<compile_context>
chip_gen: v6e
topology: v6e:2x2x1
jax: 0.10.0
libtpu: 0.0.40
codegen_flags: <defaults>
</compile_context>

<pallas_src>
import functools
import math

import jax
import jax.numpy as jnp
from jax.experimental import pallas as pl
from jax.experimental.pallas import tpu as pltpu


EXPANSION = 4  # Bottleneck.expansion


# ----------------------------------------------------------------------------
# Helpers
# ----------------------------------------------------------------------------
def _round_up(x, m):
    return (x + m - 1) // m * m


@functools.lru_cache(maxsize=1)
def _vmem_budget():
    """Generation-aware scoped-VMEM budget (bytes)."""
    try:
        cap = int(pltpu.get_tpu_info().vmem_capacity_bytes)
    except Exception:
        cap = 64 * 1024 * 1024
    if cap >= 128 * 1024 * 1024:          # v5e / v6e (128 MiB physical)
        return 96 * 1024 * 1024
    return 48 * 1024 * 1024               # v7x (64 MiB physical) or unknown


def _choose_gemm_tiles(mp, kp, np_, budget, has_resid):
    """Largest (tm, tk, tn) whose double-buffered footprint fits the budget."""
    def footprint(tm, tk, tn):
        a = 2 * tm * tk * 2               # bf16 A, double-buffered
        b = 2 * tk * tn * 2               # bf16 B, double-buffered
        o = 2 * tm * tn * 2               # bf16 output block
        acc = tm * tn * 4                 # f32 scratch accumulator
        prod = tm * tn * 4                # dot temporary
        r = 2 * tm * tn * 2 if has_resid else 0
        return a + b + o + acc + prod + r

    for tm in (512, 256, 128):
        if mp % tm:
            continue
        for tn in (1024, 512, 256, 128):
            if np_ % tn:
                continue
            for tk in (1024, 512, 256, 128):
                if kp % tk:
                    continue
                if footprint(tm, tk, tn) <= budget:
                    return tm, tk, tn
    return 128, 128, 128


def _pick_row_tile(oh, ow, target_rows=512):
    """Row-tile rt | oh so each conv3x3 grid step emits <= target_rows output rows."""
    if oh * ow <= target_rows:
        return oh
    cands = [rt for rt in range(1, oh + 1)
             if oh % rt == 0 and rt * ow <= target_rows and (rt * ow) % 8 == 0]
    return max(cands) if cands else oh


def _fold_bn(bn, eps=1e-5):
    gamma, beta, mean, var = bn
    scale = gamma * jax.lax.rsqrt(var + eps)
    return scale, beta - mean * scale


# ----------------------------------------------------------------------------
# Pallas kernels
# ----------------------------------------------------------------------------
def _mm_bn_act_kernel(*refs, relu, has_resid):
    """Tiled matmul with an f32 VMEM scratch accumulator.

    Epilogue (last k step) fuses per-column BN scale/shift, optional bf16 residual add
    (in f32) and optional ReLU, and writes the bf16 output block once.
    """
    if has_resid:
        a_ref, b_ref, s_ref, sh_ref, r_ref, o_ref, acc_ref = refs
    else:
        a_ref, b_ref, s_ref, sh_ref, o_ref, acc_ref = refs
        r_ref = None
    k = pl.program_id(2)

    prod = jnp.dot(a_ref[...], b_ref[...], preferred_element_type=jnp.float32)

    @pl.when(k == 0)
    def _():
        acc_ref[...] = prod                # no zero-fill + RMW on the first step

    @pl.when(k > 0)
    def _():
        acc_ref[...] += prod

    @pl.when(k == pl.num_programs(2) - 1)
    def _():
        out = acc_ref[...] * s_ref[...] + sh_ref[...]
        if has_resid:
            out = out + r_ref[...].astype(jnp.float32)
        if relu:
            out = jnp.maximum(out, 0.0)
        o_ref[...] = out.astype(o_ref.dtype)


def _conv3x3_bn_relu_kernel(x_ref, w_ref, s_ref, sh_ref, o_ref, *, rt, ow, stride, cin):
    """Implicit-GEMM 3x3 conv (padding=1) for one (image, row-tile) grid step.

    x_ref : (s*s, Hps, Wps, cin) phase-split zero-padded image (bf16, resident per batch)
    w_ref : (9*cin, Coutp) bf16   (tap-major: [ky][kx][cin])
    o_ref : (rt*ow, Coutp) bf16 output rows for this row tile.

    The nine shifted tap windows are concatenated along K and fed to the MXU as one
    deep matmul -> a single accumulator/store pass and good MXU fill even at small cin.
    """
    # TODO(synk): realize the dx shifts with pltpu.roll instead of sliced VMEM copies.
    row0 = pl.program_id(1) * rt
    taps = []
    for ky in range(3):
        for kx in range(3):
            ph = (ky % stride) * stride + (kx % stride)
            dy, dx = ky // stride, kx // stride
            taps.append(x_ref[ph, pl.ds(row0 + dy, rt), pl.ds(dx, ow), :])
    patches = jnp.concatenate(taps, axis=-1).reshape(rt * ow, 9 * cin)
    acc = jnp.dot(patches, w_ref[...], preferred_element_type=jnp.float32)
    out = jnp.maximum(acc * s_ref[...] + sh_ref[...], 0.0)
    o_ref[...] = out.astype(o_ref.dtype)


# ----------------------------------------------------------------------------
# Pallas wrappers
# ----------------------------------------------------------------------------
def matmul_bn_act(a, b, scale, shift, relu, residual=None):
    """act((a @ b) * scale + shift [+ residual]) -> bf16.

    a: (M, K) bf16 with K % 128 == 0.   b: (K, Np) bf16 weight, Np % 128 == 0.
    scale/shift: (1, Np) f32 (zero in padded columns).   residual: optional (M, Np) bf16.
    """
    M, K = a.shape
    Np = b.shape[1]
    assert K % 128 == 0 and Np % 128 == 0 and b.shape[0] == K

    Mp = _round_up(M, 128)
    if Mp != M:                            # pad M only when actually misaligned
        a = jnp.pad(a, ((0, Mp - M), (0, 0)))
        if residual is not None:
            residual = jnp.pad(residual, ((0, Mp - M), (0, 0)))

    budget = _vmem_budget()
    tm, tk, tn = _choose_gemm_tiles(Mp, K, Np, int(budget * 0.7),
                                    residual is not None)
    grid = (Mp // tm, Np // tn, K // tk)

    in_specs = [
        pl.BlockSpec((tm, tk), lambda i, j, k: (i, k)),
        pl.BlockSpec((tk, tn), lambda i, j, k: (k, j)),
        # block index constant along i/k: only re-fetched when the column tile changes
        pl.BlockSpec((1, tn), lambda i, j, k: (0, j)),
        pl.BlockSpec((1, tn), lambda i, j, k: (0, j)),
    ]
    operands = [a, b, scale, shift]
    if residual is not None:
        in_specs.append(pl.BlockSpec((tm, tn), lambda i, j, k: (i, j)))
        operands.append(residual)

    kernel = functools.partial(_mm_bn_act_kernel, relu=relu,
                               has_resid=residual is not None)
    out = pl.pallas_call(
        kernel,
        out_shape=jax.ShapeDtypeStruct((Mp, Np), jnp.bfloat16),
        grid_spec=pltpu.PrefetchScalarGridSpec(
            num_scalar_prefetch=0,
            grid=grid,
            in_specs=in_specs,
            out_specs=pl.BlockSpec((tm, tn), lambda i, j, k: (i, j)),
            scratch_shapes=[pltpu.VMEM((tm, tn), jnp.float32)],
        ),
        compiler_params=pltpu.CompilerParams(
            dimension_semantics=("parallel", "parallel", "arbitrary"),
            vmem_limit_bytes=budget),
    )(*operands)
    return out if Mp == M else out[:M]


def _phase_split(xp, s):
    """(N, Hp, Wp, C) -> (N, s*s, ceil(Hp/s), ceil(Wp/s), C) with
    xph[n, py*s+px, r, c] = xp[n, s*r+py, s*c+px] (contiguous tap windows for stride s)."""
    if s == 1:
        return xp[:, None]
    n, hp, wp, c = xp.shape
    hps, wps = -(-hp // s), -(-wp // s)
    xp = jnp.pad(xp, ((0, 0), (0, hps * s - hp), (0, wps * s - wp), (0, 0)))
    x6 = xp.reshape(n, hps, s, wps, s, c).transpose(0, 2, 4, 1, 3, 5)
    return x6.reshape(n, s * s, hps, wps, c)


def conv3x3_bn_relu(x, w, bn, stride):
    """3x3 conv (padding=1, bias-free) + eval-BN + ReLU.

    x: (N,H,W,Cp) bf16, channel-padded (pad region zero).  w: (3,3,cin,cout) f32.
    Returns (N,oh,ow,Coutp) bf16, Coutp = round_up(cout,128), pads exactly zero.
    """
    n, h, wd, cp = x.shape
    cin, cout = w.shape[2], w.shape[3]
    oh = (h - 1) // stride + 1
    ow = (wd - 1) // stride + 1
    coutp = _round_up(cout, 128)
    scale, shift = _fold_bn(bn)

    xp = jnp.pad(x, ((0, 0), (1, 1), (1, 1), (0, 0)))          # stays bf16
    xph = _phase_split(xp, stride)                              # (n, s*s, hps, wps, cp)
    _, nph, hps, wps, _ = xph.shape

    # Weight / scale / shift pads are tiny and constant-folded under jit; padding
    # scale AND shift with zeros keeps padded output columns exactly zero.
    w_p = jnp.pad(w, ((0, 0), (0, 0), (0, cp - cin), (0, coutp - cout)))
    w_p = w_p.reshape(9 * cp, coutp).astype(jnp.bfloat16)       # tap-major rows
    s_p = jnp.pad(scale, (0, coutp - cout)).reshape(1, coutp).astype(jnp.float32)
    sh_p = jnp.pad(shift, (0, coutp - cout)).reshape(1, coutp).astype(jnp.float32)

    rt = _pick_row_tile(oh, ow)
    nr = oh // rt
    budget = _vmem_budget()

    kernel = functools.partial(_conv3x3_bn_relu_kernel, rt=rt, ow=ow,
                               stride=stride, cin=cp)
    out = pl.pallas_call(
        kernel,
        out_shape=jax.ShapeDtypeStruct((n, oh * ow, coutp), jnp.bfloat16),
        grid_spec=pltpu.PrefetchScalarGridSpec(
            num_scalar_prefetch=0,
            grid=(n, nr),
            in_specs=[
                # whole (padded, phase-split) image: constant along the row-tile axis,
                # so it is DMA'd once per batch element and stays resident in VMEM.
                pl.BlockSpec((None, nph, hps, wps, cp), lambda b, r: (b, 0, 0, 0, 0)),
                pl.BlockSpec((9 * cp, coutp), lambda b, r: (0, 0)),
                pl.BlockSpec((1, coutp), lambda b, r: (0, 0)),
                pl.BlockSpec((1, coutp), lambda b, r: (0, 0)),
            ],
            out_specs=pl.BlockSpec((None, rt * ow, coutp), lambda b, r: (b, r, 0)),
        ),
        compiler_params=pltpu.CompilerParams(
            dimension_semantics=("parallel", "parallel"),
            vmem_limit_bytes=budget),
    )(xph, w_p, s_p, sh_p)
    return out.reshape(n, oh, ow, coutp)


def conv1x1_bn_act(x, w, bn, stride=1, relu=True, residual=None):
    """1x1 conv (bias-free) + eval-BN (+ residual + ReLU) as one fused GEMM.

    x: (N,H,W,Cp) bf16, channel-padded (pad region zero).  w: (cin, cout) f32, cin <= Cp.
    residual: optional (N,H',W',Coutp) bf16.  Returns (N,H',W',Coutp) bf16.
    """
    if stride > 1:
        # TODO(synk): fold the spatial subsample into the GEMM A BlockSpec/index_map
        # instead of a separate strided-slice pass.
        x = x[:, ::stride, ::stride, :]
    n, h, wd, cp = x.shape
    cin, cout = w.shape
    coutp = _round_up(cout, 128)
    scale, shift = _fold_bn(bn)

    w_p = jnp.pad(w, ((0, cp - cin), (0, coutp - cout))).astype(jnp.bfloat16)
    s_p = jnp.pad(scale, (0, coutp - cout)).reshape(1, coutp).astype(jnp.float32)
    sh_p = jnp.pad(shift, (0, coutp - cout)).reshape(1, coutp).astype(jnp.float32)

    a = x.reshape(n * h * wd, cp)
    r = None if residual is None else residual.reshape(n * h * wd, coutp)
    out = matmul_bn_act(a, w_p, s_p, sh_p, relu, residual=r)
    return out.reshape(n, h, wd, coutp)


# ----------------------------------------------------------------------------
# Bottleneck module (params + forward)
# ----------------------------------------------------------------------------
def init_conv(key, kh, kw, cin, cout):
    # kaiming_normal_(mode='fan_out', nonlinearity='relu')
    std = math.sqrt(2.0 / (kh * kw * cout))
    return jax.random.normal(key, (kh, kw, cin, cout), jnp.float32) * std


def init_bn(key, c):
    kg, kb, km, kv = jax.random.split(key, 4)
    gamma = jax.random.uniform(kg, (c,), jnp.float32, 0.5, 1.5)
    beta = jax.random.normal(kb, (c,), jnp.float32) * 0.1
    mean = jax.random.normal(km, (c,), jnp.float32) * 0.1
    var = jax.random.uniform(kv, (c,), jnp.float32, 0.5, 1.5)
    return (gamma, beta, mean, var)


def init_bottleneck(key, inplanes, planes, stride=1, base_width=64, groups=1):
    width = int(planes * (base_width / 64.0)) * groups
    keys = jax.random.split(key, 8)
    p = {
        'stride': stride,
        'conv1': init_conv(keys[0], 1, 1, inplanes, width)[0, 0],          # (Cin, width)
        'bn1': init_bn(keys[1], width),
        'conv2': init_conv(keys[2], 3, 3, width, width),                   # (3,3,width,width)
        'bn2': init_bn(keys[3], width),
        'conv3': init_conv(keys[4], 1, 1, width, planes * EXPANSION)[0, 0],
        'bn3': init_bn(keys[5], planes * EXPANSION),
    }
    if stride != 1 or inplanes != planes * EXPANSION:
        p['ds_conv'] = init_conv(keys[6], 1, 1, inplanes, planes * EXPANSION)[0, 0]
        p['ds_bn'] = init_bn(keys[7], planes * EXPANSION)
    return p


def _nchw_to_padded_nhwc(x_nchw):
    x = jnp.transpose(x_nchw, (0, 2, 3, 1)).astype(jnp.bfloat16)
    c = x.shape[-1]
    cp = _round_up(c, 128)
    if cp != c:
        x = jnp.pad(x, ((0, 0), (0, 0), (0, 0), (0, cp - c)))
    return x


def _padded_nhwc_to_nchw(y, cout):
    if y.shape[-1] != cout:
        y = y[..., :cout]
    return jnp.transpose(y.astype(jnp.float32), (0, 3, 1, 2))


def bottleneck_forward_nhwc(p, x):
    """x: (N,H,W,Cp) bf16 channel-padded (pads zero). Returns channel-padded bf16 NHWC."""
    stride = p['stride']
    out = conv1x1_bn_act(x, p['conv1'], p['bn1'], stride=1, relu=True)
    out = conv3x3_bn_relu(out, p['conv2'], p['bn2'], stride)
    if 'ds_conv' in p:
        identity = conv1x1_bn_act(x, p['ds_conv'], p['ds_bn'],
                                  stride=stride, relu=False)
    else:
        identity = x
    # conv3 + bn3 + residual add + ReLU, all fused in a single GEMM epilogue (bf16 out).
    return conv1x1_bn_act(out, p['conv3'], p['bn3'], stride=1, relu=True,
                          residual=identity)


def bottleneck_forward(p, x_nchw):
    """PyTorch-facing entry point for a single block: NCHW f32 in, NCHW f32 out."""
    x = _nchw_to_padded_nhwc(x_nchw)
    y = bottleneck_forward_nhwc(p, x)
    return _padded_nhwc_to_nchw(y, p['conv3'].shape[1])


# ----------------------------------------------------------------------------
# Plain-XLA reference (same bf16-activation / f32-accumulate recipe) for validation
# ----------------------------------------------------------------------------
def _ref_conv(x, w, stride, padding):
    return jax.lax.conv_general_dilated(
        x.astype(jnp.bfloat16), w.astype(jnp.bfloat16),
        window_strides=(stride, stride),
        padding=((padding, padding), (padding, padding)),
        dimension_numbers=('NHWC', 'HWIO', 'NHWC'),
        preferred_element_type=jnp.float32)


def _ref_bn(x, bn, eps=1e-5):
    gamma, beta, mean, var = bn
    scale = gamma * jax.lax.rsqrt(var + eps)
    return x * scale + (beta - mean * scale)


def bottleneck_reference_nhwc(p, x):
    """x: (N,H,W,Cin) bf16; returns bf16 NHWC (same precision recipe as the kernels)."""
    s = p['stride']
    out = jax.nn.relu(_ref_bn(_ref_conv(x, p['conv1'][None, None], 1, 0), p['bn1']))
    out = out.astype(jnp.bfloat16)
    out = jax.nn.relu(_ref_bn(_ref_conv(out, p['conv2'], s, 1), p['bn2']))
    out = out.astype(jnp.bfloat16)
    out = _ref_bn(_ref_conv(out, p['conv3'][None, None], 1, 0), p['bn3'])
    if 'ds_conv' in p:
        identity = _ref_bn(_ref_conv(x, p['ds_conv'][None, None], s, 0), p['ds_bn'])
        identity = identity.astype(jnp.bfloat16)
    else:
        identity = x
    out = jnp.maximum(out + identity.astype(jnp.float32), 0.0)
    return out.astype(jnp.bfloat16)


# ----------------------------------------------------------------------------
# Main
# ----------------------------------------------------------------------------
if __name__ == "__main__":
    key = jax.random.PRNGKey(0)
    k1, k2, kx = jax.random.split(key, 3)

    batch, inplanes, planes, spatial = 2, 64, 32, 16
    # Block 1: stride-2 Bottleneck with a conv1x1 + BN downsample shortcut.
    block1 = init_bottleneck(k1, inplanes, planes, stride=2)
    # Block 2: stride-1 Bottleneck with an identity shortcut (inplanes == planes*expansion).
    block2 = init_bottleneck(k2, planes * EXPANSION, planes, stride=1)

    x = jax.random.normal(kx, (batch, inplanes, spatial, spatial), jnp.float32)

    @jax.jit
    def model(x_nchw):
        xh = _nchw_to_padded_nhwc(x_nchw)
        y = bottleneck_forward_nhwc(block1, xh)      # activations stay padded bf16 NHWC
        y = bottleneck_forward_nhwc(block2, y)
        return _padded_nhwc_to_nchw(y, block2['conv3'].shape[1])

    out = model(x)
    jax.block_until_ready(out)

    assert out.shape == (batch, planes * EXPANSION, spatial // 2, spatial // 2)
    assert bool(jnp.all(jnp.isfinite(out)))

    @jax.jit
    def reference(x_nchw):
        xh = jnp.transpose(x_nchw, (0, 2, 3, 1)).astype(jnp.bfloat16)
        r = bottleneck_reference_nhwc(block1, xh)
        r = bottleneck_reference_nhwc(block2, r)
        return jnp.transpose(r.astype(jnp.float32), (0, 3, 1, 2))

    ref = reference(x)
    err = float(jnp.max(jnp.abs(out - ref) / (jnp.abs(ref) + 1.0)))
    assert err < 2e-2, f"max relative err vs reference: {err}"

    print("KERNEL_OK")
</pallas_src>

<mosaic_0001>
module attributes {stable_mosaic.version = 11 : i64} {
  func.func @_mm_bn_act_kernel(%arg0: i32, %arg1: i32, %arg2: i32, %arg3: memref<128x128xbf16, #tpu.memory_space<vmem>>, %arg4: memref<128x128xbf16, #tpu.memory_space<vmem>>, %arg5: memref<1x128xf32, #tpu.memory_space<vmem>>, %arg6: memref<1x128xf32, #tpu.memory_space<vmem>>, %arg7: memref<128x128xbf16, #tpu.memory_space<vmem>>, %arg8: memref<128x128xf32, #tpu.memory_space<vmem>>) attributes {dimension_semantics = [#tpu.dimension_semantics<parallel>, #tpu.dimension_semantics<parallel>, #tpu.dimension_semantics<arbitrary>], iteration_bounds = array<i64: 1, 1, 1>, scalar_prefetch = 0 : i64, scratch_operands = 1 : i64, tpu.core_type = #tpu.core_type<tc>, window_params = [{transform_indices = @transform_0, window_bounds = array<i64: 128, 128>}, {transform_indices = @transform_1, window_bounds = array<i64: 128, 128>}, {transform_indices = @transform_2, window_bounds = array<i64: 1, 128>}, {transform_indices = @transform_3, window_bounds = array<i64: 1, 128>}, {transform_indices = @transform_4, window_bounds = array<i64: 128, 128>}]} {
    %c0 = arith.constant 0 : index
    %c0_0 = arith.constant 0 : index
    %0 = vector.load %arg3[%c0, %c0_0] : memref<128x128xbf16, #tpu.memory_space<vmem>>, vector<128x128xbf16>
    %c0_1 = arith.constant 0 : index
    %c0_2 = arith.constant 0 : index
    %1 = vector.load %arg4[%c0_1, %c0_2] : memref<128x128xbf16, #tpu.memory_space<vmem>>, vector<128x128xbf16>
    %cst = arith.constant dense<0.000000e+00> : vector<128x128xf32>
    %2 = tpu.matmul %0, %1, %cst {dimension_numbers = #tpu.dot_dimension_numbers<[1], [0], [0], [1], [0, 0, 1, 1], [], []>} : vector<128x128xbf16>, vector<128x128xbf16>, vector<128x128xf32> -> vector<128x128xf32>
    %c0_i32 = arith.constant 0 : i32
    %3 = arith.cmpi eq, %arg2, %c0_i32 : i32
    %4 = arith.extui %3 : i1 to i32
    %c0_i32_3 = arith.constant 0 : i32
    %5 = arith.cmpi ne, %4, %c0_i32_3 : i32
    scf.if %5 {
      %c0_8 = arith.constant 0 : index
      %c0_9 = arith.constant 0 : index
      %12 = vector.load %arg8[%c0_8, %c0_9] : memref<128x128xf32, #tpu.memory_space<vmem>>, vector<128x128xf32>
      tpu.vector_store %arg8[%c0_8, %c0_9], %2 {strides = array<i32>} : memref<128x128xf32, #tpu.memory_space<vmem>>, vector<128x128xf32>,
    } else {
    }
    %c0_i32_4 = arith.constant 0 : i32
    %6 = arith.cmpi sgt, %arg2, %c0_i32_4 : i32
    %7 = arith.extui %6 : i1 to i32
    %c0_i32_5 = arith.constant 0 : i32
    %8 = arith.cmpi ne, %7, %c0_i32_5 : i32
    scf.if %8 {
      %c0_8 = arith.constant 0 : index
      %c0_9 = arith.constant 0 : index
      %12 = vector.load %arg8[%c0_8, %c0_9] : memref<128x128xf32, #tpu.memory_space<vmem>>, vector<128x128xf32>
      %13 = arith.addf %12, %2 : vector<128x128xf32>
      %c0_10 = arith.constant 0 : index
      %c0_11 = arith.constant 0 : index
      %14 = vector.load %arg8[%c0_10, %c0_11] : memref<128x128xf32, #tpu.memory_space<vmem>>, vector<128x128xf32>
      tpu.vector_store %arg8[%c0_10, %c0_11], %13 {strides = array<i32>} : memref<128x128xf32, #tpu.memory_space<vmem>>, vector<128x128xf32>,
    } else {
    }
    %c0_i32_6 = arith.constant 0 : i32
    %9 = arith.cmpi eq, %arg2, %c0_i32_6 : i32
    %10 = arith.extui %9 : i1 to i32
    %c0_i32_7 = arith.constant 0 : i32
    %11 = arith.cmpi ne, %10, %c0_i32_7 : i32
    scf.if %11 {
      %c0_8 = arith.constant 0 : index
      %c0_9 = arith.constant 0 : index
      %12 = vector.load %arg8[%c0_8, %c0_9] : memref<128x128xf32, #tpu.memory_space<vmem>>, vector<128x128xf32>
      %c0_10 = arith.constant 0 : index
      %c0_11 = arith.constant 0 : index
      %13 = vector.load %arg5[%c0_10, %c0_11] : memref<1x128xf32, #tpu.memory_space<vmem>>, vector<1x128xf32>
      %14 = vector.broadcast %13 : vector<1x128xf32> to vector<128x128xf32>
      %15 = arith.mulf %12, %14 : vector<128x128xf32>
      %c0_12 = arith.constant 0 : index
      %c0_13 = arith.constant 0 : index
      %16 = vector.load %arg6[%c0_12, %c0_13] : memref<1x128xf32, #tpu.memory_space<vmem>>, vector<1x128xf32>
      %17 = vector.broadcast %16 : vector<1x128xf32> to vector<128x128xf32>
      %18 = arith.addf %15, %17 : vector<128x128xf32>
      %19 = arith.truncf %18 : vector<128x128xf32> to vector<128x128xbf16>
      %c0_14 = arith.constant 0 : index
      %c0_15 = arith.constant 0 : index
      %20 = vector.load %arg7[%c0_14, %c0_15] : memref<128x128xbf16, #tpu.memory_space<vmem>>, vector<128x128xbf16>
      tpu.vector_store %arg7[%c0_14, %c0_15], %19 {strides = array<i32>} : memref<128x128xbf16, #tpu.memory_space<vmem>>, vector<128x128xbf16>,
    } else {
    }
    return
  }
  func.func @transform_0(%arg0: i32, %arg1: i32, %arg2: i32) -> (i32, i32) {
    %c0_i32 = arith.constant 0 : i32
    return %arg0, %arg2 : i32, i32
  }
  func.func @transform_1(%arg0: i32, %arg1: i32, %arg2: i32) -> (i32, i32) {
    %c0_i32 = arith.constant 0 : i32
    return %arg2, %arg1 : i32, i32
  }
  func.func @transform_2(%arg0: i32, %arg1: i32, %arg2: i32) -> (i32, i32) {
    %c0_i32 = arith.constant 0 : i32
    %c0_i32_0 = arith.constant 0 : i32
    return %c0_i32, %arg1 : i32, i32
  }
  func.func @transform_3(%arg0: i32, %arg1: i32, %arg2: i32) -> (i32, i32) {
    %c0_i32 = arith.constant 0 : i32
    %c0_i32_0 = arith.constant 0 : i32
    return %c0_i32, %arg1 : i32, i32
  }
  func.func @transform_4(%arg0: i32, %arg1: i32, %arg2: i32) -> (i32, i32) {
    %c0_i32 = arith.constant 0 : i32
    return %arg0, %arg1 : i32, i32
  }
}

module attributes {stable_mosaic.version = 11 : i64} {
  func.func @_mm_bn_act_kernel(%arg0: i32, %arg1: i32, %arg2: i32, %arg3: memref<512x128xbf16, #tpu.memory_space<vmem>>, %arg4: memref<128x128xbf16, #tpu.memory_space<vmem>>, %arg5: memref<1x128xf32, #tpu.memory_space<vmem>>, %arg6: memref<1x128xf32, #tpu.memory_space<vmem>>, %arg7: memref<512x128xbf16, #tpu.memory_space<vmem>>, %arg8: memref<512x128xf32, #tpu.memory_space<vmem>>) attributes {dimension_semantics = [#tpu.dimension_semantics<parallel>, #tpu.dimension_semantics<parallel>, #tpu.dimension_semantics<arbitrary>], iteration_bounds = array<i64: 1, 1, 1>, scalar_prefetch = 0 : i64, scratch_operands = 1 : i64, tpu.core_type = #tpu.core_type<tc>, window_params = [{transform_indices = @transform_0, window_bounds = array<i64: 512, 128>}, {transform_indices = @transform_1, window_bounds = array<i64: 128, 128>}, {transform_indices = @transform_2, window_bounds = array<i64: 1, 128>}, {transform_indices = @transform_3, window_bounds = array<i64: 1, 128>}, {transform_indices = @transform_4, window_bounds = array<i64: 512, 128>}]} {
    %c0 = arith.constant 0 : index
    %c0_0 = arith.constant 0 : index
    %0 = vector.load %arg3[%c0, %c0_0] : memref<512x128xbf16, #tpu.memory_space<vmem>>, vector<512x128xbf16>
    %c0_1 = arith.constant 0 : index
    %c0_2 = arith.constant 0 : index
    %1 = vector.load %arg4[%c0_1, %c0_2] : memref<128x128xbf16, #tpu.memory_space<vmem>>, vector<128x128xbf16>
    %cst = arith.constant dense<0.000000e+00> : vector<512x128xf32>
    %2 = tpu.matmul %0, %1, %cst {dimension_numbers = #tpu.dot_dimension_numbers<[1], [0], [0], [1], [0, 0, 1, 1], [], []>} : vector<512x128xbf16>, vector<128x128xbf16>, vector<512x128xf32> -> vector<512x128xf32>
    %c0_i32 = arith.constant 0 : i32
    %3 = arith.cmpi eq, %arg2, %c0_i32 : i32
    %4 = arith.extui %3 : i1 to i32
    %c0_i32_3 = arith.constant 0 : i32
    %5 = arith.cmpi ne, %4, %c0_i32_3 : i32
    scf.if %5 {
      %c0_8 = arith.constant 0 : index
      %c0_9 = arith.constant 0 : index
      %12 = vector.load %arg8[%c0_8, %c0_9] : memref<512x128xf32, #tpu.memory_space<vmem>>, vector<512x128xf32>
      tpu.vector_store %arg8[%c0_8, %c0_9], %2 {strides = array<i32>} : memref<512x128xf32, #tpu.memory_space<vmem>>, vector<512x128xf32>,
    } else {
    }
    %c0_i32_4 = arith.constant 0 : i32
    %6 = arith.cmpi sgt, %arg2, %c0_i32_4 : i32
    %7 = arith.extui %6 : i1 to i32
    %c0_i32_5 = arith.constant 0 : i32
    %8 = arith.cmpi ne, %7, %c0_i32_5 : i32
    scf.if %8 {
      %c0_8 = arith.constant 0 : index
      %c0_9 = arith.constant 0 : index
      %12 = vector.load %arg8[%c0_8, %c0_9] : memref<512x128xf32, #tpu.memory_space<vmem>>, vector<512x128xf32>
      %13 = arith.addf %12, %2 : vector<512x128xf32>
      %c0_10 = arith.constant 0 : index
      %c0_11 = arith.constant 0 : index
      %14 = vector.load %arg8[%c0_10, %c0_11] : memref<512x128xf32, #tpu.memory_space<vmem>>, vector<512x128xf32>
      tpu.vector_store %arg8[%c0_10, %c0_11], %13 {strides = array<i32>} : memref<512x128xf32, #tpu.memory_space<vmem>>, vector<512x128xf32>,
    } else {
    }
    %c0_i32_6 = arith.constant 0 : i32
    %9 = arith.cmpi eq, %arg2, %c0_i32_6 : i32
    %10 = arith.extui %9 : i1 to i32
    %c0_i32_7 = arith.constant 0 : i32
    %11 = arith.cmpi ne, %10, %c0_i32_7 : i32
    scf.if %11 {
      %c0_8 = arith.constant 0 : index
      %c0_9 = arith.constant 0 : index
      %12 = vector.load %arg8[%c0_8, %c0_9] : memref<512x128xf32, #tpu.memory_space<vmem>>, vector<512x128xf32>
      %c0_10 = arith.constant 0 : index
      %c0_11 = arith.constant 0 : index
      %13 = vector.load %arg5[%c0_10, %c0_11] : memref<1x128xf32, #tpu.memory_space<vmem>>, vector<1x128xf32>
      %14 = vector.broadcast %13 : vector<1x128xf32> to vector<512x128xf32>
      %15 = arith.mulf %12, %14 : vector<512x128xf32>
      %c0_12 = arith.constant 0 : index
      %c0_13 = arith.constant 0 : index
      %16 = vector.load %arg6[%c0_12, %c0_13] : memref<1x128xf32, #tpu.memory_space<vmem>>, vector<1x128xf32>
      %17 = vector.broadcast %16 : vector<1x128xf32> to vector<512x128xf32>
      %18 = arith.addf %15, %17 : vector<512x128xf32>
      %cst_14 = arith.constant 0.000000e+00 : f32
      %19 = vector.broadcast %cst_14 : f32 to vector<512x128xf32>
      %20 = arith.maximumf %18, %19 : vector<512x128xf32>
      %21 = arith.truncf %20 : vector<512x128xf32> to vector<512x128xbf16>
      %c0_15 = arith.constant 0 : index
      %c0_16 = arith.constant 0 : index
      %22 = vector.load %arg7[%c0_15, %c0_16] : memref<512x128xbf16, #tpu.memory_space<vmem>>, vector<512x128xbf16>
      tpu.vector_store %arg7[%c0_15, %c0_16], %21 {strides = array<i32>} : memref<512x128xbf16, #tpu.memory_space<vmem>>, vector<512x128xbf16>,
    } else {
    }
    return
  }
  func.func @transform_0(%arg0: i32, %arg1: i32, %arg2: i32) -> (i32, i32) {
    %c0_i32 = arith.constant 0 : i32
    return %arg0, %arg2 : i32, i32
  }
  func.func @transform_1(%arg0: i32, %arg1: i32, %arg2: i32) -> (i32, i32) {
    %c0_i32 = arith.constant 0 : i32
    return %arg2, %arg1 : i32, i32
  }
  func.func @transform_2(%arg0: i32, %arg1: i32, %arg2: i32) -> (i32, i32) {
    %c0_i32 = arith.constant 0 : i32
    %c0_i32_0 = arith.constant 0 : i32
    return %c0_i32, %arg1 : i32, i32
  }
  func.func @transform_3(%arg0: i32, %arg1: i32, %arg2: i32) -> (i32, i32) {
    %c0_i32 = arith.constant 0 : i32
    %c0_i32_0 = arith.constant 0 : i32
    return %c0_i32, %arg1 : i32, i32
  }
  func.func @transform_4(%arg0: i32, %arg1: i32, %arg2: i32) -> (i32, i32) {
    %c0_i32 = arith.constant 0 : i32
    return %arg0, %arg1 : i32, i32
  }
}

module attributes {stable_mosaic.version = 11 : i64} {
  func.func @_conv3x3_bn_relu_kernel(%arg0: i32, %arg1: i32, %arg2: memref<1x4x9x9x128xbf16, #tpu.memory_space<vmem>>, %arg3: memref<1152x128xbf16, #tpu.memory_space<vmem>>, %arg4: memref<1x128xf32, #tpu.memory_space<vmem>>, %arg5: memref<1x128xf32, #tpu.memory_space<vmem>>, %arg6: memref<1x64x128xbf16, #tpu.memory_space<vmem>>) attributes {dimension_semantics = [#tpu.dimension_semantics<parallel>, #tpu.dimension_semantics<parallel>], iteration_bounds = array<i64: 2, 1>, scalar_prefetch = 0 : i64, scratch_operands = 0 : i64, tpu.core_type = #tpu.core_type<tc>, window_params = [{transform_indices = @transform_0, window_bounds = array<i64: 1, 4, 9, 9, 128>}, {pipeline_mode = #tpu.pipeline_mode<synchronous>, transform_indices = @transform_1, window_bounds = array<i64: 1152, 128>}, {pipeline_mode = #tpu.pipeline_mode<synchronous>, transform_indices = @transform_2, window_bounds = array<i64: 1, 128>}, {pipeline_mode = #tpu.pipeline_mode<synchronous>, transform_indices = @transform_3, window_bounds = array<i64: 1, 128>}, {transform_indices = @transform_4, window_bounds = array<i64: 1, 64, 128>}]} {
    %c8_i32 = arith.constant 8 : i32
    %0 = arith.muli %arg1, %c8_i32 : i32
    %c0_i32 = arith.constant 0 : i32
    %1 = arith.addi %0, %c0_i32 : i32
    %c0 = arith.constant 0 : index
    %c0_0 = arith.constant 0 : index
    %2 = arith.index_cast %1 : i32 to index
    %c0_1 = arith.constant 0 : index
    %c0_2 = arith.constant 0 : index
    %3 = vector.load %arg2[%c0, %c0_0, %2, %c0_1, %c0_2] : memref<1x4x9x9x128xbf16, #tpu.memory_space<vmem>>, vector<1x1x8x8x128xbf16>
    %4 = vector.shape_cast %3 : vector<1x1x8x8x128xbf16> to vector<8x8x128xbf16>
    %c0_i32_3 = arith.constant 0 : i32
    %5 = arith.addi %0, %c0_i32_3 : i32
    %c0_4 = arith.constant 0 : index
    %c1 = arith.constant 1 : index
    %6 = arith.index_cast %5 : i32 to index
    %c0_5 = arith.constant 0 : index
    %c0_6 = arith.constant 0 : index
    %7 = vector.load %arg2[%c0_4, %c1, %6, %c0_5, %c0_6] : memref<1x4x9x9x128xbf16, #tpu.memory_space<vmem>>, vector<1x1x8x8x128xbf16>
    %8 = vector.shape_cast %7 : vector<1x1x8x8x128xbf16> to vector<8x8x128xbf16>
    %c0_i32_7 = arith.constant 0 : i32
    %9 = arith.addi %0, %c0_i32_7 : i32
    %c0_8 = arith.constant 0 : index
    %c0_9 = arith.constant 0 : index
    %10 = arith.index_cast %9 : i32 to index
    %c1_10 = arith.constant 1 : index
    %c0_11 = arith.constant 0 : index
    %11 = vector.load %arg2[%c0_8, %c0_9, %10, %c1_10, %c0_11] : memref<1x4x9x9x128xbf16, #tpu.memory_space<vmem>>, vector<1x1x8x8x128xbf16>
    %12 = vector.shape_cast %11 : vector<1x1x8x8x128xbf16> to vector<8x8x128xbf16>
    %c0_i32_12 = arith.constant 0 : i32
    %13 = arith.addi %0, %c0_i32_12 : i32
    %c0_13 = arith.constant 0 : index
    %c2 = arith.constant 2 : index
    %14 = arith.index_cast %13 : i32 to index
    %c0_14 = arith.constant 0 : index
    %c0_15 = arith.constant 0 : index
    %15 = vector.load %arg2[%c0_13, %c2, %14, %c0_14, %c0_15] : memref<1x4x9x9x128xbf16, #tpu.memory_space<vmem>>, vector<1x1x8x8x128xbf16>
    %16 = vector.shape_cast %15 : vector<1x1x8x8x128xbf16> to vector<8x8x128xbf16>
    %c0_i32_16 = arith.constant 0 : i32
    %17 = arith.addi %0, %c0_i32_16 : i32
    %c0_17 = arith.constant 0 : index
    %c3 = arith.constant 3 : index
    %18 = arith.index_cast %17 : i32 to index
    %c0_18 = arith.constant 0 : index
    %c0_19 = arith.constant 0 : index
    %19 = vector.load %arg2[%c0_17, %c3, %18, %c0_18, %c0_19] : memref<1x4x9x9x128xbf16, #tpu.memory_space<vmem>>, vector<1x1x8x8x128xbf16>
    %20 = vector.shape_cast %19 : vector<1x1x8x8x128xbf16> to vector<8x8x128xbf16>
    %c0_i32_20 = arith.constant 0 : i32
    %21 = arith.addi %0, %c0_i32_20 : i32
    %c0_21 = arith.constant 0 : index
    %c2_22 = arith.constant 2 : index
    %22 = arith.index_cast %21 : i32 to index
    %c1_23 = arith.constant 1 : index
    %c0_24 = arith.constant 0 : index
    %23 = vector.load %arg2[%c0_21, %c2_22, %22, %c1_23, %c0_24] : memref<1x4x9x9x128xbf16, #tpu.memory_space<vmem>>, vector<1x1x8x8x128xbf16>
    %24 = vector.shape_cast %23 : vector<1x1x8x8x128xbf16> to vector<8x8x128xbf16>
    %c1_i32 = arith.constant 1 : i32
    %25 = arith.addi %0, %c1_i32 : i32
    %c0_25 = arith.constant 0 : index
    %c0_26 = arith.constant 0 : index
    %26 = arith.index_cast %25 : i32 to index
    %c0_27 = arith.constant 0 : index
    %c0_28 = arith.constant 0 : index
    %27 = vector.load %arg2[%c0_25, %c0_26, %26, %c0_27, %c0_28] : memref<1x4x9x9x128xbf16, #tpu.memory_space<vmem>>, vector<1x1x8x8x128xbf16>
    %28 = vector.shape_cast %27 : vector<1x1x8x8x128xbf16> to vector<8x8x128xbf16>
    %c1_i32_29 = arith.constant 1 : i32
    %29 = arith.addi %0, %c1_i32_29 : i32
    %c0_30 = arith.constant 0 : index
    %c1_31 = arith.constant 1 : index
    %30 = arith.index_cast %29 : i32 to index
    %c0_32 = arith.constant 0 : index
    %c0_33 = arith.constant 0 : index
    %31 = vector.load %arg2[%c0_30, %c1_31, %30, %c0_32, %c0_33] : memref<1x4x9x9x128xbf16, #tpu.memory_space<vmem>>, vector<1x1x8x8x128xbf16>
    %32 = vector.shape_cast %31 : vector<1x1x8x8x128xbf16> to vector<8x8x128xbf16>
    %c1_i32_34 = arith.constant 1 : i32
    %33 = arith.addi %0, %c1_i32_34 : i32
    %c0_35 = arith.constant 0 : index
    %c0_36 = arith.constant 0 : index
    %34 = arith.index_cast %33 : i32 to index
    %c1_37 = arith.constant 1 : index
    %c0_38 = arith.constant 0 : index
    %35 = vector.load %arg2[%c0_35, %c0_36, %34, %c1_37, %c0_38] : memref<1x4x9x9x128xbf16, #tpu.memory_space<vmem>>, vector<1x1x8x8x128xbf16>
    %36 = vector.shape_cast %35 : vector<1x1x8x8x128xbf16> to vector<8x8x128xbf16>
    %37 = tpu.concatenate %4, %8, %12, %16, %20, %24, %28, %32, %36 in 2 : vector<8x8x128xbf16>, vector<8x8x128xbf16>, vector<8x8x128xbf16>, vector<8x8x128xbf16>, vector<8x8x128xbf16>, vector<8x8x128xbf16>, vector<8x8x128xbf16>, vector<8x8x128xbf16>, vector<8x8x128xbf16> -> vector<8x8x1152xbf16>
    %38 = vector.shape_cast %37 : vector<8x8x1152xbf16> to vector<64x1152xbf16>
    %c0_39 = arith.constant 0 : index
    %c0_40 = arith.constant 0 : index
    %39 = vector.load %arg3[%c0_39, %c0_40] : memref<1152x128xbf16, #tpu.memory_space<vmem>>, vector<1152x128xbf16>
    %cst = arith.constant dense<0.000000e+00> : vector<64x128xf32>
    %40 = tpu.matmul %38, %39, %cst {dimension_numbers = #tpu.dot_dimension_numbers<[1], [0], [0], [1], [0, 0, 1, 1], [], []>} : vector<64x1152xbf16>, vector<1152x128xbf16>, vector<64x128xf32> -> vector<64x128xf32>
    %c0_41 = arith.constant 0 : index
    %c0_42 = arith.constant 0 : index
    %41 = vector.load %arg4[%c0_41, %c0_42] : memref<1x128xf32, #tpu.memory_space<vmem>>, vector<1x128xf32>
    %42 = vector.broadcast %41 : vector<1x128xf32> to vector<64x128xf32>
    %43 = arith.mulf %40, %42 : vector<64x128xf32>
    %c0_43 = arith.constant 0 : index
    %c0_44 = arith.constant 0 : index
    %44 = vector.load %arg5[%c0_43, %c0_44] : memref<1x128xf32, #tpu.memory_space<vmem>>, vector<1x128xf32>
    %45 = vector.broadcast %44 : vector<1x128xf32> to vector<64x128xf32>
    %46 = arith.addf %43, %45 : vector<64x128xf32>
    %cst_45 = arith.constant 0.000000e+00 : f32
    %47 = vector.broadcast %cst_45 : f32 to vector<64x128xf32>
    %48 = arith.maximumf %46, %47 : vector<64x128xf32>
    %49 = arith.truncf %48 : vector<64x128xf32> to vector<64x128xbf16>
    %c0_46 = arith.constant 0 : index
    %c0_47 = arith.constant 0 : index
    %c0_48 = arith.constant 0 : index
    %50 = vector.load %arg6[%c0_46, %c0_47, %c0_48] : memref<1x64x128xbf16, #tpu.memory_space<vmem>>, vector<1x64x128xbf16>
    %51 = vector.shape_cast %50 : vector<1x64x128xbf16> to vector<64x128xbf16>
    %52 = vector.shape_cast %49 : vector<64x128xbf16> to vector<1x64x128xbf16>
    tpu.vector_store %arg6[%c0_46, %c0_47, %c0_48], %52 {strides = array<i32>} : memref<1x64x128xbf16, #tpu.memory_space<vmem>>, vector<1x64x128xbf16>,
    return
  }
  func.func @transform_0(%arg0: i32, %arg1: i32) -> (i32, i32, i32, i32, i32) {
    %c0_i32 = arith.constant 0 : i32
    %c0_i32_0 = arith.constant 0 : i32
    %c0_i32_1 = arith.constant 0 : i32
    %c0_i32_2 = arith.constant 0 : i32
    %c0_i32_3 = arith.constant 0 : i32
    return %arg0, %c0_i32, %c0_i32_0, %c0_i32_1, %c0_i32_2 : i32, i32, i32, i32, i32
  }
  func.func @transform_1(%arg0: i32, %arg1: i32) -> (i32, i32) {
    %c0_i32 = arith.constant 0 : i32
    %c0_i32_0 = arith.constant 0 : i32
    %c0_i32_1 = arith.constant 0 : i32
    return %c0_i32, %c0_i32_0 : i32, i32
  }
  func.func @transform_2(%arg0: i32, %arg1: i32) -> (i32, i32) {
    %c0_i32 = arith.constant 0 : i32
    %c0_i32_0 = arith.constant 0 : i32
    %c0_i32_1 = arith.constant 0 : i32
    return %c0_i32, %c0_i32_0 : i32, i32
  }
  func.func @transform_3(%arg0: i32, %arg1: i32) -> (i32, i32) {
    %c0_i32 = arith.constant 0 : i32
    %c0_i32_0 = arith.constant 0 : i32
    %c0_i32_1 = arith.constant 0 : i32
    return %c0_i32, %c0_i32_0 : i32, i32
  }
  func.func @transform_4(%arg0: i32, %arg1: i32) -> (i32, i32, i32) {
    %c0_i32 = arith.constant 0 : i32
    %c0_i32_0 = arith.constant 0 : i32
    return %arg0, %arg1, %c0_i32 : i32, i32, i32
  }
}

module attributes {stable_mosaic.version = 11 : i64} {
  func.func @_mm_bn_act_kernel(%arg0: i32, %arg1: i32, %arg2: i32, %arg3: memref<128x128xbf16, #tpu.memory_space<vmem>>, %arg4: memref<128x128xbf16, #tpu.memory_space<vmem>>, %arg5: memref<1x128xf32, #tpu.memory_space<vmem>>, %arg6: memref<1x128xf32, #tpu.memory_space<vmem>>, %arg7: memref<128x128xbf16, #tpu.memory_space<vmem>>, %arg8: memref<128x128xbf16, #tpu.memory_space<vmem>>, %arg9: memref<128x128xf32, #tpu.memory_space<vmem>>) attributes {dimension_semantics = [#tpu.dimension_semantics<parallel>, #tpu.dimension_semantics<parallel>, #tpu.dimension_semantics<arbitrary>], iteration_bounds = array<i64: 1, 1, 1>, scalar_prefetch = 0 : i64, scratch_operands = 1 : i64, tpu.core_type = #tpu.core_type<tc>, window_params = [{transform_indices = @transform_0, window_bounds = array<i64: 128, 128>}, {transform_indices = @transform_1, window_bounds = array<i64: 128, 128>}, {transform_indices = @transform_2, window_bounds = array<i64: 1, 128>}, {transform_indices = @transform_3, window_bounds = array<i64: 1, 128>}, {transform_indices = @transform_4, window_bounds = array<i64: 128, 128>}, {transform_indices = @transform_5, window_bounds = array<i64: 128, 128>}]} {
    %c0 = arith.constant 0 : index
    %c0_0 = arith.constant 0 : index
    %0 = vector.load %arg3[%c0, %c0_0] : memref<128x128xbf16, #tpu.memory_space<vmem>>, vector<128x128xbf16>
    %c0_1 = arith.constant 0 : index
    %c0_2 = arith.constant 0 : index
    %1 = vector.load %arg4[%c0_1, %c0_2] : memref<128x128xbf16, #tpu.memory_space<vmem>>, vector<128x128xbf16>
    %cst = arith.constant dense<0.000000e+00> : vector<128x128xf32>
    %2 = tpu.matmul %0, %1, %cst {dimension_numbers = #tpu.dot_dimension_numbers<[1], [0], [0], [1], [0, 0, 1, 1], [], []>} : vector<128x128xbf16>, vector<128x128xbf16>, vector<128x128xf32> -> vector<128x128xf32>
    %c0_i32 = arith.constant 0 : i32
    %3 = arith.cmpi eq, %arg2, %c0_i32 : i32
    %4 = arith.extui %3 : i1 to i32
    %c0_i32_3 = arith.constant 0 : i32
    %5 = arith.cmpi ne, %4, %c0_i32_3 : i32
    scf.if %5 {
      %c0_8 = arith.constant 0 : index
      %c0_9 = arith.constant 0 : index
      %12 = vector.load %arg9[%c0_8, %c0_9] : memref<128x128xf32, #tpu.memory_space<vmem>>, vector<128x128xf32>
      tpu.vector_store %arg9[%c0_8, %c0_9], %2 {strides = array<i32>} : memref<128x128xf32, #tpu.memory_space<vmem>>, vector<128x128xf32>,
    } else {
    }
    %c0_i32_4 = arith.constant 0 : i32
    %6 = arith.cmpi sgt, %arg2, %c0_i32_4 : i32
    %7 = arith.extui %6 : i1 to i32
    %c0_i32_5 = arith.constant 0 : i32
    %8 = arith.cmpi ne, %7, %c0_i32_5 : i32
    scf.if %8 {
      %c0_8 = arith.constant 0 : index
      %c0_9 = arith.constant 0 : index
      %12 = vector.load %arg9[%c0_8, %c0_9] : memref<128x128xf32, #tpu.memory_space<vmem>>, vector<128x128xf32>
      %13 = arith.addf %12, %2 : vector<128x128xf32>
      %c0_10 = arith.constant 0 : index
      %c0_11 = arith.constant 0 : index
      %14 = vector.load %arg9[%c0_10, %c0_11] : memref<128x128xf32, #tpu.memory_space<vmem>>, vector<128x128xf32>
      tpu.vector_store %arg9[%c0_10, %c0_11], %13 {strides = array<i32>} : memref<128x128xf32, #tpu.memory_space<vmem>>, vector<128x128xf32>,
    } else {
    }
    %c0_i32_6 = arith.constant 0 : i32
    %9 = arith.cmpi eq, %arg2, %c0_i32_6 : i32
    %10 = arith.extui %9 : i1 to i32
    %c0_i32_7 = arith.constant 0 : i32
    %11 = arith.cmpi ne, %10, %c0_i32_7 : i32
    scf.if %11 {
      %c0_8 = arith.constant 0 : index
      %c0_9 = arith.constant 0 : index
      %12 = vector.load %arg9[%c0_8, %c0_9] : memref<128x128xf32, #tpu.memory_space<vmem>>, vector<128x128xf32>
      %c0_10 = arith.constant 0 : index
      %c0_11 = arith.constant 0 : index
      %13 = vector.load %arg5[%c0_10, %c0_11] : memref<1x128xf32, #tpu.memory_space<vmem>>, vector<1x128xf32>
      %14 = vector.broadcast %13 : vector<1x128xf32> to vector<128x128xf32>
      %15 = arith.mulf %12, %14 : vector<128x128xf32>
      %c0_12 = arith.constant 0 : index
      %c0_13 = arith.constant 0 : index
      %16 = vector.load %arg6[%c0_12, %c0_13] : memref<1x128xf32, #tpu.memory_space<vmem>>, vector<1x128xf32>
      %17 = vector.broadcast %16 : vector<1x128xf32> to vector<128x128xf32>
      %18 = arith.addf %15, %17 : vector<128x128xf32>
      %c0_14 = arith.constant 0 : index
      %c0_15 = arith.constant 0 : index
      %19 = vector.load %arg7[%c0_14, %c0_15] : memref<128x128xbf16, #tpu.memory_space<vmem>>, vector<128x128xbf16>
      %20 = arith.extf %19 : vector<128x128xbf16> to vector<128x128xf32>
      %21 = arith.addf %18, %20 : vector<128x128xf32>
      %cst_16 = arith.constant 0.000000e+00 : f32
      %22 = vector.broadcast %cst_16 : f32 to vector<128x128xf32>
      %23 = arith.maximumf %21, %22 : vector<128x128xf32>
      %24 = arith.truncf %23 : vector<128x128xf32> to vector<128x128xbf16>
      %c0_17 = arith.constant 0 : index
      %c0_18 = arith.constant 0 : index
      %25 = vector.load %arg8[%c0_17, %c0_18] : memref<128x128xbf16, #tpu.memory_space<vmem>>, vector<128x128xbf16>
      tpu.vector_store %arg8[%c0_17, %c0_18], %24 {strides = array<i32>} : memref<128x128xbf16, #tpu.memory_space<vmem>>, vector<128x128xbf16>,
    } else {
    }
    return
  }
  func.func @transform_0(%arg0: i32, %arg1: i32, %arg2: i32) -> (i32, i32) {
    %c0_i32 = arith.constant 0 : i32
    return %arg0, %arg2 : i32, i32
  }
  func.func @transform_1(%arg0: i32, %arg1: i32, %arg2: i32) -> (i32, i32) {
    %c0_i32 = arith.constant 0 : i32
    return %arg2, %arg1 : i32, i32
  }
  func.func @transform_2(%arg0: i32, %arg1: i32, %arg2: i32) -> (i32, i32) {
    %c0_i32 = arith.constant 0 : i32
    %c0_i32_0 = arith.constant 0 : i32
    return %c0_i32, %arg1 : i32, i32
  }
  func.func @transform_3(%arg0: i32, %arg1: i32, %arg2: i32) -> (i32, i32) {
    %c0_i32 = arith.constant 0 : i32
    %c0_i32_0 = arith.constant 0 : i32
    return %c0_i32, %arg1 : i32, i32
  }
  func.func @transform_4(%arg0: i32, %arg1: i32, %arg2: i32) -> (i32, i32) {
    %c0_i32 = arith.constant 0 : i32
    return %arg0, %arg1 : i32, i32
  }
  func.func @transform_5(%arg0: i32, %arg1: i32, %arg2: i32) -> (i32, i32) {
    %c0_i32 = arith.constant 0 : i32
    return %arg0, %arg1 : i32, i32
  }
}

module attributes {stable_mosaic.version = 11 : i64} {
  func.func @_mm_bn_act_kernel(%arg0: i32, %arg1: i32, %arg2: i32, %arg3: memref<128x128xbf16, #tpu.memory_space<vmem>>, %arg4: memref<128x128xbf16, #tpu.memory_space<vmem>>, %arg5: memref<1x128xf32, #tpu.memory_space<vmem>>, %arg6: memref<1x128xf32, #tpu.memory_space<vmem>>, %arg7: memref<128x128xbf16, #tpu.memory_space<vmem>>, %arg8: memref<128x128xf32, #tpu.memory_space<vmem>>) attributes {dimension_semantics = [#tpu.dimension_semantics<parallel>, #tpu.dimension_semantics<parallel>, #tpu.dimension_semantics<arbitrary>], iteration_bounds = array<i64: 1, 1, 1>, scalar_prefetch = 0 : i64, scratch_operands = 1 : i64, tpu.core_type = #tpu.core_type<tc>, window_params = [{transform_indices = @transform_0, window_bounds = array<i64: 128, 128>}, {transform_indices = @transform_1, window_bounds = array<i64: 128, 128>}, {transform_indices = @transform_2, window_bounds = array<i64: 1, 128>}, {transform_indices = @transform_3, window_bounds = array<i64: 1, 128>}, {transform_indices = @transform_4, window_bounds = array<i64: 128, 128>}]} {
    %c0 = arith.constant 0 : index
    %c0_0 = arith.constant 0 : index
    %0 = vector.load %arg3[%c0, %c0_0] : memref<128x128xbf16, #tpu.memory_space<vmem>>, vector<128x128xbf16>
    %c0_1 = arith.constant 0 : index
    %c0_2 = arith.constant 0 : index
    %1 = vector.load %arg4[%c0_1, %c0_2] : memref<128x128xbf16, #tpu.memory_space<vmem>>, vector<128x128xbf16>
    %cst = arith.constant dense<0.000000e+00> : vector<128x128xf32>
    %2 = tpu.matmul %0, %1, %cst {dimension_numbers = #tpu.dot_dimension_numbers<[1], [0], [0], [1], [0, 0, 1, 1], [], []>} : vector<128x128xbf16>, vector<128x128xbf16>, vector<128x128xf32> -> vector<128x128xf32>
    %c0_i32 = arith.constant 0 : i32
    %3 = arith.cmpi eq, %arg2, %c0_i32 : i32
    %4 = arith.extui %3 : i1 to i32
    %c0_i32_3 = arith.constant 0 : i32
    %5 = arith.cmpi ne, %4, %c0_i32_3 : i32
    scf.if %5 {
      %c0_8 = arith.constant 0 : index
      %c0_9 = arith.constant 0 : index
      %12 = vector.load %arg8[%c0_8, %c0_9] : memref<128x128xf32, #tpu.memory_space<vmem>>, vector<128x128xf32>
      tpu.vector_store %arg8[%c0_8, %c0_9], %2 {strides = array<i32>} : memref<128x128xf32, #tpu.memory_space<vmem>>, vector<128x128xf32>,
    } else {
    }
    %c0_i32_4 = arith.constant 0 : i32
    %6 = arith.cmpi sgt, %arg2, %c0_i32_4 : i32
    %7 = arith.extui %6 : i1 to i32
    %c0_i32_5 = arith.constant 0 : i32
    %8 = arith.cmpi ne, %7, %c0_i32_5 : i32
    scf.if %8 {
      %c0_8 = arith.constant 0 : index
      %c0_9 = arith.constant 0 : index
      %12 = vector.load %arg8[%c0_8, %c0_9] : memref<128x128xf32, #tpu.memory_space<vmem>>, vector<128x128xf32>
      %13 = arith.addf %12, %2 : vector<128x128xf32>
      %c0_10 = arith.constant 0 : index
      %c0_11 = arith.constant 0 : index
      %14 = vector.load %arg8[%c0_10, %c0_11] : memref<128x128xf32, #tpu.memory_space<vmem>>, vector<128x128xf32>
      tpu.vector_store %arg8[%c0_10, %c0_11], %13 {strides = array<i32>} : memref<128x128xf32, #tpu.memory_space<vmem>>, vector<128x128xf32>,
    } else {
    }
    %c0_i32_6 = arith.constant 0 : i32
    %9 = arith.cmpi eq, %arg2, %c0_i32_6 : i32
    %10 = arith.extui %9 : i1 to i32
    %c0_i32_7 = arith.constant 0 : i32
    %11 = arith.cmpi ne, %10, %c0_i32_7 : i32
    scf.if %11 {
      %c0_8 = arith.constant 0 : index
      %c0_9 = arith.constant 0 : index
      %12 = vector.load %arg8[%c0_8, %c0_9] : memref<128x128xf32, #tpu.memory_space<vmem>>, vector<128x128xf32>
      %c0_10 = arith.constant 0 : index
      %c0_11 = arith.constant 0 : index
      %13 = vector.load %arg5[%c0_10, %c0_11] : memref<1x128xf32, #tpu.memory_space<vmem>>, vector<1x128xf32>
      %14 = vector.broadcast %13 : vector<1x128xf32> to vector<128x128xf32>
      %15 = arith.mulf %12, %14 : vector<128x128xf32>
      %c0_12 = arith.constant 0 : index
      %c0_13 = arith.constant 0 : index
      %16 = vector.load %arg6[%c0_12, %c0_13] : memref<1x128xf32, #tpu.memory_space<vmem>>, vector<1x128xf32>
      %17 = vector.broadcast %16 : vector<1x128xf32> to vector<128x128xf32>
      %18 = arith.addf %15, %17 : vector<128x128xf32>
      %cst_14 = arith.constant 0.000000e+00 : f32
      %19 = vector.broadcast %cst_14 : f32 to vector<128x128xf32>
      %20 = arith.maximumf %18, %19 : vector<128x128xf32>
      %21 = arith.truncf %20 : vector<128x128xf32> to vector<128x128xbf16>
      %c0_15 = arith.constant 0 : index
      %c0_16 = arith.constant 0 : index
      %22 = vector.load %arg7[%c0_15, %c0_16] : memref<128x128xbf16, #tpu.memory_space<vmem>>, vector<128x128xbf16>
      tpu.vector_store %arg7[%c0_15, %c0_16], %21 {strides = array<i32>} : memref<128x128xbf16, #tpu.memory_space<vmem>>, vector<128x128xbf16>,
    } else {
    }
    return
  }
  func.func @transform_0(%arg0: i32, %arg1: i32, %arg2: i32) -> (i32, i32) {
    %c0_i32 = arith.constant 0 : i32
    return %arg0, %arg2 : i32, i32
  }
  func.func @transform_1(%arg0: i32, %arg1: i32, %arg2: i32) -> (i32, i32) {
    %c0_i32 = arith.constant 0 : i32
    return %arg2, %arg1 : i32, i32
  }
  func.func @transform_2(%arg0: i32, %arg1: i32, %arg2: i32) -> (i32, i32) {
    %c0_i32 = arith.constant 0 : i32
    %c0_i32_0 = arith.constant 0 : i32
    return %c0_i32, %arg1 : i32, i32
  }
  func.func @transform_3(%arg0: i32, %arg1: i32, %arg2: i32) -> (i32, i32) {
    %c0_i32 = arith.constant 0 : i32
    %c0_i32_0 = arith.constant 0 : i32
    return %c0_i32, %arg1 : i32, i32
  }
  func.func @transform_4(%arg0: i32, %arg1: i32, %arg2: i32) -> (i32, i32) {
    %c0_i32 = arith.constant 0 : i32
    return %arg0, %arg1 : i32, i32
  }
}

module attributes {stable_mosaic.version = 11 : i64} {
  func.func @_conv3x3_bn_relu_kernel(%arg0: i32, %arg1: i32, %arg2: memref<1x1x10x10x128xbf16, #tpu.memory_space<vmem>>, %arg3: memref<1152x128xbf16, #tpu.memory_space<vmem>>, %arg4: memref<1x128xf32, #tpu.memory_space<vmem>>, %arg5: memref<1x128xf32, #tpu.memory_space<vmem>>, %arg6: memref<1x64x128xbf16, #tpu.memory_space<vmem>>) attributes {dimension_semantics = [#tpu.dimension_semantics<parallel>, #tpu.dimension_semantics<parallel>], iteration_bounds = array<i64: 2, 1>, scalar_prefetch = 0 : i64, scratch_operands = 0 : i64, tpu.core_type = #tpu.core_type<tc>, window_params = [{transform_indices = @transform_0, window_bounds = array<i64: 1, 1, 10, 10, 128>}, {pipeline_mode = #tpu.pipeline_mode<synchronous>, transform_indices = @transform_1, window_bounds = array<i64: 1152, 128>}, {pipeline_mode = #tpu.pipeline_mode<synchronous>, transform_indices = @transform_2, window_bounds = array<i64: 1, 128>}, {pipeline_mode = #tpu.pipeline_mode<synchronous>, transform_indices = @transform_3, window_bounds = array<i64: 1, 128>}, {transform_indices = @transform_4, window_bounds = array<i64: 1, 64, 128>}]} {
    %c8_i32 = arith.constant 8 : i32
    %0 = arith.muli %arg1, %c8_i32 : i32
    %c0_i32 = arith.constant 0 : i32
    %1 = arith.addi %0, %c0_i32 : i32
    %c0 = arith.constant 0 : index
    %c0_0 = arith.constant 0 : index
    %2 = arith.index_cast %1 : i32 to index
    %c0_1 = arith.constant 0 : index
    %c0_2 = arith.constant 0 : index
    %3 = vector.load %arg2[%c0, %c0_0, %2, %c0_1, %c0_2] : memref<1x1x10x10x128xbf16, #tpu.memory_space<vmem>>, vector<1x1x8x8x128xbf16>
    %4 = vector.shape_cast %3 : vector<1x1x8x8x128xbf16> to vector<8x8x128xbf16>
    %c0_i32_3 = arith.constant 0 : i32
    %5 = arith.addi %0, %c0_i32_3 : i32
    %c0_4 = arith.constant 0 : index
    %c0_5 = arith.constant 0 : index
    %6 = arith.index_cast %5 : i32 to index
    %c1 = arith.constant 1 : index
    %c0_6 = arith.constant 0 : index
    %7 = vector.load %arg2[%c0_4, %c0_5, %6, %c1, %c0_6] : memref<1x1x10x10x128xbf16, #tpu.memory_space<vmem>>, vector<1x1x8x8x128xbf16>
    %8 = vector.shape_cast %7 : vector<1x1x8x8x128xbf16> to vector<8x8x128xbf16>
    %c0_i32_7 = arith.constant 0 : i32
    %9 = arith.addi %0, %c0_i32_7 : i32
    %c0_8 = arith.constant 0 : index
    %c0_9 = arith.constant 0 : index
    %10 = arith.index_cast %9 : i32 to index
    %c2 = arith.constant 2 : index
    %c0_10 = arith.constant 0 : index
    %11 = vector.load %arg2[%c0_8, %c0_9, %10, %c2, %c0_10] : memref<1x1x10x10x128xbf16, #tpu.memory_space<vmem>>, vector<1x1x8x8x128xbf16>
    %12 = vector.shape_cast %11 : vector<1x1x8x8x128xbf16> to vector<8x8x128xbf16>
    %c1_i32 = arith.constant 1 : i32
    %13 = arith.addi %0, %c1_i32 : i32
    %c0_11 = arith.constant 0 : index
    %c0_12 = arith.constant 0 : index
    %14 = arith.index_cast %13 : i32 to index
    %c0_13 = arith.constant 0 : index
    %c0_14 = arith.constant 0 : index
    %15 = vector.load %arg2[%c0_11, %c0_12, %14, %c0_13, %c0_14] : memref<1x1x10x10x128xbf16, #tpu.memory_space<vmem>>, vector<1x1x8x8x128xbf16>
    %16 = vector.shape_cast %15 : vector<1x1x8x8x128xbf16> to vector<8x8x128xbf16>
    %c1_i32_15 = arith.constant 1 : i32
    %17 = arith.addi %0, %c1_i32_15 : i32
    %c0_16 = arith.constant 0 : index
    %c0_17 = arith.constant 0 : index
    %18 = arith.index_cast %17 : i32 to index
    %c1_18 = arith.constant 1 : index
    %c0_19 = arith.constant 0 : index
    %19 = vector.load %arg2[%c0_16, %c0_17, %18, %c1_18, %c0_19] : memref<1x1x10x10x128xbf16, #tpu.memory_space<vmem>>, vector<1x1x8x8x128xbf16>
    %20 = vector.shape_cast %19 : vector<1x1x8x8x128xbf16> to vector<8x8x128xbf16>
    %c1_i32_20 = arith.constant 1 : i32
    %21 = arith.addi %0, %c1_i32_20 : i32
    %c0_21 = arith.constant 0 : index
    %c0_22 = arith.constant 0 : index
    %22 = arith.index_cast %21 : i32 to index
    %c2_23 = arith.constant 2 : index
    %c0_24 = arith.constant 0 : index
    %23 = vector.load %arg2[%c0_21, %c0_22, %22, %c2_23, %c0_24] : memref<1x1x10x10x128xbf16, #tpu.memory_space<vmem>>, vector<1x1x8x8x128xbf16>
    %24 = vector.shape_cast %23 : vector<1x1x8x8x128xbf16> to vector<8x8x128xbf16>
    %c2_i32 = arith.constant 2 : i32
    %25 = arith.addi %0, %c2_i32 : i32
    %c0_25 = arith.constant 0 : index
    %c0_26 = arith.constant 0 : index
    %26 = arith.index_cast %25 : i32 to index
    %c0_27 = arith.constant 0 : index
    %c0_28 = arith.constant 0 : index
    %27 = vector.load %arg2[%c0_25, %c0_26, %26, %c0_27, %c0_28] : memref<1x1x10x10x128xbf16, #tpu.memory_space<vmem>>, vector<1x1x8x8x128xbf16>
    %28 = vector.shape_cast %27 : vector<1x1x8x8x128xbf16> to vector<8x8x128xbf16>
    %c2_i32_29 = arith.constant 2 : i32
    %29 = arith.addi %0, %c2_i32_29 : i32
    %c0_30 = arith.constant 0 : index
    %c0_31 = arith.constant 0 : index
    %30 = arith.index_cast %29 : i32 to index
    %c1_32 = arith.constant 1 : index
    %c0_33 = arith.constant 0 : index
    %31 = vector.load %arg2[%c0_30, %c0_31, %30, %c1_32, %c0_33] : memref<1x1x10x10x128xbf16, #tpu.memory_space<vmem>>, vector<1x1x8x8x128xbf16>
    %32 = vector.shape_cast %31 : vector<1x1x8x8x128xbf16> to vector<8x8x128xbf16>
    %c2_i32_34 = arith.constant 2 : i32
    %33 = arith.addi %0, %c2_i32_34 : i32
    %c0_35 = arith.constant 0 : index
    %c0_36 = arith.constant 0 : index
    %34 = arith.index_cast %33 : i32 to index
    %c2_37 = arith.constant 2 : index
    %c0_38 = arith.constant 0 : index
    %35 = vector.load %arg2[%c0_35, %c0_36, %34, %c2_37, %c0_38] : memref<1x1x10x10x128xbf16, #tpu.memory_space<vmem>>, vector<1x1x8x8x128xbf16>
    %36 = vector.shape_cast %35 : vector<1x1x8x8x128xbf16> to vector<8x8x128xbf16>
    %37 = tpu.concatenate %4, %8, %12, %16, %20, %24, %28, %32, %36 in 2 : vector<8x8x128xbf16>, vector<8x8x128xbf16>, vector<8x8x128xbf16>, vector<8x8x128xbf16>, vector<8x8x128xbf16>, vector<8x8x128xbf16>, vector<8x8x128xbf16>, vector<8x8x128xbf16>, vector<8x8x128xbf16> -> vector<8x8x1152xbf16>
    %38 = vector.shape_cast %37 : vector<8x8x1152xbf16> to vector<64x1152xbf16>
    %c0_39 = arith.constant 0 : index
    %c0_40 = arith.constant 0 : index
    %39 = vector.load %arg3[%c0_39, %c0_40] : memref<1152x128xbf16, #tpu.memory_space<vmem>>, vector<1152x128xbf16>
    %cst = arith.constant dense<0.000000e+00> : vector<64x128xf32>
    %40 = tpu.matmul %38, %39, %cst {dimension_numbers = #tpu.dot_dimension_numbers<[1], [0], [0], [1], [0, 0, 1, 1], [], []>} : vector<64x1152xbf16>, vector<1152x128xbf16>, vector<64x128xf32> -> vector<64x128xf32>
    %c0_41 = arith.constant 0 : index
    %c0_42 = arith.constant 0 : index
    %41 = vector.load %arg4[%c0_41, %c0_42] : memref<1x128xf32, #tpu.memory_space<vmem>>, vector<1x128xf32>
    %42 = vector.broadcast %41 : vector<1x128xf32> to vector<64x128xf32>
    %43 = arith.mulf %40, %42 : vector<64x128xf32>
    %c0_43 = arith.constant 0 : index
    %c0_44 = arith.constant 0 : index
    %44 = vector.load %arg5[%c0_43, %c0_44] : memref<1x128xf32, #tpu.memory_space<vmem>>, vector<1x128xf32>
    %45 = vector.broadcast %44 : vector<1x128xf32> to vector<64x128xf32>
    %46 = arith.addf %43, %45 : vector<64x128xf32>
    %cst_45 = arith.constant 0.000000e+00 : f32
    %47 = vector.broadcast %cst_45 : f32 to vector<64x128xf32>
    %48 = arith.maximumf %46, %47 : vector<64x128xf32>
    %49 = arith.truncf %48 : vector<64x128xf32> to vector<64x128xbf16>
    %c0_46 = arith.constant 0 : index
    %c0_47 = arith.constant 0 : index
    %c0_48 = arith.constant 0 : index
    %50 = vector.load %arg6[%c0_46, %c0_47, %c0_48] : memref<1x64x128xbf16, #tpu.memory_space<vmem>>, vector<1x64x128xbf16>
    %51 = vector.shape_cast %50 : vector<1x64x128xbf16> to vector<64x128xbf16>
    %52 = vector.shape_cast %49 : vector<64x128xbf16> to vector<1x64x128xbf16>
    tpu.vector_store %arg6[%c0_46, %c0_47, %c0_48], %52 {strides = array<i32>} : memref<1x64x128xbf16, #tpu.memory_space<vmem>>, vector<1x64x128xbf16>,
    return
  }
  func.func @transform_0(%arg0: i32, %arg1: i32) -> (i32, i32, i32, i32, i32) {
    %c0_i32 = arith.constant 0 : i32
    %c0_i32_0 = arith.constant 0 : i32
    %c0_i32_1 = arith.constant 0 : i32
    %c0_i32_2 = arith.constant 0 : i32
    %c0_i32_3 = arith.constant 0 : i32
    return %arg0, %c0_i32, %c0_i32_0, %c0_i32_1, %c0_i32_2 : i32, i32, i32, i32, i32
  }
  func.func @transform_1(%arg0: i32, %arg1: i32) -> (i32, i32) {
    %c0_i32 = arith.constant 0 : i32
    %c0_i32_0 = arith.constant 0 : i32
    %c0_i32_1 = arith.constant 0 : i32
    return %c0_i32, %c0_i32_0 : i32, i32
  }
  func.func @transform_2(%arg0: i32, %arg1: i32) -> (i32, i32) {
    %c0_i32 = arith.constant 0 : i32
    %c0_i32_0 = arith.constant 0 : i32
    %c0_i32_1 = arith.constant 0 : i32
    return %c0_i32, %c0_i32_0 : i32, i32
  }
  func.func @transform_3(%arg0: i32, %arg1: i32) -> (i32, i32) {
    %c0_i32 = arith.constant 0 : i32
    %c0_i32_0 = arith.constant 0 : i32
    %c0_i32_1 = arith.constant 0 : i32
    return %c0_i32, %c0_i32_0 : i32, i32
  }
  func.func @transform_4(%arg0: i32, %arg1: i32) -> (i32, i32, i32) {
    %c0_i32 = arith.constant 0 : i32
    %c0_i32_0 = arith.constant 0 : i32
    return %arg0, %arg1, %c0_i32 : i32, i32, i32
  }
}

</mosaic_0001>

<bundles_post_ra>
// kernel: model.9
= control target key start
LH: loop header
LB: loop body
LE: loop exit
PB: predicated region body
PF: predicated region fallthrough
CT: control target
= control target key end

     0   :  { %s744_s1 = inlined_call_operand.vmem [shape: bf16[128,128], index: 1, kind: input, shape index: {}]   ;;  %s745_s0 = inlined_call_operand.vmem [shape: bf16[128,128], index: 0, kind: input, shape index: {}]   ;;  %s746_s2 = inlined_call_operand.vmem [shape: f32[1,128], index: 2, kind: input, shape index: {}]   ;;  %s747_s3 = inlined_call_operand.vmem [shape: f32[1,128], index: 3, kind: input, shape index: {}]   ;;  %s748_s4 = inlined_call_operand.vmem [shape: bf16[128,128], index: 4, kind: output, shape index: {}]  }
   0x1   :  { %v625_v0 = vld [vmem:[%s744_s1 + $0x38] sm:$0xff]   ;;  %v626_v1 = vld [vmem:[%s744_s1 + $0x30] sm:$0xff]   ;;  %v627_v2 = vld [vmem:[%s744_s1 + $0x28] sm:$0xff]  }
   0x2   :  { %577 = vmatprep.subr.bf16.mxu0 %v625_v0  ;;  %609 = vmatprep.subr.bf16.mxu1 %v625_v0  ;;  %v628_v3 = vld [vmem:[%s744_s1 + $0x20] sm:$0xff]   ;;  %v629_v6 = vld [vmem:[%s744_s1 + $0x18] sm:$0xff]   ;;  %v630_v7 = vld [vmem:[%s744_s1 + $0x10] sm:$0xff]  }
   0x3   :  { %578 = vmatpush3.bf16.msra.mxu0 %v625_v0  ;;  %617 = vmatpush3.bf16.msra.mxu1 %v625_v0  ;;  %v633_v4 = vld [vmem:[%s745_s0] sm:$0xff]   ;;  %v631_v8 = vld [vmem:[%s744_s1 + $0x8] sm:$0xff]   ;;  %v637_v12 = vld [vmem:[%s745_s0 + $0x10] sm:$0xff]  }
   0x4   :  { %579 = vmatprep.subr.bf16.mxu0 %v626_v1  ;;  %610 = vmatprep.subr.bf16.mxu1 %v626_v1  ;;  %v634_v5 = vld [vmem:[%s745_s0 + $0x20] sm:$0xff]   ;;  %v635_v10 = vld [vmem:[%s745_s0 + $0x8] sm:$0xff]   ;;  %v638_v13 = vld [vmem:[%s745_s0 + $0x30] sm:$0xff]  }
   0x5   :  { %593 = vmatprep.mubr.bf16.mxu0 %v633_v4  ;;  %601 = vmatprep.mubr.bf16.mxu1 %v634_v5  ;;  %v632_v9 = vld [vmem:[%s744_s1] sm:$0xff]   ;;  %v636_v11 = vld [vmem:[%s745_s0 + $0x28] sm:$0xff]   ;;  %v639_v14 = vld [vmem:[%s745_s0 + $0x18] sm:$0xff]  }
   0x6   :  { %v640_v15 = vld [vmem:[%s745_s0 + $0x38] sm:$0xff]   ;;  %v480_v16 = vld [vmem:[%s746_s2] ss:$0 sm:$0xff] }
   0x7   :  { %580 = vmatpush3.bf16.msra.mxu0 %v626_v1  ;;  %618 = vmatpush3.bf16.msra.mxu1 %v626_v1  ;;  %v481_v23 = vld [vmem:[%s747_s3] ss:$0 sm:$0xff] }
   0x8   :  { %581 = vmatprep.subr.bf16.mxu0 %v627_v2  ;;  %611 = vmatprep.subr.bf16.mxu1 %v627_v2 }
   0xb   :  { %582 = vmatpush3.bf16.msra.mxu0 %v627_v2  ;;  %619 = vmatpush3.bf16.msra.mxu1 %v627_v2 }
   0xc   :  { %583 = vmatprep.subr.bf16.mxu0 %v628_v3  ;;  %612 = vmatprep.subr.bf16.mxu1 %v628_v3 }
   0xf   :  { %584 = vmatpush3.bf16.msra.mxu0 %v628_v3  ;;  %620 = vmatpush3.bf16.msra.mxu1 %v628_v3 }
  0x10   :  { %585 = vmatprep.subr.bf16.mxu0 %v629_v6  ;;  %613 = vmatprep.subr.bf16.mxu1 %v629_v6 }
  0x13   :  { %586 = vmatpush3.bf16.msra.mxu0 %v629_v6  ;;  %621 = vmatpush3.bf16.msra.mxu1 %v629_v6 }
  0x14   :  { %587 = vmatprep.subr.bf16.mxu0 %v630_v7  ;;  %614 = vmatprep.subr.bf16.mxu1 %v630_v7 }
  0x17   :  { %588 = vmatpush3.bf16.msra.mxu0 %v630_v7  ;;  %622 = vmatpush3.bf16.msra.mxu1 %v630_v7 }
  0x18   :  { %589 = vmatprep.subr.bf16.mxu0 %v631_v8  ;;  %615 = vmatprep.subr.bf16.mxu1 %v631_v8 }
  0x1b   :  { %590 = vmatpush3.bf16.msra.mxu0 %v631_v8  ;;  %623 = vmatpush3.bf16.msra.mxu1 %v631_v8 }
  0x1c   :  { %591 = vmatprep.subr.bf16.mxu0 %v632_v9  ;;  %616 = vmatprep.subr.bf16.mxu1 %v632_v9 }
  0x1f   :  { %592 = vmatpush3.bf16.msra.mxu0 %v632_v9  ;;  %624 = vmatpush3.bf16.msra.mxu1 %v632_v9 }
  0x22   :  { %594 = vmatmul.mubr.bf16.vlgmr.msra.gmra.mxu0 %v635_v10  ;;  %602 = vmatmul.mubr.bf16.vlgmr.msra.gmra.mxu1 %v636_v11 }
  0x23   :  { %597 = vmatprep.mubr.bf16.mxu0 %v637_v12  ;;  %605 = vmatprep.mubr.bf16.mxu1 %v638_v13 }
  0x2a   :  { %598 = vmatmul.mubr.bf16.gmra.mxu0 %v639_v14  ;;  %606 = vmatmul.mubr.bf16.gmra.mxu1 %v640_v15 }
  0xe2   :  { %v595_v17 = vpop.f32.mrf.mxu0  ;;  %v603_v18 = vpop.f32.mrf.mxu1 }
  0xe3   :  { %v343_v19 = vmul.f32 %v595_v17, %v480_v16  ;;  %v351_v20 = vmul.f32 %v603_v18, %v480_v16 }
  0xe4   :  { %v180_v21 = vpop.f32.mrf.mxu0  ;;  %v212_v22 = vpop.f32.mrf.mxu1 }
  0xe5   :  { %v341_v24 = vmul.f32 %v480_v16, %v180_v21  ;;  %v349_v25 = vmul.f32 %v480_v16, %v212_v22  ;;  %v366_v30 = vadd.f32 %v481_v23, %v343_v19  ;;  %v374_v31 = vadd.f32 %v481_v23, %v351_v20 }
  0xe6   :  { %v596_v26 = vpop.f32.mrf.mxu0  ;;  %v604_v27 = vpop.f32.mrf.mxu1 }
  0xe7   :  { %v344_v28 = vmul.f32 %v596_v26, %v480_v16  ;;  %v352_v29 = vmul.f32 %v604_v27, %v480_v16  ;;  %v364_v38 = vadd.f32 %v481_v23, %v341_v24  ;;  %v372_v39 = vadd.f32 %v481_v23, %v349_v25 }
  0xe8   :  { %v183_v32 = vpop.f32.mrf.mxu0  ;;  %v215_v33 = vpop.f32.mrf.mxu1 }
  0xe9   :  { %v367_v34 = vadd.f32 %v481_v23, %v344_v28  ;;  %v375_v35 = vadd.f32 %v481_v23, %v352_v29  ;;  %v342_v36 = vmul.f32 %v480_v16, %v183_v32  ;;  %v350_v37 = vmul.f32 %v480_v16, %v215_v33 }
  0xea   :  { %v599_v40 = vpop.f32.mrf.mxu0  ;;  %v607_v41 = vpop.f32.mrf.mxu1 }
  0xeb   :  { %v522_v42 = vpack.c.bf16 %v367_v34, %v366_v30  ;;  %v542_v43 = vpack.c.bf16 %v375_v35, %v374_v31  ;;  %v365_v44 = vadd.f32 %v481_v23, %v342_v36  ;;  %v373_v45 = vadd.f32 %v481_v23, %v350_v37 }
  0xec   :  { %v347_v46 = vmul.f32 %v599_v40, %v480_v16  ;;  %v355_v47 = vmul.f32 %v607_v41, %v480_v16  ;;  %v196_v48 = vpop.f32.mrf.mxu0  ;;  %v228_v49 = vpop.f32.mrf.mxu1 }
  0xed   :  { %554 = vst [vmem:[%s748_s4 + $0x8] sm:$0xff] %v522_v42   ;;  %558 = vst [vmem:[%s748_s4 + $0x28] sm:$0xff] %v542_v43   ;;  %v517_v50 = vpack.c.bf16 %v365_v44, %v364_v38  ;;  %v537_v51 = vpack.c.bf16 %v373_v45, %v372_v39  ;;  %v345_v52 = vmul.f32 %v480_v16, %v196_v48 }
  0xee   :  { %v353_v53 = vmul.f32 %v480_v16, %v228_v49  ;;  %v600_v54 = vpop.f32.mrf.mxu0  ;;  %v608_v55 = vpop.f32.mrf.mxu1  ;;  %v370_v58 = vadd.f32 %v481_v23, %v347_v46  ;;  %v378_v59 = vadd.f32 %v481_v23, %v355_v47 }
  0xef   :  { %518 = vst [vmem:[%s748_s4] sm:$0xff] %v517_v50   ;;  %557 = vst [vmem:[%s748_s4 + $0x20] sm:$0xff] %v537_v51   ;;  %v348_v56 = vmul.f32 %v600_v54, %v480_v16  ;;  %v356_v57 = vmul.f32 %v608_v55, %v480_v16  ;;  %v368_v2 = vadd.f32 %v481_v23, %v345_v52 }
  0xf0   :  { %v199_v60 = vpop.f32.mrf.mxu0  ;;  %v231_v61 = vpop.f32.mrf.mxu1  ;;  %v376_v3 = vadd.f32 %v481_v23, %v353_v53 }
  0xf1   :  { %v371_v62 = vadd.f32 %v481_v23, %v348_v56  ;;  %v379_v63 = vadd.f32 %v481_v23, %v356_v57  ;;  %v346_v0 = vmul.f32 %v480_v16, %v199_v60  ;;  %v354_v1 = vmul.f32 %v480_v16, %v231_v61 }
  0xf3   :  { %v532_v4 = vpack.c.bf16 %v371_v62, %v370_v58  ;;  %v552_v5 = vpack.c.bf16 %v379_v63, %v378_v59  ;;  %v369_v6 = vadd.f32 %v481_v23, %v346_v0  ;;  %v377_v7 = vadd.f32 %v481_v23, %v354_v1 }
  0xf5   :  { %556 = vst [vmem:[%s748_s4 + $0x18] sm:$0xff] %v532_v4   ;;  %560 = vst [vmem:[%s748_s4 + $0x38] sm:$0xff] %v552_v5   ;;  %v527_v8 = vpack.c.bf16 %v369_v6, %v368_v2  ;;  %v547_v9 = vpack.c.bf16 %v377_v7, %v376_v3 }
  0xf7   :  { %555 = vst [vmem:[%s748_s4 + $0x10] sm:$0xff] %v527_v8   ;;  %559 = vst [vmem:[%s748_s4 + $0x30] sm:$0xff] %v547_v9  }

// kernel: model.7
= control target key start
LH: loop header
LB: loop body
LE: loop exit
PB: predicated region body
PF: predicated region fallthrough
CT: control target
= control target key end

     0   :  { %s2404_s1 = inlined_call_operand.vmem [shape: bf16[128,128], index: 1, kind: input, shape index: {}]   ;;  %s2405_s0 = inlined_call_operand.vmem [shape: bf16[512,128], index: 0, kind: input, shape index: {}]   ;;  %s2406_s2 = inlined_call_operand.vmem [shape: f32[1,128], index: 2, kind: input, shape index: {}]   ;;  %s2407_s3 = inlined_call_operand.vmem [shape: f32[1,128], index: 3, kind: input, shape index: {}]   ;;  %s2408_s4 = inlined_call_operand.vmem [shape: bf16[512,128], index: 4, kind: output, shape index: {}]  }
   0x1   :  { %v1985_v0 = vld [vmem:[%s2404_s1 + $0x38] sm:$0xff]   ;;  %v1986_v1 = vld [vmem:[%s2404_s1 + $0x30] sm:$0xff]   ;;  %v1987_v2 = vld [vmem:[%s2404_s1 + $0x28] sm:$0xff]  }
   0x2   :  { %1889 = vmatprep.subr.bf16.mxu0 %v1985_v0  ;;  %1969 = vmatprep.subr.bf16.mxu1 %v1985_v0  ;;  %v1988_v3 = vld [vmem:[%s2404_s1 + $0x20] sm:$0xff]   ;;  %v1989_v6 = vld [vmem:[%s2404_s1 + $0x18] sm:$0xff]   ;;  %v1990_v7 = vld [vmem:[%s2404_s1 + $0x10] sm:$0xff]  }
   0x3   :  { %1890 = vmatpush3.bf16.msra.mxu0 %v1985_v0  ;;  %1977 = vmatpush3.bf16.msra.mxu1 %v1985_v0  ;;  %v1993_v4 = vld [vmem:[%s2405_s0] sm:$0xff]   ;;  %v1991_v8 = vld [vmem:[%s2404_s1 + $0x8] sm:$0xff]   ;;  %v1997_v12 = vld [vmem:[%s2405_s0 + $0x10] sm:$0xff]  }
   0x4   :  { %1891 = vmatprep.subr.bf16.mxu0 %v1986_v1  ;;  %1970 = vmatprep.subr.bf16.mxu1 %v1986_v1  ;;  %v1994_v5 = vld [vmem:[%s2405_s0 + $0x80] sm:$0xff]   ;;  %v1995_v10 = vld [vmem:[%s2405_s0 + $0x8] sm:$0xff]   ;;  %v1998_v13 = vld [vmem:[%s2405_s0 + $0x90] sm:$0xff]  }
   0x5   :  { %1905 = vmatprep.mubr.bf16.mxu0 %v1993_v4  ;;  %1937 = vmatprep.mubr.bf16.mxu1 %v1994_v5  ;;  %v1992_v9 = vld [vmem:[%s2404_s1] sm:$0xff]   ;;  %v1996_v11 = vld [vmem:[%s2405_s0 + $0x88] sm:$0xff]   ;;  %v1999_v14 = vld [vmem:[%s2405_s0 + $0x18] sm:$0xff]  }
   0x6   :  { %v2000_v15 = vld [vmem:[%s2405_s0 + $0x98] sm:$0xff]   ;;  %v2001_v16 = vld [vmem:[%s2405_s0 + $0x20] sm:$0xff]   ;;  %v2003_v18 = vld [vmem:[%s2405_s0 + $0x28] sm:$0xff]  }
   0x7   :  { %1892 = vmatpush3.bf16.msra.mxu0 %v1986_v1  ;;  %1978 = vmatpush3.bf16.msra.mxu1 %v1986_v1  ;;  %v2002_v17 = vld [vmem:[%s2405_s0 + $0xa0] sm:$0xff]   ;;  %v2004_v19 = vld [vmem:[%s2405_s0 + $0xa8] sm:$0xff]   ;;  %v2005_v20 = vld [vmem:[%s2405_s0 + $0x30] sm:$0xff]  }
   0x8   :  { %1893 = vmatprep.subr.bf16.mxu0 %v1987_v2  ;;  %1971 = vmatprep.subr.bf16.mxu1 %v1987_v2  ;;  %v2006_v21 = vld [vmem:[%s2405_s0 + $0xb0] sm:$0xff]   ;;  %v2007_v22 = vld [vmem:[%s2405_s0 + $0x38] sm:$0xff]   ;;  %v2009_v24 = vld [vmem:[%s2405_s0 + $0x40] sm:$0xff]  }
   0x9   :  { %v2008_v23 = vld [vmem:[%s2405_s0 + $0xb8] sm:$0xff]   ;;  %v2010_v25 = vld [vmem:[%s2405_s0 + $0xc0] sm:$0xff]   ;;  %v2011_v26 = vld [vmem:[%s2405_s0 + $0x48] sm:$0xff]  }
   0xa   :  { %v2012_v27 = vld [vmem:[%s2405_s0 + $0xc8] sm:$0xff]   ;;  %v2013_v28 = vld [vmem:[%s2405_s0 + $0x50] sm:$0xff]   ;;  %v2015_v30 = vld [vmem:[%s2405_s0 + $0x58] sm:$0xff]  }
   0xb   :  { %1894 = vmatpush3.bf16.msra.mxu0 %v1987_v2  ;;  %1979 = vmatpush3.bf16.msra.mxu1 %v1987_v2  ;;  %v2014_v29 = vld [vmem:[%s2405_s0 + $0xd0] sm:$0xff]   ;;  %v2016_v31 = vld [vmem:[%s2405_s0 + $0xd8] sm:$0xff]   ;;  %v2017_v32 = vld [vmem:[%s2405_s0 + $0x60] sm:$0xff]  }
   0xc   :  { %1895 = vmatprep.subr.bf16.mxu0 %v1988_v3  ;;  %1972 = vmatprep.subr.bf16.mxu1 %v1988_v3  ;;  %v2018_v33 = vld [vmem:[%s2405_s0 + $0xe0] sm:$0xff]   ;;  %v2019_v34 = vld [vmem:[%s2405_s0 + $0x68] sm:$0xff]   ;;  %v2021_v36 = vld [vmem:[%s2405_s0 + $0x70] sm:$0xff]  }
   0xd   :  { %v2020_v35 = vld [vmem:[%s2405_s0 + $0xe8] sm:$0xff]   ;;  %v2022_v37 = vld [vmem:[%s2405_s0 + $0xf0] sm:$0xff]   ;;  %v2023_v38 = vld [vmem:[%s2405_s0 + $0x78] sm:$0xff]  }
   0xe   :  { %v2024_v39 = vld [vmem:[%s2405_s0 + $0xf8] sm:$0xff]   ;;  %v2173_v40 = vld [vmem:[%s2406_s2] ss:$0 sm:$0xff] }
   0xf   :  { %1896 = vmatpush3.bf16.msra.mxu0 %v1988_v3  ;;  %1980 = vmatpush3.bf16.msra.mxu1 %v1988_v3  ;;  %v2180_v45 = vld [vmem:[%s2407_s3] ss:$0 sm:$0xff] }
  0x10   :  { %1897 = vmatprep.subr.bf16.mxu0 %v1989_v6  ;;  %1973 = vmatprep.subr.bf16.mxu1 %v1989_v6 }
  0x13   :  { %1898 = vmatpush3.bf16.msra.mxu0 %v1989_v6  ;;  %1981 = vmatpush3.bf16.msra.mxu1 %v1989_v6 }
  0x14   :  { %1899 = vmatprep.subr.bf16.mxu0 %v1990_v7  ;;  %1974 = vmatprep.subr.bf16.mxu1 %v1990_v7 }
  0x17   :  { %1900 = vmatpush3.bf16.msra.mxu0 %v1990_v7  ;;  %1982 = vmatpush3.bf16.msra.mxu1 %v1990_v7 }
  0x18   :  { %1901 = vmatprep.subr.bf16.mxu0 %v1991_v8  ;;  %1975 = vmatprep.subr.bf16.mxu1 %v1991_v8 }
  0x1b   :  { %1902 = vmatpush3.bf16.msra.mxu0 %v1991_v8  ;;  %1983 = vmatpush3.bf16.msra.mxu1 %v1991_v8 }
  0x1c   :  { %1903 = vmatprep.subr.bf16.mxu0 %v1992_v9  ;;  %1976 = vmatprep.subr.bf16.mxu1 %v1992_v9 }
  0x1f   :  { %1904 = vmatpush3.bf16.msra.mxu0 %v1992_v9  ;;  %1984 = vmatpush3.bf16.msra.mxu1 %v1992_v9 }
  0x22   :  { %1906 = vmatmul.mubr.bf16.vlgmr.msra.gmra.mxu0 %v1995_v10  ;;  %1938 = vmatmul.mubr.bf16.vlgmr.msra.gmra.mxu1 %v1996_v11 }
  0x23   :  { %1909 = vmatprep.mubr.bf16.mxu0 %v1997_v12  ;;  %1941 = vmatprep.mubr.bf16.mxu1 %v1998_v13 }
  0x2a   :  { %1910 = vmatmul.mubr.bf16.gmra.mxu0 %v1999_v14  ;;  %1942 = vmatmul.mubr.bf16.gmra.mxu1 %v2000_v15 }
  0x2b   :  { %1913 = vmatprep.mubr.bf16.mxu0 %v2001_v16  ;;  %1945 = vmatprep.mubr.bf16.mxu1 %v2002_v17 }
  0x32   :  { %1914 = vmatmul.mubr.bf16.gmra.mxu0 %v2003_v18  ;;  %1946 = vmatmul.mubr.bf16.gmra.mxu1 %v2004_v19 }
  0x33   :  { %1917 = vmatprep.mubr.bf16.mxu0 %v2005_v20  ;;  %1949 = vmatprep.mubr.bf16.mxu1 %v2006_v21 }
  0x3a   :  { %1918 = vmatmul.mubr.bf16.gmra.mxu0 %v2007_v22  ;;  %1950 = vmatmul.mubr.bf16.gmra.mxu1 %v2008_v23 }
  0x3b   :  { %1921 = vmatprep.mubr.bf16.mxu0 %v2009_v24  ;;  %1953 = vmatprep.mubr.bf16.mxu1 %v2010_v25 }
  0x42   :  { %1922 = vmatmul.mubr.bf16.gmra.mxu0 %v2011_v26  ;;  %1954 = vmatmul.mubr.bf16.gmra.mxu1 %v2012_v27 }
  0x43   :  { %1925 = vmatprep.mubr.bf16.mxu0 %v2013_v28  ;;  %1957 = vmatprep.mubr.bf16.mxu1 %v2014_v29 }
  0x4a   :  { %1926 = vmatmul.mubr.bf16.gmra.mxu0 %v2015_v30  ;;  %1958 = vmatmul.mubr.bf16.gmra.mxu1 %v2016_v31 }
  0x4b   :  { %1929 = vmatprep.mubr.bf16.mxu0 %v2017_v32  ;;  %1961 = vmatprep.mubr.bf16.mxu1 %v2018_v33 }
  0x52   :  { %1930 = vmatmul.mubr.bf16.gmra.mxu0 %v2019_v34  ;;  %1962 = vmatmul.mubr.bf16.gmra.mxu1 %v2020_v35 }
  0x53   :  { %1933 = vmatprep.mubr.bf16.mxu0 %v2021_v36  ;;  %1965 = vmatprep.mubr.bf16.mxu1 %v2022_v37 }
  0x5a   :  { %1934 = vmatmul.mubr.bf16.gmra.mxu0 %v2023_v38  ;;  %1966 = vmatmul.mubr.bf16.gmra.mxu1 %v2024_v39 }
  0xe2   :  { %v1907_v41 = vpop.f32.mrf.mxu0  ;;  %v1939_v42 = vpop.f32.mrf.mxu1 }
  0xe3   :  { %v967_v43 = vmul.f32 %v1907_v41, %v2173_v40  ;;  %v999_v44 = vmul.f32 %v1939_v42, %v2173_v40 }
  0xe4   :  { %v372_v46 = vpop.f32.mrf.mxu0  ;;  %v500_v47 = vpop.f32.mrf.mxu1 }
  0xe5   :  { %v965_v48 = vmul.f32 %v2173_v40, %v372_v46  ;;  %v997_v49 = vmul.f32 %v2173_v40, %v500_v47  ;;  %v1038_v52 = vadd.f32 %v2180_v45, %v967_v43  ;;  %v1070_v53 = vadd.f32 %v2180_v45, %v999_v44 }
  0xe6   :  { %v1908_v50 = vpop.f32.mrf.mxu0  ;;  %v1940_v51 = vpop.f32.mrf.mxu1 }
  0xe7   :  { %v968_v54 = vmul.f32 %v1908_v50, %v2173_v40  ;;  %v1000_v55 = vmul.f32 %v1940_v51, %v2173_v40  ;;  %v1036_v58 = vadd.f32 %v2180_v45, %v965_v48  ;;  %v1068_v59 = vadd.f32 %v2180_v45, %v997_v49 }
  0xe8   :  { %v375_v56 = vpop.f32.mrf.mxu0  ;;  %v503_v57 = vpop.f32.mrf.mxu1  ;;  %v1102_v2 = vmax.f32 %v1038_v52, 0.0  ;;  %v1134_v3 = vmax.f32 %v1070_v53, 0.0 }
  0xe9   :  { %v966_v60 = vmul.f32 %v2173_v40, %v375_v56  ;;  %v998_v61 = vmul.f32 %v2173_v40, %v503_v57  ;;  %v1039_v62 = vadd.f32 %v2180_v45, %v968_v54  ;;  %v1071_v63 = vadd.f32 %v2180_v45, %v1000_v55 }
  0xea   :  { %v1911_v0 = vpop.f32.mrf.mxu0  ;;  %v1943_v1 = vpop.f32.mrf.mxu1  ;;  %v1100_v12 = vmax.f32 %v1036_v58, 0.0  ;;  %v1132_v13 = vmax.f32 %v1068_v59, 0.0 }
  0xeb   :  { %v1037_v4 = vadd.f32 %v2180_v45, %v966_v60  ;;  %v1069_v5 = vadd.f32 %v2180_v45, %v998_v61  ;;  %v1103_v6 = vmax.f32 %v1039_v62, 0.0  ;;  %v1135_v7 = vmax.f32 %v1071_v63, 0.0 }
  0xec   :  { %v971_v8 = vmul.f32 %v1911_v0, %v2173_v40  ;;  %v1003_v9 = vmul.f32 %v1943_v1, %v2173_v40  ;;  %v388_v10 = vpop.f32.mrf.mxu0  ;;  %v516_v11 = vpop.f32.mrf.mxu1 }
  0xed   :  { %v1101_v14 = vmax.f32 %v1037_v4, 0.0  ;;  %v1133_v15 = vmax.f32 %v1069_v5, 0.0  ;;  %v1666_v16 = vpack.c.bf16 %v1103_v6, %v1102_v2  ;;  %v1746_v17 = vpack.c.bf16 %v1135_v7, %v1134_v3 }
  0xee   :  { %v969_v18 = vmul.f32 %v2173_v40, %v388_v10  ;;  %v1001_v19 = vmul.f32 %v2173_v40, %v516_v11  ;;  %v1912_v20 = vpop.f32.mrf.mxu0  ;;  %v1944_v21 = vpop.f32.mrf.mxu1  ;;  %v1042_v24 = vadd.f32 %v2180_v45, %v971_v8  ;;  %v1074_v25 = vadd.f32 %v2180_v45, %v1003_v9 }
  0xef   :  { %v1661_v22 = vpack.c.bf16 %v1101_v14, %v1100_v12  ;;  %v1741_v23 = vpack.c.bf16 %v1133_v15, %v1132_v13  ;;  %1818 = vst [vmem:[%s2408_s4 + $0x8] sm:$0xff] %v1666_v16   ;;  %1834 = vst [vmem:[%s2408_s4 + $0x88] sm:$0xff] %v1746_v17   ;;  %v972_v26 = vmul.f32 %v1912_v20, %v2173_v40 }
  0xf0   :  { %v1004_v27 = vmul.f32 %v1944_v21, %v2173_v40  ;;  %v391_v28 = vpop.f32.mrf.mxu0  ;;  %v519_v29 = vpop.f32.mrf.mxu1  ;;  %v1040_v30 = vadd.f32 %v2180_v45, %v969_v18  ;;  %v1072_v31 = vadd.f32 %v2180_v45, %v1001_v19  ;;  %v1106_v43 = vmax.f32 %v1042_v24, 0.0 }
  0xf1   :  { %1662 = vst [vmem:[%s2408_s4] sm:$0xff] %v1661_v22   ;;  %1833 = vst [vmem:[%s2408_s4 + $0x80] sm:$0xff] %v1741_v23   ;;  %v970_v32 = vmul.f32 %v2173_v40, %v391_v28  ;;  %v1002_v33 = vmul.f32 %v2173_v40, %v519_v29  ;;  %v1043_v34 = vadd.f32 %v2180_v45, %v972_v26  ;;  %v1138_v44 = vmax.f32 %v1074_v25, 0.0 }
  0xf2   :  { %v1075_v35 = vadd.f32 %v2180_v45, %v1004_v27  ;;  %v1915_v36 = vpop.f32.mrf.mxu0  ;;  %v1947_v37 = vpop.f32.mrf.mxu1  ;;  %v1104_v50 = vmax.f32 %v1040_v30, 0.0  ;;  %v1136_v51 = vmax.f32 %v1072_v31, 0.0 }
  0xf3   :  { %v1041_v38 = vadd.f32 %v2180_v45, %v970_v32  ;;  %v1073_v39 = vadd.f32 %v2180_v45, %v1002_v33  ;;  %v975_v41 = vmul.f32 %v1915_v36, %v2173_v40  ;;  %v1007_v42 = vmul.f32 %v1947_v37, %v2173_v40 }
  0xf4   :  { %v1107_v46 = vmax.f32 %v1043_v34, 0.0  ;;  %v1139_v47 = vmax.f32 %v1075_v35, 0.0  ;;  %v404_v48 = vpop.f32.mrf.mxu0  ;;  %v532_v49 = vpop.f32.mrf.mxu1 }
  0xf5   :  { %v1105_v52 = vmax.f32 %v1041_v38, 0.0  ;;  %v1137_v53 = vmax.f32 %v1073_v39, 0.0  ;;  %v973_v56 = vmul.f32 %v2173_v40, %v404_v48  ;;  %v1005_v57 = vmul.f32 %v2173_v40, %v532_v49 }
  0xf6   :  { %v1676_v54 = vpack.c.bf16 %v1107_v46, %v1106_v43  ;;  %v1756_v55 = vpack.c.bf16 %v1139_v47, %v1138_v44  ;;  %v1916_v58 = vpop.f32.mrf.mxu0  ;;  %v1948_v59 = vpop.f32.mrf.mxu1  ;;  %v1046_v62 = vadd.f32 %v2180_v45, %v975_v41  ;;  %v1078_v63 = vadd.f32 %v2180_v45, %v1007_v42 }
  0xf7   :  { %v1671_v60 = vpack.c.bf16 %v1105_v52, %v1104_v50  ;;  %v1751_v61 = vpack.c.bf16 %v1137_v53, %v1136_v51  ;;  %v976_v0 = vmul.f32 %v1916_v58, %v2173_v40  ;;  %v1008_v1 = vmul.f32 %v1948_v59, %v2173_v40 }
  0xf8   :  { %1820 = vst [vmem:[%s2408_s4 + $0x18] sm:$0xff] %v1676_v54   ;;  %1836 = vst [vmem:[%s2408_s4 + $0x98] sm:$0xff] %v1756_v55   ;;  %v407_v2 = vpop.f32.mrf.mxu0  ;;  %v535_v3 = vpop.f32.mrf.mxu1  ;;  %v1044_v4 = vadd.f32 %v2180_v45, %v973_v56  ;;  %v1076_v5 = vadd.f32 %v2180_v45, %v1005_v57  ;;  %v1110_v12 = vmax.f32 %v1046_v62, 0.0  ;;  %v1142_v13 = vmax.f32 %v1078_v63, 0.0 }
  0xf9   :  { %1819 = vst [vmem:[%s2408_s4 + $0x10] sm:$0xff] %v1671_v60   ;;  %1835 = vst [vmem:[%s2408_s4 + $0x90] sm:$0xff] %v1751_v61   ;;  %v974_v6 = vmul.f32 %v2173_v40, %v407_v2  ;;  %v1006_v7 = vmul.f32 %v2173_v40, %v535_v3  ;;  %v1047_v8 = vadd.f32 %v2180_v45, %v976_v0 }
  0xfa   :  { %v1079_v9 = vadd.f32 %v2180_v45, %v1008_v1  ;;  %v1919_v10 = vpop.f32.mrf.mxu0  ;;  %v1951_v11 = vpop.f32.mrf.mxu1  ;;  %v1108_v22 = vmax.f32 %v1044_v4, 0.0  ;;  %v1140_v23 = vmax.f32 %v1076_v5, 0.0 }
  0xfb   :  { %v1045_v14 = vadd.f32 %v2180_v45, %v974_v6  ;;  %v1077_v15 = vadd.f32 %v2180_v45, %v1006_v7  ;;  %v1111_v16 = vmax.f32 %v1047_v8, 0.0  ;;  %v979_v18 = vmul.f32 %v1919_v10, %v2173_v40 }
  0xfc   :  { %v1143_v17 = vmax.f32 %v1079_v9, 0.0  ;;  %v1011_v19 = vmul.f32 %v1951_v11, %v2173_v40  ;;  %v420_v20 = vpop.f32.mrf.mxu0  ;;  %v548_v21 = vpop.f32.mrf.mxu1 }
  0xfd   :  { %v1109_v24 = vmax.f32 %v1045_v14, 0.0  ;;  %v1141_v25 = vmax.f32 %v1077_v15, 0.0  ;;  %v1686_v26 = vpack.c.bf16 %v1111_v16, %v1110_v12  ;;  %v977_v28 = vmul.f32 %v2173_v40, %v420_v20 }
  0xfe   :  { %v1766_v27 = vpack.c.bf16 %v1143_v17, %v1142_v13  ;;  %v1009_v29 = vmul.f32 %v2173_v40, %v548_v21  ;;  %v1920_v30 = vpop.f32.mrf.mxu0  ;;  %v1952_v31 = vpop.f32.mrf.mxu1  ;;  %v1050_v34 = vadd.f32 %v2180_v45, %v979_v18  ;;  %v1082_v35 = vadd.f32 %v2180_v45, %v1011_v19 }
  0xff   :  { %v1681_v32 = vpack.c.bf16 %v1109_v24, %v1108_v22  ;;  %v1761_v33 = vpack.c.bf16 %v1141_v25, %v1140_v23  ;;  %1822 = vst [vmem:[%s2408_s4 + $0x28] sm:$0xff] %v1686_v26   ;;  %v980_v36 = vmul.f32 %v1920_v30, %v2173_v40  ;;  %v1012_v37 = vmul.f32 %v1952_v31, %v2173_v40 }
 0x100   :  { %1838 = vst [vmem:[%s2408_s4 + $0xa8] sm:$0xff] %v1766_v27   ;;  %v423_v38 = vpop.f32.mrf.mxu0  ;;  %v551_v39 = vpop.f32.mrf.mxu1  ;;  %v1048_v41 = vadd.f32 %v2180_v45, %v977_v28  ;;  %v1080_v42 = vadd.f32 %v2180_v45, %v1009_v29  ;;  %v1114_v54 = vmax.f32 %v1050_v34, 0.0  ;;  %v1146_v55 = vmax.f32 %v1082_v35, 0.0 }
 0x101   :  { %1821 = vst [vmem:[%s2408_s4 + $0x20] sm:$0xff] %v1681_v32   ;;  %1837 = vst [vmem:[%s2408_s4 + $0xa0] sm:$0xff] %v1761_v33   ;;  %v978_v43 = vmul.f32 %v2173_v40, %v423_v38  ;;  %v1010_v44 = vmul.f32 %v2173_v40, %v551_v39  ;;  %v1051_v46 = vadd.f32 %v2180_v45, %v980_v36 }
 0x102   :  { %v1083_v47 = vadd.f32 %v2180_v45, %v1012_v37  ;;  %v1923_v48 = vpop.f32.mrf.mxu0  ;;  %v1955_v49 = vpop.f32.mrf.mxu1  ;;  %v1112_v60 = vmax.f32 %v1048_v41, 0.0  ;;  %v1144_v61 = vmax.f32 %v1080_v42, 0.0 }
 0x103   :  { %v1049_v50 = vadd.f32 %v2180_v45, %v978_v43  ;;  %v1081_v51 = vadd.f32 %v2180_v45, %v1010_v44  ;;  %v983_v52 = vmul.f32 %v1923_v48, %v2173_v40  ;;  %v1015_v53 = vmul.f32 %v1955_v49, %v2173_v40 }
 0x104   :  { %v1115_v56 = vmax.f32 %v1051_v46, 0.0  ;;  %v1147_v57 = vmax.f32 %v1083_v47, 0.0  ;;  %v436_v58 = vpop.f32.mrf.mxu0  ;;  %v564_v59 = vpop.f32.mrf.mxu1 }
 0x105   :  { %v1113_v62 = vmax.f32 %v1049_v50, 0.0  ;;  %v1145_v63 = vmax.f32 %v1081_v51, 0.0  ;;  %v981_v2 = vmul.f32 %v2173_v40, %v436_v58  ;;  %v1013_v3 = vmul.f32 %v2173_v40, %v564_v59 }
 0x106   :  { %v1696_v0 = vpack.c.bf16 %v1115_v56, %v1114_v54  ;;  %v1776_v1 = vpack.c.bf16 %v1147_v57, %v1146_v55  ;;  %v1924_v4 = vpop.f32.mrf.mxu0  ;;  %v1956_v5 = vpop.f32.mrf.mxu1  ;;  %v1054_v8 = vadd.f32 %v2180_v45, %v983_v52  ;;  %v1086_v9 = vadd.f32 %v2180_v45, %v1015_v53 }
 0x107   :  { %v1691_v6 = vpack.c.bf16 %v1113_v62, %v1112_v60  ;;  %v1771_v7 = vpack.c.bf16 %v1145_v63, %v1144_v61  ;;  %v984_v10 = vmul.f32 %v1924_v4, %v2173_v40  ;;  %v1016_v11 = vmul.f32 %v1956_v5, %v2173_v40 }
 0x108   :  { %1824 = vst [vmem:[%s2408_s4 + $0x38] sm:$0xff] %v1696_v0   ;;  %1840 = vst [vmem:[%s2408_s4 + $0xb8] sm:$0xff] %v1776_v1   ;;  %v439_v12 = vpop.f32.mrf.mxu0  ;;  %v567_v13 = vpop.f32.mrf.mxu1  ;;  %v1052_v14 = vadd.f32 %v2180_v45, %v981_v2  ;;  %v1084_v15 = vadd.f32 %v2180_v45, %v1013_v3  ;;  %v1118_v22 = vmax.f32 %v1054_v8, 0.0  ;;  %v1150_v23 = vmax.f32 %v1086_v9, 0.0 }
 0x109   :  { %1823 = vst [vmem:[%s2408_s4 + $0x30] sm:$0xff] %v1691_v6   ;;  %1839 = vst [vmem:[%s2408_s4 + $0xb0] sm:$0xff] %v1771_v7   ;;  %v982_v16 = vmul.f32 %v2173_v40, %v439_v12  ;;  %v1014_v17 = vmul.f32 %v2173_v40, %v567_v13  ;;  %v1055_v18 = vadd.f32 %v2180_v45, %v984_v10 }
 0x10a   :  { %v1087_v19 = vadd.f32 %v2180_v45, %v1016_v11  ;;  %v1927_v20 = vpop.f32.mrf.mxu0  ;;  %v1959_v21 = vpop.f32.mrf.mxu1  ;;  %v1116_v32 = vmax.f32 %v1052_v14, 0.0  ;;  %v1148_v33 = vmax.f32 %v1084_v15, 0.0 }
 0x10b   :  { %v1053_v24 = vadd.f32 %v2180_v45, %v982_v16  ;;  %v1085_v25 = vadd.f32 %v2180_v45, %v1014_v17  ;;  %v1119_v26 = vmax.f32 %v1055_v18, 0.0  ;;  %v987_v28 = vmul.f32 %v1927_v20, %v2173_v40 }
 0x10c   :  { %v1151_v27 = vmax.f32 %v1087_v19, 0.0  ;;  %v1019_v29 = vmul.f32 %v1959_v21, %v2173_v40  ;;  %v452_v30 = vpop.f32.mrf.mxu0  ;;  %v580_v31 = vpop.f32.mrf.mxu1 }
 0x10d   :  { %v1117_v34 = vmax.f32 %v1053_v24, 0.0  ;;  %v1149_v35 = vmax.f32 %v1085_v25, 0.0  ;;  %v1706_v36 = vpack.c.bf16 %v1119_v26, %v1118_v22  ;;  %v985_v38 = vmul.f32 %v2173_v40, %v452_v30 }
 0x10e   :  { %v1786_v37 = vpack.c.bf16 %v1151_v27, %v1150_v23  ;;  %v1017_v39 = vmul.f32 %v2173_v40, %v580_v31  ;;  %v1928_v41 = vpop.f32.mrf.mxu0  ;;  %v1960_v42 = vpop.f32.mrf.mxu1  ;;  %v1058_v46 = vadd.f32 %v2180_v45, %v987_v28  ;;  %v1090_v47 = vadd.f32 %v2180_v45, %v1019_v29 }
 0x10f   :  { %v1701_v43 = vpack.c.bf16 %v1117_v34, %v1116_v32  ;;  %v1781_v44 = vpack.c.bf16 %v1149_v35, %v1148_v33  ;;  %1826 = vst [vmem:[%s2408_s4 + $0x48] sm:$0xff] %v1706_v36   ;;  %v988_v48 = vmul.f32 %v1928_v41, %v2173_v40  ;;  %v1020_v49 = vmul.f32 %v1960_v42, %v2173_v40 }
 0x110   :  { %1842 = vst [vmem:[%s2408_s4 + $0xc8] sm:$0xff] %v1786_v37   ;;  %v455_v50 = vpop.f32.mrf.mxu0  ;;  %v583_v51 = vpop.f32.mrf.mxu1  ;;  %v1056_v52 = vadd.f32 %v2180_v45, %v985_v38  ;;  %v1088_v53 = vadd.f32 %v2180_v45, %v1017_v39  ;;  %v1122_v0 = vmax.f32 %v1058_v46, 0.0  ;;  %v1154_v1 = vmax.f32 %v1090_v47, 0.0 }
 0x111   :  { %1825 = vst [vmem:[%s2408_s4 + $0x40] sm:$0xff] %v1701_v43   ;;  %1841 = vst [vmem:[%s2408_s4 + $0xc0] sm:$0xff] %v1781_v44   ;;  %v986_v54 = vmul.f32 %v2173_v40, %v455_v50  ;;  %v1018_v55 = vmul.f32 %v2173_v40, %v583_v51  ;;  %v1059_v56 = vadd.f32 %v2180_v45, %v988_v48 }
 0x112   :  { %v1091_v57 = vadd.f32 %v2180_v45, %v1020_v49  ;;  %v1931_v58 = vpop.f32.mrf.mxu0  ;;  %v1963_v59 = vpop.f32.mrf.mxu1  ;;  %v1120_v6 = vmax.f32 %v1056_v52, 0.0  ;;  %v1152_v7 = vmax.f32 %v1088_v53, 0.0 }
 0x113   :  { %v1057_v60 = vadd.f32 %v2180_v45, %v986_v54  ;;  %v1089_v61 = vadd.f32 %v2180_v45, %v1018_v55  ;;  %v991_v62 = vmul.f32 %v1931_v58, %v2173_v40  ;;  %v1023_v63 = vmul.f32 %v1963_v59, %v2173_v40 }
 0x114   :  { %v1123_v2 = vmax.f32 %v1059_v56, 0.0  ;;  %v1155_v3 = vmax.f32 %v1091_v57, 0.0  ;;  %v468_v4 = vpop.f32.mrf.mxu0  ;;  %v596_v5 = vpop.f32.mrf.mxu1 }
 0x115   :  { %v1121_v8 = vmax.f32 %v1057_v60, 0.0  ;;  %v1153_v9 = vmax.f32 %v1089_v61, 0.0  ;;  %v989_v12 = vmul.f32 %v2173_v40, %v468_v4  ;;  %v1021_v13 = vmul.f32 %v2173_v40, %v596_v5 }
 0x116   :  { %v1716_v10 = vpack.c.bf16 %v1123_v2, %v1122_v0  ;;  %v1796_v11 = vpack.c.bf16 %v1155_v3, %v1154_v1  ;;  %v1932_v14 = vpop.f32.mrf.mxu0  ;;  %v1964_v15 = vpop.f32.mrf.mxu1  ;;  %v1062_v18 = vadd.f32 %v2180_v45, %v991_v62  ;;  %v1094_v19 = vadd.f32 %v2180_v45, %v1023_v63 }
 0x117   :  { %v1711_v16 = vpack.c.bf16 %v1121_v8, %v1120_v6  ;;  %v1791_v17 = vpack.c.bf16 %v1153_v9, %v1152_v7  ;;  %v992_v20 = vmul.f32 %v1932_v14, %v2173_v40  ;;  %v1024_v21 = vmul.f32 %v1964_v15, %v2173_v40 }
 0x118   :  { %1828 = vst [vmem:[%s2408_s4 + $0x58] sm:$0xff] %v1716_v10   ;;  %1844 = vst [vmem:[%s2408_s4 + $0xd8] sm:$0xff] %v1796_v11   ;;  %v471_v22 = vpop.f32.mrf.mxu0  ;;  %v599_v23 = vpop.f32.mrf.mxu1  ;;  %v1060_v24 = vadd.f32 %v2180_v45, %v989_v12  ;;  %v1092_v25 = vadd.f32 %v2180_v45, %v1021_v13  ;;  %v1126_v32 = vmax.f32 %v1062_v18, 0.0  ;;  %v1158_v33 = vmax.f32 %v1094_v19, 0.0 }
 0x119   :  { %1827 = vst [vmem:[%s2408_s4 + $0x50] sm:$0xff] %v1711_v16   ;;  %1843 = vst [vmem:[%s2408_s4 + $0xd0] sm:$0xff] %v1791_v17   ;;  %v990_v26 = vmul.f32 %v2173_v40, %v471_v22  ;;  %v1022_v27 = vmul.f32 %v2173_v40, %v599_v23  ;;  %v1063_v28 = vadd.f32 %v2180_v45, %v992_v20 }
 0x11a   :  { %v1095_v29 = vadd.f32 %v2180_v45, %v1024_v21  ;;  %v1935_v30 = vpop.f32.mrf.mxu0  ;;  %v1967_v31 = vpop.f32.mrf.mxu1  ;;  %v1124_v43 = vmax.f32 %v1060_v24, 0.0  ;;  %v1156_v44 = vmax.f32 %v1092_v25, 0.0 }
 0x11b   :  { %v1061_v34 = vadd.f32 %v2180_v45, %v990_v26  ;;  %v1093_v35 = vadd.f32 %v2180_v45, %v1022_v27  ;;  %v1127_v36 = vmax.f32 %v1063_v28, 0.0  ;;  %v995_v38 = vmul.f32 %v1935_v30, %v2173_v40 }
 0x11c   :  { %v1159_v37 = vmax.f32 %v1095_v29, 0.0  ;;  %v1027_v39 = vmul.f32 %v1967_v31, %v2173_v40  ;;  %v484_v41 = vpop.f32.mrf.mxu0  ;;  %v612_v42 = vpop.f32.mrf.mxu1 }
 0x11d   :  { %v1125_v46 = vmax.f32 %v1061_v34, 0.0  ;;  %v1157_v47 = vmax.f32 %v1093_v35, 0.0  ;;  %v1726_v48 = vpack.c.bf16 %v1127_v36, %v1126_v32  ;;  %v993_v50 = vmul.f32 %v2173_v40, %v484_v41 }
 0x11e   :  { %v1806_v49 = vpack.c.bf16 %v1159_v37, %v1158_v33  ;;  %v1025_v51 = vmul.f32 %v2173_v40, %v612_v42  ;;  %v1936_v52 = vpop.f32.mrf.mxu0  ;;  %v1968_v53 = vpop.f32.mrf.mxu1  ;;  %v1066_v56 = vadd.f32 %v2180_v45, %v995_v38  ;;  %v1098_v57 = vadd.f32 %v2180_v45, %v1027_v39 }
 0x11f   :  { %v1721_v54 = vpack.c.bf16 %v1125_v46, %v1124_v43  ;;  %v1801_v55 = vpack.c.bf16 %v1157_v47, %v1156_v44  ;;  %1830 = vst [vmem:[%s2408_s4 + $0x68] sm:$0xff] %v1726_v48   ;;  %v996_v58 = vmul.f32 %v1936_v52, %v2173_v40  ;;  %v1028_v59 = vmul.f32 %v1968_v53, %v2173_v40 }
 0x120   :  { %1846 = vst [vmem:[%s2408_s4 + $0xe8] sm:$0xff] %v1806_v49   ;;  %v487_v60 = vpop.f32.mrf.mxu0  ;;  %v615_v61 = vpop.f32.mrf.mxu1  ;;  %v1064_v62 = vadd.f32 %v2180_v45, %v993_v50  ;;  %v1096_v63 = vadd.f32 %v2180_v45, %v1025_v51  ;;  %v1130_v6 = vmax.f32 %v1066_v56, 0.0  ;;  %v1162_v7 = vmax.f32 %v1098_v57, 0.0 }
 0x121   :  { %1829 = vst [vmem:[%s2408_s4 + $0x60] sm:$0xff] %v1721_v54   ;;  %1845 = vst [vmem:[%s2408_s4 + $0xe0] sm:$0xff] %v1801_v55   ;;  %v994_v0 = vmul.f32 %v2173_v40, %v487_v60  ;;  %v1026_v1 = vmul.f32 %v2173_v40, %v615_v61  ;;  %v1067_v2 = vadd.f32 %v2180_v45, %v996_v58 }
 0x122   :  { %v1099_v3 = vadd.f32 %v2180_v45, %v1028_v59  ;;  %v1128_v10 = vmax.f32 %v1064_v62, 0.0  ;;  %v1160_v11 = vmax.f32 %v1096_v63, 0.0 }
 0x123   :  { %v1065_v4 = vadd.f32 %v2180_v45, %v994_v0  ;;  %v1097_v5 = vadd.f32 %v2180_v45, %v1026_v1  ;;  %v1131_v8 = vmax.f32 %v1067_v2, 0.0 }
 0x124   :  { %v1163_v9 = vmax.f32 %v1099_v3, 0.0 }
 0x125   :  { %v1129_v12 = vmax.f32 %v1065_v4, 0.0  ;;  %v1161_v13 = vmax.f32 %v1097_v5, 0.0  ;;  %v1736_v14 = vpack.c.bf16 %v1131_v8, %v1130_v6 }
 0x126   :  { %v1816_v15 = vpack.c.bf16 %v1163_v9, %v1162_v7 }
 0x127   :  { %v1731_v16 = vpack.c.bf16 %v1129_v12, %v1128_v10  ;;  %v1811_v40 = vpack.c.bf16 %v1161_v13, %v1160_v11  ;;  %1832 = vst [vmem:[%s2408_s4 + $0x78] sm:$0xff] %v1736_v14  }
 0x128   :  { %1848 = vst [vmem:[%s2408_s4 + $0xf8] sm:$0xff] %v1816_v15  }
 0x129   :  { %1831 = vst [vmem:[%s2408_s4 + $0x70] sm:$0xff] %v1731_v16   ;;  %1847 = vst [vmem:[%s2408_s4 + $0xf0] sm:$0xff] %v1811_v40  }

// kernel: model.11
= control target key start
LH: loop header
LB: loop body
LE: loop exit
PB: predicated region body
PF: predicated region fallthrough
CT: control target
= control target key end

     0   :  { %s778_s1 = inlined_call_operand.vmem [shape: bf16[128,128], index: 1, kind: input, shape index: {}]   ;;  %s779_s0 = inlined_call_operand.vmem [shape: bf16[128,128], index: 0, kind: input, shape index: {}]   ;;  %s780_s2 = inlined_call_operand.vmem [shape: f32[1,128], index: 2, kind: input, shape index: {}]   ;;  %s781_s3 = inlined_call_operand.vmem [shape: f32[1,128], index: 3, kind: input, shape index: {}]   ;;  %s782_s4 = inlined_call_operand.vmem [shape: bf16[128,128], index: 4, kind: output, shape index: {}]  }
   0x1   :  { %v641_v0 = vld [vmem:[%s778_s1 + $0x38] sm:$0xff]   ;;  %v642_v1 = vld [vmem:[%s778_s1 + $0x30] sm:$0xff]   ;;  %v643_v2 = vld [vmem:[%s778_s1 + $0x28] sm:$0xff]  }
   0x2   :  { %593 = vmatprep.subr.bf16.mxu0 %v641_v0  ;;  %625 = vmatprep.subr.bf16.mxu1 %v641_v0  ;;  %v644_v3 = vld [vmem:[%s778_s1 + $0x20] sm:$0xff]   ;;  %v645_v6 = vld [vmem:[%s778_s1 + $0x18] sm:$0xff]   ;;  %v646_v7 = vld [vmem:[%s778_s1 + $0x10] sm:$0xff]  }
   0x3   :  { %594 = vmatpush3.bf16.msra.mxu0 %v641_v0  ;;  %633 = vmatpush3.bf16.msra.mxu1 %v641_v0  ;;  %v649_v4 = vld [vmem:[%s779_s0] sm:$0xff]   ;;  %v647_v8 = vld [vmem:[%s778_s1 + $0x8] sm:$0xff]   ;;  %v653_v12 = vld [vmem:[%s779_s0 + $0x10] sm:$0xff]  }
   0x4   :  { %595 = vmatprep.subr.bf16.mxu0 %v642_v1  ;;  %626 = vmatprep.subr.bf16.mxu1 %v642_v1  ;;  %v650_v5 = vld [vmem:[%s779_s0 + $0x20] sm:$0xff]   ;;  %v651_v10 = vld [vmem:[%s779_s0 + $0x8] sm:$0xff]   ;;  %v654_v13 = vld [vmem:[%s779_s0 + $0x30] sm:$0xff]  }
   0x5   :  { %609 = vmatprep.mubr.bf16.mxu0 %v649_v4  ;;  %617 = vmatprep.mubr.bf16.mxu1 %v650_v5  ;;  %v648_v9 = vld [vmem:[%s778_s1] sm:$0xff]   ;;  %v652_v11 = vld [vmem:[%s779_s0 + $0x28] sm:$0xff]   ;;  %v655_v14 = vld [vmem:[%s779_s0 + $0x18] sm:$0xff]  }
   0x6   :  { %v656_v15 = vld [vmem:[%s779_s0 + $0x38] sm:$0xff]   ;;  %v733_v16 = vld [vmem:[%s780_s2] ss:$0 sm:$0xff] }
   0x7   :  { %596 = vmatpush3.bf16.msra.mxu0 %v642_v1  ;;  %634 = vmatpush3.bf16.msra.mxu1 %v642_v1  ;;  %v497_v21 = vld [vmem:[%s781_s3] ss:$0 sm:$0xff] }
   0x8   :  { %597 = vmatprep.subr.bf16.mxu0 %v643_v2  ;;  %627 = vmatprep.subr.bf16.mxu1 %v643_v2 }
   0xb   :  { %598 = vmatpush3.bf16.msra.mxu0 %v643_v2  ;;  %635 = vmatpush3.bf16.msra.mxu1 %v643_v2 }
   0xc   :  { %599 = vmatprep.subr.bf16.mxu0 %v644_v3  ;;  %628 = vmatprep.subr.bf16.mxu1 %v644_v3 }
   0xf   :  { %600 = vmatpush3.bf16.msra.mxu0 %v644_v3  ;;  %636 = vmatpush3.bf16.msra.mxu1 %v644_v3 }
  0x10   :  { %601 = vmatprep.subr.bf16.mxu0 %v645_v6  ;;  %629 = vmatprep.subr.bf16.mxu1 %v645_v6 }
  0x13   :  { %602 = vmatpush3.bf16.msra.mxu0 %v645_v6  ;;  %637 = vmatpush3.bf16.msra.mxu1 %v645_v6 }
  0x14   :  { %603 = vmatprep.subr.bf16.mxu0 %v646_v7  ;;  %630 = vmatprep.subr.bf16.mxu1 %v646_v7 }
  0x17   :  { %604 = vmatpush3.bf16.msra.mxu0 %v646_v7  ;;  %638 = vmatpush3.bf16.msra.mxu1 %v646_v7 }
  0x18   :  { %605 = vmatprep.subr.bf16.mxu0 %v647_v8  ;;  %631 = vmatprep.subr.bf16.mxu1 %v647_v8 }
  0x1b   :  { %606 = vmatpush3.bf16.msra.mxu0 %v647_v8  ;;  %639 = vmatpush3.bf16.msra.mxu1 %v647_v8 }
  0x1c   :  { %607 = vmatprep.subr.bf16.mxu0 %v648_v9  ;;  %632 = vmatprep.subr.bf16.mxu1 %v648_v9 }
  0x1f   :  { %608 = vmatpush3.bf16.msra.mxu0 %v648_v9  ;;  %640 = vmatpush3.bf16.msra.mxu1 %v648_v9 }
  0x22   :  { %610 = vmatmul.mubr.bf16.vlgmr.msra.gmra.mxu0 %v651_v10  ;;  %618 = vmatmul.mubr.bf16.vlgmr.msra.gmra.mxu1 %v652_v11 }
  0x23   :  { %613 = vmatprep.mubr.bf16.mxu0 %v653_v12  ;;  %621 = vmatprep.mubr.bf16.mxu1 %v654_v13 }
  0x2a   :  { %614 = vmatmul.mubr.bf16.gmra.mxu0 %v655_v14  ;;  %622 = vmatmul.mubr.bf16.gmra.mxu1 %v656_v15 }
  0xe2   :  { %v611_v17 = vpop.f32.mrf.mxu0  ;;  %v619_v18 = vpop.f32.mrf.mxu1 }
  0xe3   :  { %v343_v19 = vmul.f32 %v611_v17, %v733_v16  ;;  %v351_v20 = vmul.f32 %v619_v18, %v733_v16 }
  0xe4   :  { %v180_v22 = vpop.f32.mrf.mxu0  ;;  %v212_v23 = vpop.f32.mrf.mxu1 }
  0xe5   :  { %v341_v24 = vmul.f32 %v733_v16, %v180_v22  ;;  %v349_v25 = vmul.f32 %v733_v16, %v212_v23  ;;  %v366_v28 = vadd.f32 %v497_v21, %v343_v19  ;;  %v374_v29 = vadd.f32 %v497_v21, %v351_v20 }
  0xe6   :  { %v612_v26 = vpop.f32.mrf.mxu0  ;;  %v620_v27 = vpop.f32.mrf.mxu1 }
  0xe7   :  { %v344_v30 = vmul.f32 %v612_v26, %v733_v16  ;;  %v352_v31 = vmul.f32 %v620_v27, %v733_v16  ;;  %v364_v34 = vadd.f32 %v497_v21, %v341_v24  ;;  %v372_v35 = vadd.f32 %v497_v21, %v349_v25 }
  0xe8   :  { %v183_v32 = vpop.f32.mrf.mxu0  ;;  %v215_v33 = vpop.f32.mrf.mxu1  ;;  %v382_v42 = vmax.f32 %v366_v28, 0.0  ;;  %v390_v43 = vmax.f32 %v374_v29, 0.0 }
  0xe9   :  { %v342_v36 = vmul.f32 %v733_v16, %v183_v32  ;;  %v350_v37 = vmul.f32 %v733_v16, %v215_v33  ;;  %v367_v38 = vadd.f32 %v497_v21, %v344_v30  ;;  %v375_v39 = vadd.f32 %v497_v21, %v352_v31 }
  0xea   :  { %v615_v40 = vpop.f32.mrf.mxu0  ;;  %v623_v41 = vpop.f32.mrf.mxu1  ;;  %v380_v52 = vmax.f32 %v364_v34, 0.0  ;;  %v388_v53 = vmax.f32 %v372_v35, 0.0 }
  0xeb   :  { %v365_v44 = vadd.f32 %v497_v21, %v342_v36  ;;  %v373_v45 = vadd.f32 %v497_v21, %v350_v37  ;;  %v383_v46 = vmax.f32 %v367_v38, 0.0  ;;  %v391_v47 = vmax.f32 %v375_v39, 0.0 }
  0xec   :  { %v347_v48 = vmul.f32 %v615_v40, %v733_v16  ;;  %v355_v49 = vmul.f32 %v623_v41, %v733_v16  ;;  %v196_v50 = vpop.f32.mrf.mxu0  ;;  %v228_v51 = vpop.f32.mrf.mxu1 }
  0xed   :  { %v381_v54 = vmax.f32 %v365_v44, 0.0  ;;  %v389_v55 = vmax.f32 %v373_v45, 0.0  ;;  %v538_v56 = vpack.c.bf16 %v383_v46, %v382_v42  ;;  %v558_v57 = vpack.c.bf16 %v391_v47, %v390_v43 }
  0xee   :  { %v345_v58 = vmul.f32 %v733_v16, %v196_v50  ;;  %v353_v59 = vmul.f32 %v733_v16, %v228_v51  ;;  %v616_v60 = vpop.f32.mrf.mxu0  ;;  %v624_v61 = vpop.f32.mrf.mxu1  ;;  %v370_v0 = vadd.f32 %v497_v21, %v347_v48  ;;  %v378_v1 = vadd.f32 %v497_v21, %v355_v49 }
  0xef   :  { %v533_v62 = vpack.c.bf16 %v381_v54, %v380_v52  ;;  %v553_v63 = vpack.c.bf16 %v389_v55, %v388_v53  ;;  %570 = vst [vmem:[%s782_s4 + $0x8] sm:$0xff] %v538_v56   ;;  %574 = vst [vmem:[%s782_s4 + $0x28] sm:$0xff] %v558_v57   ;;  %v348_v2 = vmul.f32 %v616_v60, %v733_v16 }
  0xf0   :  { %v356_v3 = vmul.f32 %v624_v61, %v733_v16  ;;  %v199_v4 = vpop.f32.mrf.mxu0  ;;  %v231_v5 = vpop.f32.mrf.mxu1  ;;  %v368_v6 = vadd.f32 %v497_v21, %v345_v58  ;;  %v376_v7 = vadd.f32 %v497_v21, %v353_v59  ;;  %v386_v14 = vmax.f32 %v370_v0, 0.0 }
  0xf1   :  { %534 = vst [vmem:[%s782_s4] sm:$0xff] %v533_v62   ;;  %573 = vst [vmem:[%s782_s4 + $0x20] sm:$0xff] %v553_v63   ;;  %v346_v8 = vmul.f32 %v733_v16, %v199_v4  ;;  %v354_v9 = vmul.f32 %v733_v16, %v231_v5  ;;  %v371_v10 = vadd.f32 %v497_v21, %v348_v2  ;;  %v394_v15 = vmax.f32 %v378_v1, 0.0 }
  0xf2   :  { %v379_v11 = vadd.f32 %v497_v21, %v356_v3  ;;  %v384_v19 = vmax.f32 %v368_v6, 0.0  ;;  %v392_v20 = vmax.f32 %v376_v7, 0.0 }
  0xf3   :  { %v369_v12 = vadd.f32 %v497_v21, %v346_v8  ;;  %v377_v13 = vadd.f32 %v497_v21, %v354_v9  ;;  %v387_v17 = vmax.f32 %v371_v10, 0.0 }
  0xf4   :  { %v395_v18 = vmax.f32 %v379_v11, 0.0 }
  0xf5   :  { %v385_v22 = vmax.f32 %v369_v12, 0.0  ;;  %v393_v23 = vmax.f32 %v377_v13, 0.0  ;;  %v548_v24 = vpack.c.bf16 %v387_v17, %v386_v14 }
  0xf6   :  { %v568_v25 = vpack.c.bf16 %v395_v18, %v394_v15 }
  0xf7   :  { %v543_v26 = vpack.c.bf16 %v385_v22, %v384_v19  ;;  %v563_v27 = vpack.c.bf16 %v393_v23, %v392_v20  ;;  %572 = vst [vmem:[%s782_s4 + $0x18] sm:$0xff] %v548_v24  }
  0xf8   :  { %576 = vst [vmem:[%s782_s4 + $0x38] sm:$0xff] %v568_v25  }
  0xf9   :  { %571 = vst [vmem:[%s782_s4 + $0x10] sm:$0xff] %v543_v26   ;;  %575 = vst [vmem:[%s782_s4 + $0x30] sm:$0xff] %v563_v27  }

// kernel: model.10
= control target key start
LH: loop header
LB: loop body
LE: loop exit
PB: predicated region body
PF: predicated region fallthrough
CT: control target
= control target key end

     0   :  { %s931_s1 = inlined_call_operand.vmem [shape: bf16[128,128], index: 1, kind: input, shape index: {}]   ;;  %s932_s0 = inlined_call_operand.vmem [shape: bf16[128,128], index: 0, kind: input, shape index: {}]   ;;  %s933_s2 = inlined_call_operand.vmem [shape: f32[1,128], index: 2, kind: input, shape index: {}]   ;;  %s934_s4 = inlined_call_operand.vmem [shape: bf16[128,128], index: 4, kind: input, shape index: {}]   ;;  %s935_s3 = inlined_call_operand.vmem [shape: f32[1,128], index: 3, kind: input, shape index: {}]   ;;  %s936_s5 = inlined_call_operand.vmem [shape: bf16[128,128], index: 5, kind: output, shape index: {}]  }
   0x1   :  { %v731_v0 = vld [vmem:[%s931_s1 + $0x38] sm:$0xff]   ;;  %v732_v1 = vld [vmem:[%s931_s1 + $0x30] sm:$0xff]   ;;  %v733_v2 = vld [vmem:[%s931_s1 + $0x28] sm:$0xff]  }
   0x2   :  { %683 = vmatprep.subr.bf16.mxu0 %v731_v0  ;;  %715 = vmatprep.subr.bf16.mxu1 %v731_v0  ;;  %v734_v3 = vld [vmem:[%s931_s1 + $0x20] sm:$0xff]   ;;  %v735_v6 = vld [vmem:[%s931_s1 + $0x18] sm:$0xff]   ;;  %v736_v7 = vld [vmem:[%s931_s1 + $0x10] sm:$0xff]  }
   0x3   :  { %684 = vmatpush3.bf16.msra.mxu0 %v731_v0  ;;  %723 = vmatpush3.bf16.msra.mxu1 %v731_v0  ;;  %v739_v4 = vld [vmem:[%s932_s0] sm:$0xff]   ;;  %v737_v8 = vld [vmem:[%s931_s1 + $0x8] sm:$0xff]   ;;  %v743_v12 = vld [vmem:[%s932_s0 + $0x10] sm:$0xff]  }
   0x4   :  { %685 = vmatprep.subr.bf16.mxu0 %v732_v1  ;;  %716 = vmatprep.subr.bf16.mxu1 %v732_v1  ;;  %v740_v5 = vld [vmem:[%s932_s0 + $0x20] sm:$0xff]   ;;  %v741_v10 = vld [vmem:[%s932_s0 + $0x8] sm:$0xff]   ;;  %v744_v13 = vld [vmem:[%s932_s0 + $0x30] sm:$0xff]  }
   0x5   :  { %699 = vmatprep.mubr.bf16.mxu0 %v739_v4  ;;  %707 = vmatprep.mubr.bf16.mxu1 %v740_v5  ;;  %v738_v9 = vld [vmem:[%s931_s1] sm:$0xff]   ;;  %v742_v11 = vld [vmem:[%s932_s0 + $0x28] sm:$0xff]   ;;  %v745_v14 = vld [vmem:[%s932_s0 + $0x18] sm:$0xff]  }
   0x6   :  { %v746_v15 = vld [vmem:[%s932_s0 + $0x38] sm:$0xff]   ;;  %v828_v16 = vld [vmem:[%s933_s2] ss:$0 sm:$0xff]  ;;  %v653_v17 = vld [vmem:[%s934_s4 + $0x8] sm:$0xff]  }
   0x7   :  { %686 = vmatpush3.bf16.msra.mxu0 %v732_v1  ;;  %724 = vmatpush3.bf16.msra.mxu1 %v732_v1  ;;  %v657_v18 = vld [vmem:[%s934_s4 + $0x28] sm:$0xff]   ;;  %v839_v20 = vld [vmem:[%s935_s3] ss:$0 sm:$0xff]  ;;  %v587_v26 = vunpack.c.l.bf16 %v653_v17  ;;  %v856_v34 = vld [vmem:[%s934_s4 + $0x18] sm:$0xff]   ;;  %v588_v39 = vunpack.c.h.bf16 %v653_v17 }
   0x8   :  { %687 = vmatprep.subr.bf16.mxu0 %v733_v2  ;;  %717 = vmatprep.subr.bf16.mxu1 %v733_v2  ;;  %v582_v24 = vld [vmem:[%s934_s4] sm:$0xff]   ;;  %v603_v27 = vunpack.c.l.bf16 %v657_v18  ;;  %v861_v35 = vld [vmem:[%s934_s4 + $0x38] sm:$0xff]   ;;  %v604_v41 = vunpack.c.h.bf16 %v657_v18  ;;  %v866_v42 = vld [vmem:[%s934_s4 + $0x10] sm:$0xff]   ;;  %v595_v52 = vunpack.c.l.bf16 %v856_v34 }
   0x9   :  { %v656_v25 = vld [vmem:[%s934_s4 + $0x20] sm:$0xff]   ;;  %v583_v36 = vunpack.c.l.bf16 %v582_v24  ;;  %v871_v43 = vld [vmem:[%s934_s4 + $0x30] sm:$0xff]   ;;  %v584_v46 = vunpack.c.h.bf16 %v582_v24  ;;  %v611_v53 = vunpack.c.l.bf16 %v861_v35  ;;  %v591_v56 = vunpack.c.l.bf16 %v866_v42 }
   0xa   :  { %v599_v37 = vunpack.c.l.bf16 %v656_v25  ;;  %v600_v47 = vunpack.c.h.bf16 %v656_v25  ;;  %v607_v57 = vunpack.c.l.bf16 %v871_v43 }
   0xb   :  { %688 = vmatpush3.bf16.msra.mxu0 %v733_v2  ;;  %725 = vmatpush3.bf16.msra.mxu1 %v733_v2 }
   0xc   :  { %689 = vmatprep.subr.bf16.mxu0 %v734_v3  ;;  %718 = vmatprep.subr.bf16.mxu1 %v734_v3 }
   0xf   :  { %690 = vmatpush3.bf16.msra.mxu0 %v734_v3  ;;  %726 = vmatpush3.bf16.msra.mxu1 %v734_v3 }
  0x10   :  { %691 = vmatprep.subr.bf16.mxu0 %v735_v6  ;;  %719 = vmatprep.subr.bf16.mxu1 %v735_v6 }
  0x13   :  { %692 = vmatpush3.bf16.msra.mxu0 %v735_v6  ;;  %727 = vmatpush3.bf16.msra.mxu1 %v735_v6 }
  0x14   :  { %693 = vmatprep.subr.bf16.mxu0 %v736_v7  ;;  %720 = vmatprep.subr.bf16.mxu1 %v736_v7 }
  0x17   :  { %694 = vmatpush3.bf16.msra.mxu0 %v736_v7  ;;  %728 = vmatpush3.bf16.msra.mxu1 %v736_v7 }
  0x18   :  { %695 = vmatprep.subr.bf16.mxu0 %v737_v8  ;;  %721 = vmatprep.subr.bf16.mxu1 %v737_v8 }
  0x1b   :  { %696 = vmatpush3.bf16.msra.mxu0 %v737_v8  ;;  %729 = vmatpush3.bf16.msra.mxu1 %v737_v8 }
  0x1c   :  { %697 = vmatprep.subr.bf16.mxu0 %v738_v9  ;;  %722 = vmatprep.subr.bf16.mxu1 %v738_v9 }
  0x1f   :  { %698 = vmatpush3.bf16.msra.mxu0 %v738_v9  ;;  %730 = vmatpush3.bf16.msra.mxu1 %v738_v9 }
  0x22   :  { %700 = vmatmul.mubr.bf16.vlgmr.msra.gmra.mxu0 %v741_v10  ;;  %708 = vmatmul.mubr.bf16.vlgmr.msra.gmra.mxu1 %v742_v11 }
  0x23   :  { %703 = vmatprep.mubr.bf16.mxu0 %v743_v12  ;;  %711 = vmatprep.mubr.bf16.mxu1 %v744_v13 }
  0x2a   :  { %704 = vmatmul.mubr.bf16.gmra.mxu0 %v745_v14  ;;  %712 = vmatmul.mubr.bf16.gmra.mxu1 %v746_v15 }
  0xe2   :  { %v701_v19 = vpop.f32.mrf.mxu0  ;;  %v709_v21 = vpop.f32.mrf.mxu1 }
  0xe3   :  { %v346_v22 = vmul.f32 %v701_v19, %v828_v16  ;;  %v354_v23 = vmul.f32 %v709_v21, %v828_v16 }
  0xe4   :  { %v183_v28 = vpop.f32.mrf.mxu0  ;;  %v215_v29 = vpop.f32.mrf.mxu1 }
  0xe5   :  { %v369_v30 = vadd.f32 %v839_v20, %v346_v22  ;;  %v377_v31 = vadd.f32 %v839_v20, %v354_v23  ;;  %v344_v32 = vmul.f32 %v828_v16, %v183_v28  ;;  %v352_v33 = vmul.f32 %v828_v16, %v215_v29 }
  0xe6   :  { %v702_v38 = vpop.f32.mrf.mxu0  ;;  %v710_v40 = vpop.f32.mrf.mxu1 }
  0xe7   :  { %v367_v44 = vadd.f32 %v839_v20, %v344_v32  ;;  %v375_v45 = vadd.f32 %v839_v20, %v352_v33  ;;  %v347_v48 = vmul.f32 %v702_v38, %v828_v16  ;;  %v355_v49 = vmul.f32 %v710_v40, %v828_v16 }
  0xe8   :  { %v186_v50 = vpop.f32.mrf.mxu0  ;;  %v218_v51 = vpop.f32.mrf.mxu1  ;;  %v417_v54 = vadd.f32 %v587_v26, %v369_v30  ;;  %v425_v55 = vadd.f32 %v603_v27, %v377_v31 }
  0xe9   :  { %v370_v58 = vadd.f32 %v839_v20, %v347_v48  ;;  %v378_v59 = vadd.f32 %v839_v20, %v355_v49  ;;  %v345_v60 = vmul.f32 %v828_v16, %v186_v50  ;;  %v353_v61 = vmul.f32 %v828_v16, %v218_v51 }
  0xea   :  { %v705_v62 = vpop.f32.mrf.mxu0  ;;  %v713_v63 = vpop.f32.mrf.mxu1  ;;  %v415_v0 = vadd.f32 %v583_v36, %v367_v44  ;;  %v423_v1 = vadd.f32 %v599_v37, %v375_v45  ;;  %v433_v10 = vmax.f32 %v417_v54, 0.0  ;;  %v441_v11 = vmax.f32 %v425_v55, 0.0 }
  0xeb   :  { %v350_v2 = vmul.f32 %v705_v62, %v828_v16  ;;  %v358_v3 = vmul.f32 %v713_v63, %v828_v16  ;;  %v418_v4 = vadd.f32 %v588_v39, %v370_v58  ;;  %v426_v5 = vadd.f32 %v604_v41, %v378_v59 }
  0xec   :  { %v368_v6 = vadd.f32 %v839_v20, %v345_v60  ;;  %v376_v7 = vadd.f32 %v839_v20, %v353_v61  ;;  %v199_v8 = vpop.f32.mrf.mxu0  ;;  %v231_v9 = vpop.f32.mrf.mxu1  ;;  %v431_v22 = vmax.f32 %v415_v0, 0.0  ;;  %v439_v23 = vmax.f32 %v423_v1, 0.0 }
  0xed   :  { %v348_v12 = vmul.f32 %v828_v16, %v199_v8  ;;  %v356_v13 = vmul.f32 %v828_v16, %v231_v9  ;;  %v434_v14 = vmax.f32 %v418_v4, 0.0  ;;  %v442_v15 = vmax.f32 %v426_v5, 0.0 }
  0xee   :  { %v416_v17 = vadd.f32 %v584_v46, %v368_v6  ;;  %v424_v18 = vadd.f32 %v600_v47, %v376_v7  ;;  %v706_v19 = vpop.f32.mrf.mxu0  ;;  %v714_v21 = vpop.f32.mrf.mxu1  ;;  %v373_v24 = vadd.f32 %v839_v20, %v350_v2  ;;  %v381_v25 = vadd.f32 %v839_v20, %v358_v3 }
  0xef   :  { %v621_v26 = vpack.c.bf16 %v434_v14, %v433_v10  ;;  %v641_v27 = vpack.c.bf16 %v442_v15, %v441_v11  ;;  %v371_v32 = vadd.f32 %v839_v20, %v348_v12  ;;  %v379_v33 = vadd.f32 %v839_v20, %v356_v13 }
  0xf0   :  { %v432_v28 = vmax.f32 %v416_v17, 0.0  ;;  %v440_v29 = vmax.f32 %v424_v18, 0.0  ;;  %v202_v30 = vpop.f32.mrf.mxu0  ;;  %v234_v31 = vpop.f32.mrf.mxu1  ;;  %v596_v36 = vunpack.c.h.bf16 %v856_v34  ;;  %v612_v37 = vunpack.c.h.bf16 %v861_v35 }
  0xf1   :  { %660 = vst [vmem:[%s936_s5 + $0x8] sm:$0xff] %v621_v26   ;;  %664 = vst [vmem:[%s936_s5 + $0x28] sm:$0xff] %v641_v27   ;;  %v351_v40 = vmul.f32 %v706_v19, %v828_v16  ;;  %v359_v41 = vmul.f32 %v714_v21, %v828_v16  ;;  %v349_v44 = vmul.f32 %v828_v16, %v202_v30  ;;  %v592_v34 = vunpack.c.h.bf16 %v866_v42 }
  0xf2   :  { %v616_v38 = vpack.c.bf16 %v432_v28, %v431_v22  ;;  %v636_v39 = vpack.c.bf16 %v440_v29, %v439_v23  ;;  %v357_v35 = vmul.f32 %v828_v16, %v234_v31  ;;  %v608_v45 = vunpack.c.h.bf16 %v871_v43 }
  0xf3   :  { %v421_v46 = vadd.f32 %v595_v52, %v373_v24  ;;  %v429_v47 = vadd.f32 %v611_v53, %v381_v25  ;;  %v374_v48 = vadd.f32 %v839_v20, %v351_v40  ;;  %v382_v49 = vadd.f32 %v839_v20, %v359_v41 }
  0xf4   :  { %617 = vst [vmem:[%s936_s5] sm:$0xff] %v616_v38   ;;  %663 = vst [vmem:[%s936_s5 + $0x20] sm:$0xff] %v636_v39   ;;  %v419_v50 = vadd.f32 %v591_v56, %v371_v32  ;;  %v427_v42 = vadd.f32 %v607_v57, %v379_v33  ;;  %v372_v16 = vadd.f32 %v839_v20, %v349_v44 }
  0xf5   :  { %v380_v43 = vadd.f32 %v839_v20, %v357_v35  ;;  %v422_v51 = vadd.f32 %v596_v36, %v374_v48  ;;  %v430_v54 = vadd.f32 %v612_v37, %v382_v49  ;;  %v437_v59 = vmax.f32 %v421_v46, 0.0 }
  0xf6   :  { %v420_v55 = vadd.f32 %v592_v34, %v372_v16  ;;  %v445_v60 = vmax.f32 %v429_v47, 0.0  ;;  %v435_v52 = vmax.f32 %v419_v50, 0.0  ;;  %v443_v53 = vmax.f32 %v427_v42, 0.0 }
  0xf7   :  { %v428_v58 = vadd.f32 %v608_v45, %v380_v43  ;;  %v438_v61 = vmax.f32 %v422_v51, 0.0  ;;  %v446_v62 = vmax.f32 %v430_v54, 0.0 }
  0xf8   :  { %v436_v63 = vmax.f32 %v420_v55, 0.0 }
  0xf9   :  { %v444_v0 = vmax.f32 %v428_v58, 0.0  ;;  %v631_v1 = vpack.c.bf16 %v438_v61, %v437_v59  ;;  %v651_v2 = vpack.c.bf16 %v446_v62, %v445_v60 }
  0xfa   :  { %v626_v56 = vpack.c.bf16 %v436_v63, %v435_v52 }
  0xfb   :  { %v646_v57 = vpack.c.bf16 %v444_v0, %v443_v53  ;;  %662 = vst [vmem:[%s936_s5 + $0x18] sm:$0xff] %v631_v1   ;;  %666 = vst [vmem:[%s936_s5 + $0x38] sm:$0xff] %v651_v2  }
  0xfc   :  { %661 = vst [vmem:[%s936_s5 + $0x10] sm:$0xff] %v626_v56  }
  0xfd   :  { %665 = vst [vmem:[%s936_s5 + $0x30] sm:$0xff] %v646_v57  }

// kernel: model.8
= control target key start
LH: loop header
LB: loop body
LE: loop exit
PB: predicated region body
PF: predicated region fallthrough
CT: control target
= control target key end

     0   :  { %s2475_s15 = smov 0   ;;  %s2477_s16 = smov 0   ;;  %s2886_s0 = inlined_call_operand.vmem [shape: bf16[2,4,9,9,128], index: 0, kind: input, shape index: {}]   ;;  %s2887_s1 = inlined_call_operand.vmem [shape: bf16[1152,128], index: 1, kind: input, shape index: {}]   ;;  %s2888_s2 = inlined_call_operand.vmem [shape: f32[1,128], index: 2, kind: input, shape index: {}]   ;;  %s2889_s3 = inlined_call_operand.vmem [shape: f32[1,128], index: 3, kind: input, shape index: {}]   ;;  %s2890_s4 = inlined_call_operand.vmem [shape: bf16[2,64,128], index: 4, kind: output, shape index: {}]  }
   0x1   :  { %s2479_s17 = smov 0  }
   0x2 LB: > { %s26_s18 = sadd.s32 1, %s2444_s16  ;;  %p1833_p0 = scmp.ge.s32.totalorder %s2448_s17, 1  ;;  %s2448_s17 = sphi %s2479_s17, %s14_s17   ;;  %s2444_s16 = sphi %s2477_s16, %s2900_s16   ;;  %s2440_s15 = sphi %s2475_s15, %s2899_s15  }
   0x3   : > { %p28_p1 = scmp.ge.s32.totalorder %s26_s18, 2  ;;  %p176_p2 = scmp.lt.s32.totalorder %s2448_s17, 3 }
   0x5   : > { %s2902_s18 = smov (%p28_p1, %s26_s18), 0  ;;  %p177_p3 = pnand %p1833_p0, %p176_p2 }
   0x7   : > { %180 = sbr.rel (%p177_p3) target bundleno = 323 (0x143), region = 36 }
   0xc   : > { %v2306_v0 = vld [vmem:[%s2887_s1 + $0x78] sm:$0xff]   ;;  %v2310_v4 = vld [vmem:[%s2887_s1 + $0x70] sm:$0xff]   ;;  %v2314_v8 = vld [vmem:[%s2887_s1 + $0x68] sm:$0xff]   ;;  %p206_p4 = scmp.lt.s32.totalorder %s2440_s15, 1 }
   0xd   : > { %v2307_v1 = vld [vmem:[%s2887_s1 + $0xf8] sm:$0xff]   ;;  %2069 = vmatprep.subr.bf16.mxu0 %v2306_v0  ;;  %v2311_v5 = vld [vmem:[%s2887_s1 + $0xf0] sm:$0xff]   ;;  %v2315_v9 = vld [vmem:[%s2887_s1 + $0xe8] sm:$0xff]  }
   0xe   : > { %v2308_v2 = vld [vmem:[%s2887_s1 + $0x38] sm:$0xff]   ;;  %2109 = vmatprep.subr.bf16.mxu1 %v2307_v1  ;;  %v2312_v6 = vld [vmem:[%s2887_s1 + $0x30] sm:$0xff]   ;;  %v2316_v10 = vld [vmem:[%s2887_s1 + $0x28] sm:$0xff]   ;;  %s2904_s15 = smov (!%p206_p4, %s2440_s15), 1 }
   0xf   : > { %v2309_v3 = vld [vmem:[%s2887_s1 + $0xb8] sm:$0xff]   ;;  %2070 = vmatpush3.bf16.msra.mxu0 %v2308_v2  ;;  %v2313_v7 = vld [vmem:[%s2887_s1 + $0xb0] sm:$0xff]   ;;  %v2317_v11 = vld [vmem:[%s2887_s1 + $0xa8] sm:$0xff]   ;;  %s2281_s5 = smul.u32 288, %s2904_s15  ;;  %s2037_s19 = sshll.u32 %s2904_s15, 5 }
  0x10   : > { %2110 = vmatpush3.bf16.msra.mxu1 %v2309_v3  ;;  %2071 = vmatprep.subr.bf16.mxu0 %v2310_v4  ;;  %v2318_v12 = vld [vmem:[%s2887_s1 + $0x60] sm:$0xff]   ;;  %v2322_v16 = vld [vmem:[%s2887_s1 + $0x58] sm:$0xff]   ;;  %v2326_v20 = vld [vmem:[%s2887_s1 + $0x50] sm:$0xff]   ;;  %s219_s23 = scalar_lea.vmem %s2890_s4, %s2037_s19 }
  0x11   : > { %2111 = vmatprep.subr.bf16.mxu1 %v2311_v5  ;;  %v2319_v13 = vld [vmem:[%s2887_s1 + $0xe0] sm:$0xff]   ;;  %v2323_v17 = vld [vmem:[%s2887_s1 + $0xd8] sm:$0xff]   ;;  %v2327_v21 = vld [vmem:[%s2887_s1 + $0xd0] sm:$0xff]   ;;  %s2599_s20 = scalar_lea.vmem %s2886_s0, %s2281_s5 }
  0x12   : > { %v2320_v14 = vld [vmem:[%s2887_s1 + $0x20] sm:$0xff]   ;;  %v2324_v18 = vld [vmem:[%s2887_s1 + $0x18] sm:$0xff]   ;;  %v2328_v22 = vld [vmem:[%s2887_s1 + $0x10] sm:$0xff]  }
  0x13   : > { %2072 = vmatpush3.bf16.msra.mxu0 %v2312_v6  ;;  %v2321_v15 = vld [vmem:[%s2887_s1 + $0xa0] sm:$0xff]   ;;  %v2325_v19 = vld [vmem:[%s2887_s1 + $0x98] sm:$0xff]   ;;  %v2329_v23 = vld [vmem:[%s2887_s1 + $0x90] sm:$0xff]  }
  0x14   : > { %2112 = vmatpush3.bf16.msra.mxu1 %v2313_v7  ;;  %2073 = vmatprep.subr.bf16.mxu0 %v2314_v8  ;;  %v2330_v24 = vld [vmem:[%s2887_s1 + $0x48] sm:$0xff]   ;;  %v2334_v28 = vld [vmem:[%s2887_s1 + $0x40] sm:$0xff]   ;;  %v1845_v33 = vld [vmem:[%s2599_s20 + $0x90] sm:$0xf] }
  0x15   : > { %2113 = vmatprep.subr.bf16.mxu1 %v2315_v9  ;;  %v2331_v25 = vld [vmem:[%s2887_s1 + $0xc8] sm:$0xff]   ;;  %v2335_v29 = vld [vmem:[%s2887_s1 + $0xc0] sm:$0xff]   ;;  %v1846_v34 = vld [vmem:[%s2599_s20 + $0x98] sm:$0xf] }
  0x16   : > { %v2332_v26 = vld [vmem:[%s2887_s1 + $0x8] sm:$0xff]   ;;  %v2336_v30 = vld [vmem:[%s2887_s1] sm:$0xff]   ;;  %v1920_v35 = vcombine.low %v1845_v33, %v1846_v34  ;;  %v2345_v43 = vld [vmem:[%s2887_s1 + $0x178] sm:$0xff]  }
  0x17   : > { %2074 = vmatpush3.bf16.msra.mxu0 %v2316_v10  ;;  %v2333_v27 = vld [vmem:[%s2887_s1 + $0x88] sm:$0xff]   ;;  %v2337_v31 = vld [vmem:[%s2887_s1 + $0x80] sm:$0xff]   ;;  %v2346_v44 = vld [vmem:[%s2887_s1 + $0x1f8] sm:$0xff]  }
  0x18   : > { %2114 = vmatpush3.bf16.msra.mxu1 %v2317_v11  ;;  %2075 = vmatprep.subr.bf16.mxu0 %v2318_v12  ;;  %v2338_v32 = vld [vmem:[%s2599_s20 + $0x48] ss:$8 sps:$4 sm:$0xff]   ;;  %v226_v36 = vld [vmem:[%s2599_s20] sm:$0xf]  ;;  %v245_v38 = vld [vmem:[%s2599_s20 + $0x4] sm:$0x1] }
  0x19   : > { %2115 = vmatprep.subr.bf16.mxu1 %v2319_v13  ;;  %1354 = vmatprep.mubr.bf16.mxu0 %v2338_v32  ;;  %v227_v37 = vld [vmem:[%s2599_s20 + $0x8] sm:$0xf]  ;;  %v246_v39 = vld [vmem:[%s2599_s20 + $0xc] sm:$0x1]  ;;  %v1893_v41 = vcombine.low %v226_v36, %v245_v38  ;;  %v2347_v49 = vld [vmem:[%s2887_s1 + $0x138] sm:$0xff]  }
  0x1a   : > { %v1917_v40 = vcombine.low %v226_v36, %v227_v37  ;;  %1419 = vmatprep.mubr.bf16.mxu1 %v1920_v35  ;;  %v1894_v42 = vcombine.low %v227_v37, %v246_v39  ;;  %v2349_v52 = vld [vmem:[%s2887_s1 + $0x170] sm:$0xff]   ;;  %v2348_v55 = vld [vmem:[%s2887_s1 + $0x1b8] sm:$0xff]   ;;  %v1847_v62 = vld [vmem:[%s2599_s20 + $0xa0] sm:$0xf] }
  0x1b   : > { %2076 = vmatpush3.bf16.msra.mxu0 %v2320_v14  ;;  %v357_v45 = vshll.u32 %v1893_v41, 16  ;;  %v355_v47 = vshrl.u32 %v1893_v41, 16  ;;  %v1861_v56 = vld [vmem:[%s2599_s20 + $0x94] sm:$0x1]  ;;  %v2353_v60 = vld [vmem:[%s2599_s20 + $0x58] ss:$8 sps:$4 sm:$0xff]  }
  0x1c   : > { %2116 = vmatpush3.bf16.msra.mxu1 %v2321_v15  ;;  %2077 = vmatprep.subr.bf16.mxu0 %v2322_v16  ;;  %v364_v46 = vshll.u32 %v1894_v42, 16  ;;  %v362_v48 = vshrl.u32 %v1894_v42, 16  ;;  %v2351_v57 = vld [vmem:[%s2887_s1 + $0x130] sm:$0xff]   ;;  %v1862_v61 = vld [vmem:[%s2599_s20 + $0x9c] sm:$0x1]  ;;  %v2642_v4 = vcombine.low %v1845_v33, %v1861_v56  ;;  %v2360_v10 = vld [vmem:[%s2887_s1 + $0x168] sm:$0xff]  }
  0x1d   : > { %2117 = vmatprep.subr.bf16.mxu1 %v2323_v17  ;;  %v359_v50 = vrot.slane %v357_v45, 1  ;;  %v2350_v59 = vld [vmem:[%s2887_s1 + $0x1f0] sm:$0xff]   ;;  %v2634_v63 = vld [vmem:[%s2599_s20 + $0xa8] sm:$0xf]  ;;  %v229_v3 = vld [vmem:[%s2599_s20 + $0x18] sm:$0xf]  ;;  %v2649_v11 = vcombine.low %v1846_v34, %v1862_v61 }
  0x1e   : > { %v366_v51 = vrot.slane %v364_v46, 1  ;;  %v2352_v0 = vld [vmem:[%s2887_s1 + $0x1b0] sm:$0xff]   ;;  %v1929_v1 = vcombine.low %v1847_v62, %v2634_v63  ;;  %v248_v6 = vld [vmem:[%s2599_s20 + $0x1c] sm:$0x1]  ;;  %v2361_v12 = vld [vmem:[%s2887_s1 + $0x1e8] sm:$0xff]   ;;  %v453_v17 = vshll.u32 %v2642_v4, 16 }
  0x1f   : > { %2078 = vmatpush3.bf16.msra.mxu0 %v2324_v18  ;;  %v360_v53 = vor.u32 %v359_v50, %v355_v47  ;;  %v228_v2 = vld [vmem:[%s2599_s20 + $0x10] sm:$0xf]  ;;  %v247_v5 = vld [vmem:[%s2599_s20 + $0x14] sm:$0x1]  ;;  %v1896_v9 = vcombine.low %v229_v3, %v248_v6  ;;  %v1863_v18 = vld [vmem:[%s2599_s20 + $0xa4] sm:$0x1] }
  0x20   : > { %2118 = vmatpush3.bf16.msra.mxu1 %v2325_v19  ;;  %2079 = vmatprep.subr.bf16.mxu0 %v2326_v20  ;;  %v367_v54 = vor.u32 %v366_v51, %v362_v48  ;;  %v1926_v7 = vcombine.low %v228_v2, %v229_v3  ;;  %v1895_v8 = vcombine.low %v228_v2, %v247_v5  ;;  %v2362_v19 = vld [vmem:[%s2887_s1 + $0x128] sm:$0xff]   ;;  %v2367_v33 = vld [vmem:[%s2887_s1 + $0x1a0] sm:$0xff]   ;;  %v1849_v35 = vld [vmem:[%s2599_s20 + $0xb0] sm:$0xf]  ;;  %v455_v37 = vrot.slane %v453_v17, 1 }
  0x21   : > { %2119 = vmatprep.subr.bf16.mxu1 %v2327_v21  ;;  %v378_v14 = vshll.u32 %v1896_v9, 16  ;;  %v376_v16 = vshrl.u32 %v1896_v9, 16  ;;  %v2368_v34 = vld [vmem:[%s2599_s20 + $0x68] ss:$8 sps:$4 sm:$0xff]   ;;  %v1850_v36 = vld [vmem:[%s2599_s20 + $0xb8] sm:$0xf] }
  0x22   : > { %v1919_v58 = vcombine.low %v360_v53, %v367_v54  ;;  %v371_v13 = vshll.u32 %v1895_v8, 16  ;;  %v369_v15 = vshrl.u32 %v1895_v8, 16  ;;  %v1864_v39 = vld [vmem:[%s2599_s20 + $0xac] sm:$0x1]  ;;  %v230_v41 = vld [vmem:[%s2599_s20 + $0x20] sm:$0xf] }
  0x23   : > { %2080 = vmatpush3.bf16.msra.mxu0 %v2328_v22  ;;  %v380_v21 = vrot.slane %v378_v14, 1  ;;  %v2363_v22 = vld [vmem:[%s2887_s1 + $0x1a8] sm:$0xff]   ;;  %v1865_v42 = vld [vmem:[%s2599_s20 + $0xb4] sm:$0x1]  ;;  %v2375_v50 = vld [vmem:[%s2887_s1 + $0x158] sm:$0xff]   ;;  %v2693_v51 = vcombine.low %v2634_v63, %v1864_v39 }
  0x24   : > { %2120 = vmatpush3.bf16.msra.mxu1 %v2329_v23  ;;  %2081 = vmatprep.subr.bf16.mxu0 %v2330_v24  ;;  %v373_v20 = vrot.slane %v371_v13, 1  ;;  %v2364_v23 = vld [vmem:[%s2887_s1 + $0x160] sm:$0xff]   ;;  %v460_v24 = vshll.u32 %v2649_v11, 16  ;;  %v250_v45 = vld [vmem:[%s2599_s20 + $0x2c] sm:$0x1]  ;;  %v2379_v63 = vld [vmem:[%s2887_s1 + $0x150] sm:$0xff]  }
  0x25   : > { %2121 = vmatprep.subr.bf16.mxu1 %v2331_v25  ;;  %v2381_v5 = vld [vmem:[%s2887_s1 + $0x110] sm:$0xff]   ;;  %v1851_v13 = vld [vmem:[%s2599_s20 + $0xc0] sm:$0xf]  ;;  %v472_v17 = vshrl.u32 %v2693_v51, 16 }
  0x26   : > { %v374_v25 = vor.u32 %v373_v20, %v369_v15  ;;  %v462_v38 = vrot.slane %v460_v24, 1  ;;  %v2382_v9 = vld [vmem:[%s2887_s1 + $0x190] sm:$0xff]   ;;  %v1852_v15 = vld [vmem:[%s2599_s20 + $0xc8] sm:$0xf] }
  0x27   : > { %2082 = vmatpush3.bf16.msra.mxu0 %v2332_v26  ;;  %v381_v26 = vor.u32 %v380_v21, %v376_v16  ;;  %v232_v20 = vld [vmem:[%s2599_s20 + $0x30] sm:$0xf]  ;;  %v233_v21 = vld [vmem:[%s2599_s20 + $0x38] sm:$0xf] }
  0x28   : > { %2122 = vmatpush3.bf16.msra.mxu1 %v2333_v27  ;;  %2083 = vmatprep.subr.bf16.mxu0 %v2334_v28  ;;  %v2365_v27 = vld [vmem:[%s2887_s1 + $0x1e0] sm:$0xff]   ;;  %v451_v28 = vshrl.u32 %v2642_v4, 16  ;;  %v2380_v4 = vld [vmem:[%s2887_s1 + $0x1d0] sm:$0xff]  }
  0x29   : > { %2123 = vmatprep.subr.bf16.mxu1 %v2335_v29  ;;  %v2366_v29 = vld [vmem:[%s2887_s1 + $0x120] sm:$0xff]   ;;  %v1928_v32 = vcombine.low %v374_v25, %v381_v26  ;;  %v1944_v25 = vcombine.low %v232_v20, %v233_v21 }
  0x2b   : > { %2084 = vmatpush3.bf16.msra.mxu0 %v2336_v30  ;;  %v458_v30 = vshrl.u32 %v2649_v11, 16 }
  0x2c   : > { %2124 = vmatpush3.bf16.msra.mxu1 %v2337_v31  ;;  %2149 = vmatprep.subr.bf16.mxu0 %v2345_v43  ;;  %v2674_v31 = vcombine.low %v1847_v62, %v1863_v18  ;;  %v231_v43 = vld [vmem:[%s2599_s20 + $0x28] sm:$0xf]  ;;  %v2378_v62 = vld [vmem:[%s2887_s1 + $0x198] sm:$0xff]  }
  0x2d   : > { %2189 = vmatprep.subr.bf16.mxu1 %v2346_v44  ;;  %v249_v44 = vld [vmem:[%s2599_s20 + $0x24] sm:$0x1]  ;;  %v1898_v48 = vcombine.low %v231_v43, %v250_v45  ;;  %v463_v11 = vor.u32 %v462_v38, %v458_v30  ;;  %v2393_v38 = vld [vmem:[%s2887_s1 + $0x188] sm:$0xff]  }
  0x2e   : > { %1355 = vmatmul.mubr.bf16.vlgmr.msra.gmra.mxu0 %v1917_v40  ;;  %v1938_v40 = vcombine.low %v1849_v35, %v1850_v36  ;;  %v467_v46 = vshll.u32 %v2674_v31, 16  ;;  %v1897_v47 = vcombine.low %v230_v41, %v249_v44  ;;  %v465_v6 = vshrl.u32 %v2674_v31, 16 }
  0x2f   : > { %2150 = vmatpush3.bf16.msra.mxu0 %v2347_v49  ;;  %1420 = vmatmul.mubr.bf16.vlgmr.msra.gmra.mxu1 %v1919_v58  ;;  %v1935_v49 = vcombine.low %v230_v41, %v231_v43  ;;  %v392_v54 = vshll.u32 %v1898_v48, 16  ;;  %v390_v56 = vshrl.u32 %v1898_v48, 16  ;;  %v2377_v58 = vld [vmem:[%s2887_s1 + $0x118] sm:$0xff]   ;;  %v1868_v41 = vld [vmem:[%s2599_s20 + $0xcc] sm:$0x1]  ;;  %v2395_v43 = vld [vmem:[%s2887_s1 + $0x1c0] sm:$0xff]  }
  0x30   : > { %2151 = vmatprep.subr.bf16.mxu0 %v2349_v52  ;;  %2190 = vmatpush3.bf16.msra.mxu1 %v2348_v55  ;;  %v1866_v52 = vld [vmem:[%s2599_s20 + $0xbc] sm:$0x1]  ;;  %v385_v53 = vshll.u32 %v1897_v47, 16  ;;  %v383_v55 = vshrl.u32 %v1897_v47, 16  ;;  %v469_v16 = vrot.slane %v467_v46, 1  ;;  %v2396_v48 = vld [vmem:[%s2887_s1 + $0x100] sm:$0xff]  }
  0x31   : > { %1362 = vmatprep.mubr.bf16.mxu0 %v2353_v60  ;;  %2191 = vmatprep.subr.bf16.mxu1 %v2350_v59  ;;  %v2702_v59 = vcombine.low %v1849_v35, %v1865_v42  ;;  %v394_v61 = vrot.slane %v392_v54, 1  ;;  %v2398_v54 = vld [vmem:[%s2599_s20 + $0x50] ss:$8 sps:$4 sm:$0xff]  }
  0x32   : > { %1427 = vmatprep.mubr.bf16.mxu1 %v1929_v1  ;;  %v387_v60 = vrot.slane %v385_v53, 1  ;;  %v2711_v1 = vcombine.low %v1850_v36, %v1866_v52  ;;  %v470_v44 = vor.u32 %v469_v16, %v465_v6 }
  0x33   : > { %2152 = vmatpush3.bf16.msra.mxu0 %v2351_v57  ;;  %v2376_v57 = vld [vmem:[%s2887_s1 + $0x1d8] sm:$0xff]   ;;  %v395_v3 = vor.u32 %v394_v61, %v390_v56  ;;  %v479_v30 = vshrl.u32 %v2702_v59, 16  ;;  %v1908_v56 = vcombine.low %v1852_v15, %v1868_v41  ;;  %v1885_v41 = vld [vmem:[%s2599_s20 + $0xc] sm:$0x1] }
  0x34   : > { %2192 = vmatpush3.bf16.msra.mxu1 %v2352_v0  ;;  %2153 = vmatprep.subr.bf16.mxu0 %v2360_v10  ;;  %v474_v0 = vshll.u32 %v2693_v51, 16  ;;  %v388_v2 = vor.u32 %v387_v60, %v383_v55  ;;  %v456_v10 = vor.u32 %v455_v37, %v451_v28  ;;  %v488_v14 = vshll.u32 %v2711_v1, 16  ;;  %v2390_v28 = vld [vmem:[%s2887_s1 + $0x148] sm:$0xff]   ;;  %v2397_v51 = vld [vmem:[%s2887_s1 + $0x180] sm:$0xff]   ;;  %v2401_v61 = vld [vmem:[%s2887_s1 + $0x238] sm:$0xff]  }
  0x35   : > { %2193 = vmatprep.subr.bf16.mxu1 %v2361_v12  ;;  %v2383_v12 = vld [vmem:[%s2599_s20 + $0x78] ss:$8 sps:$4 sm:$0xff]   ;;  %v2392_v37 = vld [vmem:[%s2887_s1 + $0x108] sm:$0xff]   ;;  %v500_v6 = vshrl.u32 %v1908_v56, 16 }
  0x36   : > { %1363 = vmatmul.mubr.bf16.gmra.mxu0 %v1926_v7  ;;  %v481_v7 = vshll.u32 %v2702_v59, 16  ;;  %v1937_v8 = vcombine.low %v388_v2, %v395_v3  ;;  %v476_v18 = vrot.slane %v474_v0, 1  ;;  %v1922_v26 = vcombine.low %v456_v10, %v463_v11  ;;  %v2767_v59 = vld [vmem:[%s2599_s20 + $0x10] sm:$0xf] }
  0x37   : > { %2154 = vmatpush3.bf16.msra.mxu0 %v2362_v19  ;;  %1428 = vmatmul.mubr.bf16.gmra.mxu1 %v1928_v32  ;;  %v1947_v19 = vcombine.low %v1851_v13, %v1852_v15  ;;  %v490_v52 = vrot.slane %v488_v14, 1  ;;  %v2409_v14 = vld [vmem:[%s2887_s1 + $0x220] sm:$0xff]  }
  0x38   : > { %2194 = vmatpush3.bf16.msra.mxu1 %v2363_v22  ;;  %2155 = vmatprep.subr.bf16.mxu0 %v2364_v23  ;;  %v251_v22 = vld [vmem:[%s2599_s20 + $0x34] sm:$0x1]  ;;  %v252_v23 = vld [vmem:[%s2599_s20 + $0x3c] sm:$0x1]  ;;  %v483_v31 = vrot.slane %v481_v7, 1  ;;  %v477_v45 = vor.u32 %v476_v18, %v472_v17 }
  0x39   : > { %2195 = vmatprep.subr.bf16.mxu1 %v2365_v27  ;;  %1370 = vmatprep.mubr.bf16.mxu0 %v2368_v34  ;;  %v1899_v24 = vcombine.low %v232_v20, %v251_v22  ;;  %v1900_v27 = vcombine.low %v233_v21, %v252_v23  ;;  %v1867_v34 = vld [vmem:[%s2599_s20 + $0xc4] sm:$0x1]  ;;  %v2404_v7 = vld [vmem:[%s2599_s20 + $0xe8] ss:$8 sps:$4 sm:$0xff]   ;;  %v1889_v18 = vld [vmem:[%s2599_s20 + $0x2c] sm:$0x1] }
  0x3a   : > { %1435 = vmatprep.mubr.bf16.mxu1 %v1938_v40  ;;  %v2394_v40 = vld [vmem:[%s2887_s1 + $0x140] sm:$0xff]   ;;  %v1931_v55 = vcombine.low %v470_v44, %v477_v45  ;;  %v484_v0 = vor.u32 %v483_v31, %v479_v30  ;;  %v1873_v17 = vld [vmem:[%s2599_s20 + $0x28] sm:$0xf]  ;;  %v2410_v23 = vld [vmem:[%s2599_s20 + $0x70] ss:$8 sps:$4 sm:$0xff]  }
  0x3b   : > { %2156 = vmatpush3.bf16.msra.mxu0 %v2366_v29  ;;  %v2391_v29 = vld [vmem:[%s2887_s1 + $0x1c8] sm:$0xff]   ;;  %v399_v32 = vshll.u32 %v1899_v24, 16  ;;  %v406_v35 = vshll.u32 %v1900_v27, 16  ;;  %v404_v36 = vshrl.u32 %v1900_v27, 16  ;;  %v1888_v15 = vld [vmem:[%s2599_s20 + $0x24] sm:$0x1] }
  0x3c   : > { %2196 = vmatpush3.bf16.msra.mxu1 %v2367_v33  ;;  %2157 = vmatprep.subr.bf16.mxu0 %v2375_v50  ;;  %v397_v33 = vshrl.u32 %v1899_v24, 16  ;;  %v1907_v50 = vcombine.low %v1851_v13, %v1867_v34  ;;  %v1887_v13 = vld [vmem:[%s2599_s20 + $0x1c] sm:$0x1]  ;;  %v2795_v24 = vcombine.low %v1873_v17, %v1889_v18  ;;  %v2411_v27 = vld [vmem:[%s2599_s20 + $0xf8] ss:$8 sps:$4 sm:$0xff]  }
  0x3d   : > { %2197 = vmatprep.subr.bf16.mxu1 %v2376_v57  ;;  %v401_v39 = vrot.slane %v399_v32, 1  ;;  %v408_v42 = vrot.slane %v406_v35, 1  ;;  %v2399_v57 = vld [vmem:[%s2599_s20 + $0xd8] ss:$8 sps:$4 sm:$0xff]   ;;  %v1886_v45 = vld [vmem:[%s2599_s20 + $0x14] sm:$0x1] }
  0x3e   : > { %1371 = vmatmul.mubr.bf16.gmra.mxu0 %v1935_v49  ;;  %v486_v49 = vshrl.u32 %v2711_v1, 16  ;;  %v495_v60 = vshll.u32 %v1907_v50, 16  ;;  %v493_v3 = vshrl.u32 %v1907_v50, 16  ;;  %v2415_v30 = vld [vmem:[%s2887_s1 + $0x218] sm:$0xff]   ;;  %v577_v32 = vshll.u32 %v2795_v24, 16 }
  0x3f   : > { %2158 = vmatpush3.bf16.msra.mxu0 %v2377_v58  ;;  %1436 = vmatmul.mubr.bf16.gmra.mxu1 %v1937_v8  ;;  %v402_v46 = vor.u32 %v401_v39, %v397_v33  ;;  %v409_v47 = vor.u32 %v408_v42, %v404_v36  ;;  %v2764_v58 = vld [vmem:[%s2599_s20 + $0x8] sm:$0xf]  ;;  %v1871_v8 = vld [vmem:[%s2599_s20 + $0x18] sm:$0xf]  ;;  %v2416_v33 = vld [vmem:[%s2887_s1 + $0x210] sm:$0xff]  }
  0x40   : > { %2198 = vmatpush3.bf16.msra.mxu1 %v2378_v62  ;;  %2159 = vmatprep.subr.bf16.mxu0 %v2379_v63  ;;  %v2402_v62 = vld [vmem:[%s2887_s1 + $0x230] sm:$0xff]   ;;  %v502_v63 = vshll.u32 %v1908_v56, 16  ;;  %v491_v1 = vor.u32 %v490_v52, %v486_v49  ;;  %v1923_v2 = vcombine.low %v2764_v58, %v2767_v59  ;;  %v2789_v16 = vcombine.low %v1871_v8, %v1887_v13  ;;  %v2810_v34 = vld [vmem:[%s2599_s20 + $0x38] sm:$0xf]  ;;  %v2813_v35 = vld [vmem:[%s2599_s20 + $0x40] sm:$0xf] }
  0x41   : > { %2199 = vmatprep.subr.bf16.mxu1 %v2380_v4  ;;  %1378 = vmatprep.mubr.bf16.mxu0 %v2383_v12  ;;  %v1946_v53 = vcombine.low %v402_v46, %v409_v47  ;;  %v2403_v4 = vld [vmem:[%s2599_s20 + $0x60] ss:$8 sps:$4 sm:$0xff]   ;;  %v1891_v36 = vld [vmem:[%s2599_s20 + $0x3c] sm:$0x1]  ;;  %v575_v46 = vshrl.u32 %v2795_v24, 16  ;;  %v1910_v49 = vcombine.low %v2767_v59, %v1886_v45  ;;  %v579_v50 = vrot.slane %v577_v32, 1 }
  0x42   : > { %1443 = vmatprep.mubr.bf16.mxu1 %v1947_v19  ;;  %v1940_v10 = vcombine.low %v484_v0, %v491_v1  ;;  %v504_v11 = vrot.slane %v502_v63, 1  ;;  %v1872_v12 = vld [vmem:[%s2599_s20 + $0x20] sm:$0xf]  ;;  %v1890_v19 = vld [vmem:[%s2599_s20 + $0x34] sm:$0x1] }
  0x43   : > { %2160 = vmatpush3.bf16.msra.mxu0 %v2381_v5  ;;  %v497_v5 = vrot.slane %v495_v60, 1  ;;  %v1932_v22 = vcombine.low %v1871_v8, %v1872_v12  ;;  %v2417_v47 = vld [vmem:[%s2599_s20 + $0x80] ss:$8 sps:$4 sm:$0xff]   ;;  %v556_v63 = vshll.u32 %v1910_v49, 16 }
  0x44   : > { %2200 = vmatpush3.bf16.msra.mxu1 %v2382_v9  ;;  %2161 = vmatprep.subr.bf16.mxu0 %v2390_v28  ;;  %v2408_v9 = vld [vmem:[%s2887_s1 + $0x228] sm:$0xff]   ;;  %v505_v21 = vor.u32 %v504_v11, %v500_v6  ;;  %v2423_v0 = vld [vmem:[%s2887_s1 + $0x200] sm:$0xff]  }
  0x45   : > { %2201 = vmatprep.subr.bf16.mxu1 %v2391_v29  ;;  %v498_v20 = vor.u32 %v497_v5, %v493_v3  ;;  %v563_v29 = vshll.u32 %v2789_v16, 16  ;;  %v580_v3 = vor.u32 %v579_v50, %v575_v46 }
  0x46   : > { %1379 = vmatmul.mubr.bf16.gmra.mxu0 %v1944_v25  ;;  %v1874_v25 = vld [vmem:[%s2599_s20 + $0x30] sm:$0xf] }
  0x47   : > { %1484 = vmatprep.mubr.bf16.mxu0 %v1922_v26  ;;  %2162 = vmatpush3.bf16.msra.mxu0 %v2392_v37  ;;  %v2798_v26 = vcombine.low %v1872_v12, %v1888_v15  ;;  %v1914_v28 = vcombine.low %v1874_v25, %v1890_v19  ;;  %v1949_v31 = vcombine.low %v498_v20, %v505_v21  ;;  %v1892_v37 = vld [vmem:[%s2599_s20 + $0x44] sm:$0x1]  ;;  %v565_v52 = vrot.slane %v563_v29, 1 }
  0x48   : > { %2202 = vmatpush3.bf16.msra.mxu1 %v2393_v38  ;;  %2163 = vmatprep.subr.bf16.mxu0 %v2394_v40  ;;  %v561_v40 = vshrl.u32 %v2789_v16, 16  ;;  %v1941_v42 = vcombine.low %v1873_v17, %v1874_v25  ;;  %v1916_v44 = vcombine.low %v2813_v35, %v1892_v37 }
  0x49   : > { %2203 = vmatprep.subr.bf16.mxu1 %v2395_v43  ;;  %1444 = vmatmul.mubr.bf16.gmra.mxu1 %v1946_v53  ;;  %v570_v38 = vshll.u32 %v2798_v26, 16  ;;  %v584_v39 = vshll.u32 %v1914_v28, 16  ;;  %v1915_v43 = vcombine.low %v2810_v34, %v1891_v36  ;;  %v568_v53 = vshrl.u32 %v2798_v26, 16 }
  0x4a   : > { %1549 = vmatprep.mubr.bf16.mxu1 %v2398_v54  ;;  %v598_v59 = vshll.u32 %v1916_v44, 16  ;;  %v566_v5 = vor.u32 %v565_v52, %v561_v40  ;;  %v596_v12 = vshrl.u32 %v1916_v44, 16 }
  0x4b   : > { %2164 = vmatpush3.bf16.msra.mxu0 %v2396_v48  ;;  %v1909_v48 = vcombine.low %v2764_v58, %v1885_v41  ;;  %v572_v54 = vrot.slane %v570_v38, 1  ;;  %v586_v56 = vrot.slane %v584_v39, 1  ;;  %v591_v58 = vshll.u32 %v1915_v43, 16 }
  0x4c   : > { %2204 = vmatpush3.bf16.msra.mxu1 %v2397_v51  ;;  %2241 = vmatprep.subr.bf16.mxu0 %v2401_v61  ;;  %v582_v51 = vshrl.u32 %v1914_v28, 16  ;;  %v600_v13 = vrot.slane %v598_v59, 1 }
  0x4d   : > { %2265 = vmatprep.subr.bf16.mxu1 %v2401_v61  ;;  %v547_v60 = vshrl.u32 %v1909_v48, 16  ;;  %v573_v6 = vor.u32 %v572_v54, %v568_v53  ;;  %v593_v11 = vrot.slane %v591_v58, 1 }
  0x4e   : > { %1485 = vmatmul.mubr.bf16.vlgmr.msra.gmra.mxu0 %v2399_v57  ;;  %v2422_v57 = vld [vmem:[%s2887_s1 + $0x208] sm:$0xff]   ;;  %v601_v18 = vor.u32 %v600_v13, %v596_v12 }
  0x4f   : > { %1492 = vmatprep.mubr.bf16.mxu0 %v1931_v55  ;;  %2242 = vmatpush3.bf16.msra.mxu0 %v2401_v61  ;;  %v2418_v55 = vld [vmem:[%s2599_s20 + $0x108] ss:$8 sps:$4 sm:$0xff]   ;;  %v1934_v16 = vcombine.low %v566_v5, %v573_v6 }
  0x50   : > { %2243 = vmatprep.subr.bf16.mxu0 %v2402_v62 }
  0x51   : > { %1550 = vmatmul.mubr.bf16.vlgmr.msra.gmra.mxu1 %v1923_v2  ;;  %v558_v2 = vrot.slane %v556_v63, 1 }
  0x52   : > { %2273 = vmatpush3.bf16.msra.mxu1 %v2401_v61  ;;  %1557 = vmatprep.mubr.bf16.mxu1 %v2403_v4  ;;  %v549_v61 = vshll.u32 %v1909_v48, 16  ;;  %v587_v4 = vor.u32 %v586_v56, %v582_v51 }
  0x53   : > { %2244 = vmatpush3.bf16.msra.mxu0 %v2402_v62  ;;  %2266 = vmatprep.subr.bf16.mxu1 %v2402_v62 }
  0x54   : > { %2245 = vmatprep.subr.bf16.mxu0 %v2408_v9  ;;  %v551_v1 = vrot.slane %v549_v61, 1  ;;  %v1943_v15 = vcombine.low %v580_v3, %v587_v4 }
  0x56   : > { %1493 = vmatmul.mubr.bf16.gmra.mxu0 %v2404_v7  ;;  %2274 = vmatpush3.bf16.msra.mxu1 %v2402_v62  ;;  %v554_v62 = vshrl.u32 %v1910_v49, 16  ;;  %v1950_v7 = vcombine.low %v2810_v34, %v2813_v35  ;;  %v552_v8 = vor.u32 %v551_v1, %v547_v60 }
  0x57   : > { %1500 = vmatprep.mubr.bf16.mxu0 %v1940_v10  ;;  %2246 = vmatpush3.bf16.msra.mxu0 %v2408_v9  ;;  %v589_v10 = vshrl.u32 %v1915_v43, 16 }
  0x58   : > { %2247 = vmatprep.subr.bf16.mxu0 %v2409_v14  ;;  %2267 = vmatprep.subr.bf16.mxu1 %v2408_v9 }
  0x59   : > { %1558 = vmatmul.mubr.bf16.gmra.mxu1 %v1932_v22  ;;  %v594_v17 = vor.u32 %v593_v11, %v589_v10 }
  0x5a   : > { %2275 = vmatpush3.bf16.msra.mxu1 %v2408_v9  ;;  %1565 = vmatprep.mubr.bf16.mxu1 %v2410_v23  ;;  %v559_v9 = vor.u32 %v558_v2, %v554_v62 }
  0x5b   : > { %2248 = vmatpush3.bf16.msra.mxu0 %v2409_v14  ;;  %2268 = vmatprep.subr.bf16.mxu1 %v2409_v14  ;;  %v1952_v19 = vcombine.low %v594_v17, %v601_v18 }
  0x5c   : > { %2249 = vmatprep.subr.bf16.mxu0 %v2415_v30 }
  0x5e   : > { %1501 = vmatmul.mubr.bf16.gmra.mxu0 %v2411_v27  ;;  %2276 = vmatpush3.bf16.msra.mxu1 %v2409_v14  ;;  %v1925_v14 = vcombine.low %v552_v8, %v559_v9 }
  0x5f   : > { %1508 = vmatprep.mubr.bf16.mxu0 %v1949_v31  ;;  %2250 = vmatpush3.bf16.msra.mxu0 %v2415_v30 }
  0x60   : > { %2251 = vmatprep.subr.bf16.mxu0 %v2416_v33  ;;  %2269 = vmatprep.subr.bf16.mxu1 %v2415_v30 }
  0x61   : > { %1566 = vmatmul.mubr.bf16.gmra.mxu1 %v1941_v42 }
  0x62   : > { %2277 = vmatpush3.bf16.msra.mxu1 %v2415_v30  ;;  %1573 = vmatprep.mubr.bf16.mxu1 %v2417_v47 }
  0x63   : > { %2252 = vmatpush3.bf16.msra.mxu0 %v2416_v33  ;;  %2270 = vmatprep.subr.bf16.mxu1 %v2416_v33 }
  0x64   : > { %2253 = vmatprep.subr.bf16.mxu0 %v2422_v57 }
  0x66   : > { %1509 = vmatmul.mubr.bf16.gmra.mxu0 %v2418_v55  ;;  %2278 = vmatpush3.bf16.msra.mxu1 %v2416_v33 }
  0x67   : > { %2254 = vmatpush3.bf16.msra.mxu0 %v2422_v57  ;;  %2271 = vmatprep.subr.bf16.mxu1 %v2422_v57 }
  0x68   : > { %2255 = vmatprep.subr.bf16.mxu0 %v2423_v0  ;;  %2257 = vmatprep.mubr.bf16.mxu0 %v1925_v14 }
  0x69   : > { %1574 = vmatmul.mubr.bf16.gmra.mxu1 %v1950_v7 }
  0x6a   : > { %2279 = vmatpush3.bf16.msra.mxu1 %v2422_v57  ;;  %2261 = vmatprep.mubr.bf16.mxu1 %v1943_v15 }
  0x6b   : > { %2256 = vmatpush3.bf16.msra.mxu0 %v2423_v0  ;;  %2272 = vmatprep.subr.bf16.mxu1 %v2423_v0 }
  0x6e   : > { %2258 = vmatmul.mubr.bf16.vlgmr.msra.gmra.mxu0 %v1934_v16  ;;  %2280 = vmatpush3.bf16.msra.mxu1 %v2423_v0 }
  0x71   : > { %2262 = vmatmul.mubr.bf16.vlgmr.msra.gmra.mxu1 %v1952_v19 }
  0xee   : > { %v2085_v20 = vpop.f32.mrf.mxu0 }
  0xef   : > { %v2125_v23 = vpop.f32.mrf.mxu1 }
  0xf0   : > { %v2086_v21 = vpop.f32.mrf.mxu0 }
  0xf1   : > { %v2126_v25 = vpop.f32.mrf.mxu1  ;;  %v2087_v11 = vadd.f32 %v2086_v21, %v2085_v20 }
  0xf2   : > { %v2837_v22 = vpop.f32.mrf.mxu0  ;;  %v2127_v12 = vadd.f32 %v2126_v25, %v2125_v23 }
  0xf3   : > { %v2128_v27 = vpop.f32.mrf.mxu1 }
  0xf4   : > { %v2839_v24 = vpop.f32.mrf.mxu0 }
  0xf5   : > { %v2129_v29 = vpop.f32.mrf.mxu1 }
  0xf6   : > { %v2091_v26 = vpop.f32.mrf.mxu0 }
  0xf7   : > { %v2131_v31 = vpop.f32.mrf.mxu1 }
  0xf8   : > { %v2092_v28 = vpop.f32.mrf.mxu0 }
  0xf9   : > { %v2132_v33 = vpop.f32.mrf.mxu1  ;;  %v2093_v7 = vadd.f32 %v2092_v28, %v2091_v26  ;;  %v2090_v26 = vadd.f32 %v2839_v24, %v2837_v22  ;;  %v2130_v28 = vadd.f32 %v2129_v29, %v2128_v27 }
  0xfa   : > { %v2094_v30 = vpop.f32.mrf.mxu0  ;;  %v2133_v8 = vadd.f32 %v2132_v33, %v2131_v31  ;;  %v1422_v33 = vadd.f32 %v2127_v12, %v2087_v11 }
  0xfb   : > { %v2134_v34 = vpop.f32.mrf.mxu1 }
  0xfc   : > { %v2095_v32 = vpop.f32.mrf.mxu0  ;;  %v1430_v18 = vadd.f32 %v2133_v8, %v2093_v7 }
  0xfd   : > { %v2135_v37 = vpop.f32.mrf.mxu1  ;;  %v2096_v19 = vadd.f32 %v2095_v32, %v2094_v30 }
  0xfe   : > { %v2097_v35 = vpop.f32.mrf.mxu0 }
  0xff   : > { %v2137_v39 = vpop.f32.mrf.mxu1 }
 0x100   : > { %v2098_v36 = vpop.f32.mrf.mxu0 }
 0x101   : > { %v2138_v41 = vpop.f32.mrf.mxu1  ;;  %v2099_v20 = vadd.f32 %v2098_v36, %v2097_v35 }
 0x102   : > { %v2841_v38 = vpop.f32.mrf.mxu0 }
 0x103   : > { %v2845_v43 = vpop.f32.mrf.mxu1 }
 0x104   : > { %v2843_v40 = vpop.f32.mrf.mxu0  ;;  %2891 = vst [vmem:[#allocation2_spill] sm:$0xff] %v2845_v43 }
 0x105   : > { %v2847_v46 = vpop.f32.mrf.mxu1  ;;  %v2102_v29 = vadd.f32 %v2843_v40, %v2841_v38 }
 0x106   : > { %v2103_v42 = vpop.f32.mrf.mxu0  ;;  %2892 = vst [vmem:[#allocation3_spill] sm:$0xff] %v2847_v46 }
 0x108   : > { %v2104_v44 = vpop.f32.mrf.mxu0 }
 0x109   : > { %v2143_v48 = vpop.f32.mrf.mxu1  ;;  %v2105_v16 = vadd.f32 %v2104_v44, %v2103_v42  ;;  %v2139_v42 = vadd.f32 %v2138_v41, %v2137_v39 }
 0x10a   : > { %v2106_v45 = vpop.f32.mrf.mxu0 }
 0x10b   : > { %v2144_v50 = vpop.f32.mrf.mxu1  ;;  %v1438_v41 = vadd.f32 %v2139_v42, %v2099_v20 }
 0x10c   : > { %v2107_v47 = vpop.f32.mrf.mxu0  ;;  %v2145_v17 = vadd.f32 %v2144_v50, %v2143_v48 }
 0x10d   : > { %v2146_v52 = vpop.f32.mrf.mxu1  ;;  %v2108_v48 = vadd.f32 %v2107_v47, %v2106_v45  ;;  %v2895_v45 = vld [vmem:[#allocation2_spill] sm:$0xff]  ;;  %v2896_v47 = vld [vmem:[#allocation3_spill] sm:$0xff] }
 0x10e   : > { %v2165_v49 = vpop.f32.mrf.mxu0  ;;  %v1446_v44 = vadd.f32 %v2145_v17, %v2105_v16 }
 0x10f   : > { %v2147_v54 = vpop.f32.mrf.mxu1 }
 0x110   : > { %v2166_v51 = vpop.f32.mrf.mxu0  ;;  %v2148_v30 = vadd.f32 %v2147_v54, %v2146_v52  ;;  %v2142_v52 = vadd.f32 %v2896_v47, %v2895_v45 }
 0x111   : > { %v2205_v56 = vpop.f32.mrf.mxu1 }
 0x112   : > { %v2168_v53 = vpop.f32.mrf.mxu0  ;;  %v1449_v54 = vadd.f32 %v2148_v30, %v2108_v48  ;;  %v1441_v16 = vadd.f32 %v2142_v52, %v2102_v29 }
 0x113   : > { %v2206_v57 = vpop.f32.mrf.mxu1 }
 0x114   : > { %v2169_v55 = vpop.f32.mrf.mxu0  ;;  %v2207_v35 = vadd.f32 %v2206_v57, %v2205_v56 }
 0x115   : > { %v2849_v61 = vpop.f32.mrf.mxu1 }
 0x116   : > { %v2171_v60 = vpop.f32.mrf.mxu0  ;;  %2893 = vst [vmem:[#allocation4_spill] sm:$0xff] %v2849_v61  ;;  %v2167_v61 = vadd.f32 %v2166_v51, %v2165_v49 }
 0x117   : > { %v2851_v63 = vpop.f32.mrf.mxu1 }
 0x118   : > { %v2172_v62 = vpop.f32.mrf.mxu0  ;;  %2894 = vst [vmem:[#allocation5_spill] sm:$0xff] %v2851_v63  ;;  %v2136_v63 = vadd.f32 %v2135_v37, %v2134_v34  ;;  %v1487_v34 = vadd.f32 %v2167_v61, %v1422_v33  ;;  %v2170_v37 = vadd.f32 %v2169_v55, %v2168_v53  ;;  %v2025_v61 = vld [vmem:[%s2888_s2] ss:$0 sm:$0xff] }
 0x119   : > { %v2211_v59 = vpop.f32.mrf.mxu1  ;;  %v2173_v13 = vadd.f32 %v2172_v62, %v2171_v60  ;;  %v1425_v62 = vadd.f32 %v2130_v28, %v2090_v26 }
 0x11a   : > { %v2174_v58 = vpop.f32.mrf.mxu0  ;;  %v1433_v32 = vadd.f32 %v2136_v63, %v2096_v19  ;;  %v1552_v38 = vadd.f32 %v2207_v35, %v1487_v34 }
 0x11b   : > { %v2212_v1 = vpop.f32.mrf.mxu1  ;;  %v1495_v21 = vadd.f32 %v2173_v13, %v1430_v18  ;;  %v1490_v63 = vadd.f32 %v2170_v37, %v1425_v62 }
 0x11c   : > { %v2175_v0 = vpop.f32.mrf.mxu0  ;;  %v2213_v49 = vadd.f32 %v2212_v1, %v2211_v59 }
 0x11d   : > { %v2214_v3 = vpop.f32.mrf.mxu1  ;;  %v2176_v23 = vadd.f32 %v2175_v0, %v2174_v58 }
 0x11e   : > { %v2177_v2 = vpop.f32.mrf.mxu0  ;;  %v1560_v39 = vadd.f32 %v2213_v49, %v1495_v21 }
 0x11f   : > { %v2215_v5 = vpop.f32.mrf.mxu1  ;;  %v1498_v36 = vadd.f32 %v2176_v23, %v1433_v32  ;;  %v2898_v7 = vld [vmem:[#allocation5_spill] sm:$0xff] }
 0x120   : > { %v2178_v4 = vpop.f32.mrf.mxu0  ;;  %v2216_v58 = vadd.f32 %v2215_v5, %v2214_v3  ;;  %v2026_v3 = vld [vmem:[%s2889_s3] ss:$0 sm:$0xff] }
 0x121   : > { %v2853_v9 = vpop.f32.mrf.mxu1  ;;  %v2179_v22 = vadd.f32 %v2178_v4, %v2177_v2  ;;  %v2897_v4 = vld [vmem:[#allocation4_spill] sm:$0xff] }
 0x122   : > { %v2180_v6 = vpop.f32.mrf.mxu0  ;;  %v2210_v8 = vadd.f32 %v2898_v7, %v2897_v4 }
 0x123   : > { %v2218_v14 = vpop.f32.mrf.mxu1  ;;  %v1503_v40 = vadd.f32 %v2179_v22, %v1438_v41 }
 0x124   : > { %v2181_v10 = vpop.f32.mrf.mxu0  ;;  %v2219_v17 = vadd.f32 %v2218_v14, %v2853_v9  ;;  %v1555_v26 = vadd.f32 %v2210_v8, %v1490_v63 }
 0x125   : > { %v2855_v46 = vpop.f32.mrf.mxu1  ;;  %v2182_v56 = vadd.f32 %v2181_v10, %v2180_v6 }
 0x126   : > { %v2183_v15 = vpop.f32.mrf.mxu0  ;;  %v1568_v33 = vadd.f32 %v2219_v17, %v1503_v40 }
 0x127   : > { %v2221_v25 = vpop.f32.mrf.mxu1  ;;  %v1506_v28 = vadd.f32 %v2182_v56, %v1441_v16 }
 0x128   : > { %v2184_v43 = vpop.f32.mrf.mxu0  ;;  %v2222_v14 = vadd.f32 %v2221_v25, %v2855_v46 }
 0x129   : > { %v2185_v31 = vadd.f32 %v2184_v43, %v2183_v15  ;;  %v2223_v50 = vpop.f32.mrf.mxu1  ;;  %v1563_v15 = vadd.f32 %v2216_v58, %v1498_v36 }
 0x12a   : > { %v2186_v60 = vpop.f32.mrf.mxu0 }
 0x12b   : > { %v1511_v24 = vadd.f32 %v2185_v31, %v1446_v44  ;;  %v2224_v43 = vpop.f32.mrf.mxu1 }
 0x12c   : > { %v2187_v51 = vpop.f32.mrf.mxu0  ;;  %v2225_v53 = vadd.f32 %v2224_v43, %v2223_v50 }
 0x12d   : > { %v2188_v27 = vadd.f32 %v2187_v51, %v2186_v60  ;;  %v2226_v59 = vpop.f32.mrf.mxu1  ;;  %v1571_v51 = vadd.f32 %v2222_v14, %v1506_v28 }
 0x12e   : > { %v2259_v55 = vpop.f32.mrf.mxu0  ;;  %v1576_v1 = vadd.f32 %v2225_v53, %v1511_v24 }
 0x12f   : > { %v1625_v0 = vadd.f32 %v2259_v55, %v1560_v39  ;;  %v1514_v57 = vadd.f32 %v2188_v27, %v1449_v54  ;;  %v2227_v11 = vpop.f32.mrf.mxu1 }
 0x130   : > { %v1616_v2 = vpop.f32.mrf.mxu0  ;;  %v2228_v18 = vadd.f32 %v2227_v11, %v2226_v59 }
 0x131   : > { %v1656_v12 = vmul.f32 %v2025_v61, %v1625_v0  ;;  %v1617_v13 = vadd.f32 %v1616_v2, %v1552_v38  ;;  %v2263_v6 = vpop.f32.mrf.mxu1 }
 0x132   : > { %v2260_v5 = vpop.f32.mrf.mxu0  ;;  %v1641_v31 = vadd.f32 %v2263_v6, %v1576_v1  ;;  %v1579_v20 = vadd.f32 %v2228_v18, %v1514_v57 }
 0x133   : > { %v1654_v10 = vmul.f32 %v2025_v61, %v1617_v13  ;;  %v1628_v19 = vadd.f32 %v2260_v5, %v1563_v15  ;;  %v1671_v23 = vadd.f32 %v2026_v3, %v1656_v12  ;;  %v1632_v60 = vpop.f32.mrf.mxu1 }
 0x134   : > { %v1619_v21 = vpop.f32.mrf.mxu0  ;;  %v1660_v44 = vmul.f32 %v2025_v61, %v1641_v31  ;;  %v1633_v48 = vadd.f32 %v1632_v60, %v1568_v33 }
 0x135   : > { %v1657_v42 = vmul.f32 %v2025_v61, %v1628_v19  ;;  %v1620_v9 = vadd.f32 %v1619_v21, %v1555_v26  ;;  %v1669_v30 = vadd.f32 %v2026_v3, %v1654_v10  ;;  %v2264_v34 = vpop.f32.mrf.mxu1  ;;  %v1679_v62 = vmax.f32 %v1671_v23, 0.0 }
 0x136   : > { %v1658_v49 = vmul.f32 %v2025_v61, %v1633_v48  ;;  %v1644_v50 = vadd.f32 %v2264_v34, %v1579_v20  ;;  %v1675_v29 = vadd.f32 %v2026_v3, %v1660_v44 }
 0x137   : > { %v1672_v32 = vadd.f32 %v2026_v3, %v1657_v42  ;;  %v1655_v37 = vmul.f32 %v2025_v61, %v1620_v9  ;;  %v1635_v27 = vpop.f32.mrf.mxu1  ;;  %v1677_v35 = vmax.f32 %v1669_v30, 0.0 }
 0x138   : > { %v1661_v46 = vmul.f32 %v2025_v61, %v1644_v50  ;;  %v1636_v25 = vadd.f32 %v1635_v27, %v1571_v51  ;;  %v1673_v39 = vadd.f32 %v2026_v3, %v1658_v49  ;;  %v1683_v52 = vmax.f32 %v1675_v29, 0.0 }
 0x139   : > { %v1680_v22 = vmax.f32 %v1672_v32, 0.0  ;;  %v1670_v24 = vadd.f32 %v2026_v3, %v1655_v37 }
 0x13a   : > { %v1676_v41 = vadd.f32 %v2026_v3, %v1661_v46  ;;  %v1659_v45 = vmul.f32 %v2025_v61, %v1636_v25  ;;  %v1681_v55 = vmax.f32 %v1673_v39, 0.0 }
 0x13b   : > { %v2054_v36 = vpack.c.bf16 %v1680_v22, %v1679_v62  ;;  %v1678_v43 = vmax.f32 %v1670_v24, 0.0 }
 0x13c   : > { %v1684_v54 = vmax.f32 %v1676_v41, 0.0  ;;  %v1674_v53 = vadd.f32 %v2026_v3, %v1659_v45 }
 0x13d   : > { %2066 = vst [vmem:[%s219_s23 + $0x8] sm:$0xff] %v2054_v36   ;;  %v2049_v47 = vpack.c.bf16 %v1678_v43, %v1677_v35 }
 0x13e   : > { %v2064_v63 = vpack.c.bf16 %v1684_v54, %v1683_v52  ;;  %v1682_v58 = vmax.f32 %v1674_v53, 0.0 }
 0x13f   : > { %2050 = vst [vmem:[%s219_s23] sm:$0xff] %v2049_v47  }
 0x140   : > { %2068 = vst [vmem:[%s219_s23 + $0x18] sm:$0xff] %v2064_v63   ;;  %v2059_v59 = vpack.c.bf16 %v1682_v58, %v1681_v55 }
 0x142   : > { %2067 = vst [vmem:[%s219_s23 + $0x10] sm:$0xff] %v2059_v59  }
 0x143 PF: > { %s14_s17 = sadd.s32 1, %s2448_s17   ;;  %s2899_s15 = smov %s2444_s16 }
 0x144   : > { %p11_p5 = scmp.ge.s32.totalorder %s14_s17, 4   ;;  %s2900_s16 = smov %s2902_s18 }
 0x146   :  { %13 = sbr.rel (!%p11_p5) target bundleno = 2 (0x2), region = 72 }

// kernel: model.12
= control target key start
LH: loop header
LB: loop body
LE: loop exit
PB: predicated region body
PF: predicated region fallthrough
CT: control target
= control target key end

     0   :  { %s2554_s15 = smov 0   ;;  %s2556_s16 = smov 0   ;;  %s3136_s0 = inlined_call_operand.vmem [shape: bf16[2,1,10,10,128], index: 0, kind: input, shape index: {}]   ;;  %s3137_s1 = inlined_call_operand.vmem [shape: bf16[1152,128], index: 1, kind: input, shape index: {}]   ;;  %s3138_s2 = inlined_call_operand.vmem [shape: f32[1,128], index: 2, kind: input, shape index: {}]   ;;  %s3139_s3 = inlined_call_operand.vmem [shape: f32[1,128], index: 3, kind: input, shape index: {}]   ;;  %s3140_s4 = inlined_call_operand.vmem [shape: bf16[2,64,128], index: 4, kind: output, shape index: {}]  }
   0x1   :  { %s2558_s17 = smov 0  }
   0x2 LB: > { %s26_s18 = sadd.s32 1, %s2523_s16  ;;  %p1884_p0 = scmp.ge.s32.totalorder %s2527_s17, 1  ;;  %s2527_s17 = sphi %s2558_s17, %s14_s17   ;;  %s2523_s16 = sphi %s2556_s16, %s3152_s16   ;;  %s2519_s15 = sphi %s2554_s15, %s3151_s15  }
   0x3   : > { %p28_p1 = scmp.ge.s32.totalorder %s26_s18, 2  ;;  %p176_p2 = scmp.lt.s32.totalorder %s2527_s17, 3 }
   0x5   : > { %s3154_s18 = smov (%p28_p1, %s26_s18), 0  ;;  %p177_p3 = pnand %p1884_p0, %p176_p2 }
   0x7   : > { %180 = sbr.rel (%p177_p3) target bundleno = 323 (0x143), region = 36 }
   0xc   : > { %v2373_v0 = vld [vmem:[%s3137_s1 + $0x78] sm:$0xff]   ;;  %v2377_v4 = vld [vmem:[%s3137_s1 + $0x70] sm:$0xff]   ;;  %v2381_v8 = vld [vmem:[%s3137_s1 + $0x68] sm:$0xff]   ;;  %p206_p4 = scmp.lt.s32.totalorder %s2519_s15, 1 }
   0xd   : > { %v2374_v1 = vld [vmem:[%s3137_s1 + $0xf8] sm:$0xff]   ;;  %2136 = vmatprep.subr.bf16.mxu0 %v2373_v0  ;;  %v2378_v5 = vld [vmem:[%s3137_s1 + $0xf0] sm:$0xff]   ;;  %v2382_v9 = vld [vmem:[%s3137_s1 + $0xe8] sm:$0xff]  }
   0xe   : > { %v2375_v2 = vld [vmem:[%s3137_s1 + $0x38] sm:$0xff]   ;;  %2176 = vmatprep.subr.bf16.mxu1 %v2374_v1  ;;  %v2379_v6 = vld [vmem:[%s3137_s1 + $0x30] sm:$0xff]   ;;  %v2383_v10 = vld [vmem:[%s3137_s1 + $0x28] sm:$0xff]   ;;  %s3156_s15 = smov (!%p206_p4, %s2519_s15), 1 }
   0xf   : > { %v2376_v3 = vld [vmem:[%s3137_s1 + $0xb8] sm:$0xff]   ;;  %2137 = vmatpush3.bf16.msra.mxu0 %v2375_v2  ;;  %v2380_v7 = vld [vmem:[%s3137_s1 + $0xb0] sm:$0xff]   ;;  %v2384_v11 = vld [vmem:[%s3137_s1 + $0xa8] sm:$0xff]   ;;  %s2348_s27 = smul.u32 80, %s3156_s15  ;;  %s2104_s20 = sshll.u32 %s3156_s15, 5 }
  0x10   : > { %2177 = vmatpush3.bf16.msra.mxu1 %v2376_v3  ;;  %2138 = vmatprep.subr.bf16.mxu0 %v2377_v4  ;;  %v2385_v12 = vld [vmem:[%s3137_s1 + $0x60] sm:$0xff]   ;;  %v2389_v16 = vld [vmem:[%s3137_s1 + $0x58] sm:$0xff]   ;;  %v2393_v20 = vld [vmem:[%s3137_s1 + $0x50] sm:$0xff]   ;;  %s219_s23 = scalar_lea.vmem %s3140_s4, %s2104_s20 }
  0x11   : > { %2178 = vmatprep.subr.bf16.mxu1 %v2378_v5  ;;  %v2386_v13 = vld [vmem:[%s3137_s1 + $0xe0] sm:$0xff]   ;;  %v2390_v17 = vld [vmem:[%s3137_s1 + $0xd8] sm:$0xff]   ;;  %v2394_v21 = vld [vmem:[%s3137_s1 + $0xd0] sm:$0xff]   ;;  %s2672_s12 = scalar_lea.vmem %s3136_s0, %s2348_s27 }
  0x12   : > { %v2387_v14 = vld [vmem:[%s3137_s1 + $0x20] sm:$0xff]   ;;  %v2391_v18 = vld [vmem:[%s3137_s1 + $0x18] sm:$0xff]   ;;  %v2395_v22 = vld [vmem:[%s3137_s1 + $0x10] sm:$0xff]  }
  0x13   : > { %2139 = vmatpush3.bf16.msra.mxu0 %v2379_v6  ;;  %v2388_v15 = vld [vmem:[%s3137_s1 + $0xa0] sm:$0xff]   ;;  %v2392_v19 = vld [vmem:[%s3137_s1 + $0x98] sm:$0xff]   ;;  %v2396_v23 = vld [vmem:[%s3137_s1 + $0x90] sm:$0xff]  }
  0x14   : > { %2179 = vmatpush3.bf16.msra.mxu1 %v2380_v7  ;;  %2140 = vmatprep.subr.bf16.mxu0 %v2381_v8  ;;  %v2397_v24 = vld [vmem:[%s3137_s1 + $0x48] sm:$0xff]   ;;  %v2401_v28 = vld [vmem:[%s3137_s1 + $0x40] sm:$0xff]   ;;  %v2688_v38 = vld [vmem:[%s2672_s12 + $0x10] sm:$0xf] }
  0x15   : > { %2180 = vmatprep.subr.bf16.mxu1 %v2382_v9  ;;  %v2398_v25 = vld [vmem:[%s3137_s1 + $0xc8] sm:$0xff]   ;;  %v2402_v29 = vld [vmem:[%s3137_s1 + $0xc0] sm:$0xff]   ;;  %v2415_v49 = vld [vmem:[%s3137_s1 + $0x178] sm:$0xff]  }
  0x16   : > { %v2399_v26 = vld [vmem:[%s3137_s1 + $0x8] sm:$0xff]   ;;  %v2403_v30 = vld [vmem:[%s3137_s1] sm:$0xff]   ;;  %v2416_v50 = vld [vmem:[%s3137_s1 + $0x1f8] sm:$0xff]  }
  0x17   : > { %2141 = vmatpush3.bf16.msra.mxu0 %v2383_v10  ;;  %v2400_v27 = vld [vmem:[%s3137_s1 + $0x88] sm:$0xff]   ;;  %v2404_v31 = vld [vmem:[%s3137_s1 + $0x80] sm:$0xff]   ;;  %v2417_v55 = vld [vmem:[%s3137_s1 + $0x138] sm:$0xff]  }
  0x18   : > { %2181 = vmatpush3.bf16.msra.mxu1 %v2384_v11  ;;  %2142 = vmatprep.subr.bf16.mxu0 %v2385_v12  ;;  %v226_v32 = vld [vmem:[%s2672_s12] sm:$0xf]  ;;  %v227_v33 = vld [vmem:[%s2672_s12 + $0x8] sm:$0xf]  ;;  %v234_v34 = vld [vmem:[%s2672_s12 + $0x4] sm:$0x1] }
  0x19   : > { %2182 = vmatprep.subr.bf16.mxu1 %v2386_v13  ;;  %v235_v35 = vld [vmem:[%s2672_s12 + $0xc] sm:$0x1]  ;;  %v1936_v36 = vcombine.low %v226_v32, %v234_v34  ;;  %v2685_v37 = vld [vmem:[%s2672_s12 + $0x8] sm:$0xf]  ;;  %v242_v43 = vld [vmem:[%s2672_s12] sm:$0xe]  ;;  %v1984_v57 = vcombine.low %v226_v32, %v227_v33 }
  0x1a   : > { %v1937_v39 = vcombine.low %v227_v33, %v235_v35  ;;  %v1987_v40 = vcombine.low %v2685_v37, %v2688_v38  ;;  %v243_v46 = vld [vmem:[%s2672_s12 + $0x8] sm:$0xe]  ;;  %v1944_v52 = vcombine.low %v242_v43, %v234_v34  ;;  %v2418_v56 = vld [vmem:[%s3137_s1 + $0x1b8] sm:$0xff]   ;;  %v2419_v61 = vld [vmem:[%s3137_s1 + $0x170] sm:$0xff]  }
  0x1b   : > { %2143 = vmatpush3.bf16.msra.mxu0 %v2387_v14  ;;  %v347_v41 = vshrl.u32 %v1936_v36, 16  ;;  %v349_v42 = vshll.u32 %v1936_v36, 16  ;;  %v1945_v53 = vcombine.low %v243_v46, %v235_v35  ;;  %v2420_v63 = vld [vmem:[%s3137_s1 + $0x1f0] sm:$0xff]   ;;  %v229_v3 = vld [vmem:[%s2672_s12 + $0x18] sm:$0xf]  ;;  %v2435_v36 = vld [vmem:[%s3137_s1 + $0x160] sm:$0xff]  }
  0x1c   : > { %2183 = vmatpush3.bf16.msra.mxu1 %v2388_v15  ;;  %2144 = vmatprep.subr.bf16.mxu0 %v2389_v16  ;;  %v354_v44 = vshrl.u32 %v1937_v39, 16  ;;  %v356_v45 = vshll.u32 %v1937_v39, 16  ;;  %v426_v58 = vrot.slane %v1944_v52, 1  ;;  %v2421_v0 = vld [vmem:[%s3137_s1 + $0x130] sm:$0xff]   ;;  %v237_v5 = vld [vmem:[%s2672_s12 + $0x1c] sm:$0x1] }
  0x1d   : > { %2184 = vmatprep.subr.bf16.mxu1 %v2390_v17  ;;  %1483 = vmatprep.mubr.bf16.mxu1 %v1987_v40  ;;  %v351_v47 = vrot.slane %v349_v42, 1  ;;  %v427_v59 = vrot.slane %v1945_v53, 1  ;;  %v2422_v1 = vld [vmem:[%s3137_s1 + $0x1b0] sm:$0xff]   ;;  %v2723_v7 = vld [vmem:[%s2672_s12 + $0x18] sm:$0xf]  ;;  %v1939_v9 = vcombine.low %v229_v3, %v237_v5  ;;  %v2437_v42 = vld [vmem:[%s3137_s1 + $0x120] sm:$0xff]  }
  0x1e   : > { %v358_v48 = vrot.slane %v356_v45, 1  ;;  %v228_v2 = vld [vmem:[%s2672_s12 + $0x10] sm:$0xf]  ;;  %v236_v4 = vld [vmem:[%s2672_s12 + $0x14] sm:$0x1]  ;;  %v2438_v43 = vld [vmem:[%s3137_s1 + $0x1a0] sm:$0xff]  }
  0x1f   : > { %2145 = vmatpush3.bf16.msra.mxu0 %v2391_v18  ;;  %v352_v51 = vor.u32 %v351_v47, %v347_v41  ;;  %v1986_v62 = vcombine.low %v426_v58, %v427_v59  ;;  %v1938_v6 = vcombine.low %v228_v2, %v236_v4  ;;  %v2726_v8 = vld [vmem:[%s2672_s12 + $0x20] sm:$0xf]  ;;  %v244_v11 = vld [vmem:[%s2672_s12 + $0x10] sm:$0xe]  ;;  %v2732_v12 = vld [vmem:[%s2672_s12 + $0xc] sm:$0x1]  ;;  %v1993_v35 = vcombine.low %v228_v2, %v229_v3 }
  0x20   : > { %2185 = vmatpush3.bf16.msra.mxu1 %v2392_v19  ;;  %2146 = vmatprep.subr.bf16.mxu0 %v2393_v20  ;;  %v359_v54 = vor.u32 %v358_v48, %v354_v44  ;;  %v1996_v10 = vcombine.low %v2723_v7, %v2726_v8  ;;  %v245_v15 = vld [vmem:[%s2672_s12 + $0x18] sm:$0xe]  ;;  %v368_v16 = vshrl.u32 %v1939_v9, 16  ;;  %v370_v17 = vshll.u32 %v1939_v9, 16  ;;  %v2431_v20 = vld [vmem:[%s3137_s1 + $0x168] sm:$0xff]  }
  0x21   : > { %2186 = vmatprep.subr.bf16.mxu1 %v2394_v21  ;;  %v361_v13 = vshrl.u32 %v1938_v6, 16  ;;  %v363_v14 = vshll.u32 %v1938_v6, 16  ;;  %v1946_v18 = vcombine.low %v244_v11, %v236_v4  ;;  %v1947_v19 = vcombine.low %v245_v15, %v237_v5  ;;  %v2432_v21 = vld [vmem:[%s3137_s1 + $0x1e8] sm:$0xff]   ;;  %v230_v44 = vld [vmem:[%s2672_s12 + $0x20] sm:$0xf]  ;;  %v2447_v5 = vld [vmem:[%s3137_s1 + $0x158] sm:$0xff]  }
  0x22   : > { %v1985_v60 = vcombine.low %v352_v51, %v359_v54  ;;  %v2752_v32 = vcombine.low %v2685_v37, %v2732_v12  ;;  %v2436_v37 = vld [vmem:[%s3137_s1 + $0x1e0] sm:$0xff]   ;;  %v231_v45 = vld [vmem:[%s2672_s12 + $0x28] sm:$0xf]  ;;  %v2782_v53 = vld [vmem:[%s2672_s12 + $0x1c] sm:$0x1] }
  0x23   : > { %2147 = vmatpush3.bf16.msra.mxu0 %v2395_v22  ;;  %v1897_v22 = vld [vmem:[%s2672_s12 + $0x14] sm:$0x1]  ;;  %v238_v48 = vld [vmem:[%s2672_s12 + $0x24] sm:$0x1]  ;;  %v246_v59 = vld [vmem:[%s2672_s12 + $0x20] sm:$0xe]  ;;  %v2806_v9 = vcombine.low %v2723_v7, %v2782_v53 }
  0x24   : > { %2187 = vmatpush3.bf16.msra.mxu1 %v2396_v23  ;;  %2148 = vmatprep.subr.bf16.mxu0 %v2397_v24  ;;  %v365_v23 = vrot.slane %v363_v14, 1  ;;  %v2433_v24 = vld [vmem:[%s3137_s1 + $0x128] sm:$0xff]   ;;  %v2758_v39 = vcombine.low %v2688_v38, %v1897_v22  ;;  %v475_v41 = vshrl.u32 %v2752_v32, 16  ;;  %v477_v38 = vshll.u32 %v2752_v32, 16  ;;  %v2448_v6 = vld [vmem:[%s3137_s1 + $0x1d8] sm:$0xff]  }
  0x25   : > { %2188 = vmatprep.subr.bf16.mxu1 %v2398_v25  ;;  %1418 = vmatprep.mubr.bf16.mxu0 %v1985_v60  ;;  %v372_v25 = vrot.slane %v370_v17, 1  ;;  %v1940_v54 = vcombine.low %v230_v44, %v238_v48  ;;  %v247_v60 = vld [vmem:[%s2672_s12 + $0x28] sm:$0xe]  ;;  %v1948_v3 = vcombine.low %v246_v59, %v238_v48  ;;  %v2449_v14 = vld [vmem:[%s3137_s1 + $0x118] sm:$0xff]  }
  0x26   : > { %v482_v51 = vshrl.u32 %v2758_v39, 16  ;;  %v484_v52 = vshll.u32 %v2758_v39, 16  ;;  %v2450_v15 = vld [vmem:[%s3137_s1 + $0x198] sm:$0xff]  }
  0x27   : > { %2149 = vmatpush3.bf16.msra.mxu0 %v2399_v26  ;;  %v428_v26 = vrot.slane %v1946_v18, 1  ;;  %v373_v33 = vor.u32 %v372_v25, %v368_v16  ;;  %v2818_v18 = vrot.slane %v477_v38, 1  ;;  %v2852_v38 = vld [vmem:[%s2672_s12 + $0x34] sm:$0x1]  ;;  %v2925_v32 = vld [vmem:[%s2672_s12 + $0x1c] sm:$0x1] }
  0x28   : > { %2189 = vmatpush3.bf16.msra.mxu1 %v2400_v27  ;;  %2150 = vmatprep.subr.bf16.mxu0 %v2401_v28  ;;  %v429_v27 = vrot.slane %v1947_v19, 1  ;;  %v2434_v28 = vld [vmem:[%s3137_s1 + $0x1a8] sm:$0xff]   ;;  %v2002_v19 = vcombine.low %v230_v44, %v231_v45  ;;  %v2830_v25 = vrot.slane %v484_v52, 1 }
  0x29   : > { %2190 = vmatprep.subr.bf16.mxu1 %v2402_v29  ;;  %v366_v29 = vor.u32 %v365_v23, %v361_v13  ;;  %v2825_v23 = vld [vmem:[%s2672_s12 + $0x2c] sm:$0x1] }
  0x2a   : > { %v1995_v34 = vcombine.low %v428_v26, %v429_v27  ;;  %v2453_v26 = vld [vmem:[%s3137_s1 + $0x110] sm:$0xff]  }
  0x2b   : > { %2151 = vmatpush3.bf16.msra.mxu0 %v2403_v30  ;;  %v1904_v30 = vld [vmem:[%s2672_s12 + $0x8] sm:$0xe]  ;;  %v1994_v40 = vcombine.low %v366_v29, %v373_v33  ;;  %v2840_v29 = vld [vmem:[%s2672_s12 + $0x30] sm:$0xf]  ;;  %v241_v33 = vld [vmem:[%s2672_s12 + $0x3c] sm:$0x1] }
  0x2c   : > { %2191 = vmatpush3.bf16.msra.mxu1 %v2404_v31  ;;  %2216 = vmatprep.subr.bf16.mxu0 %v2415_v49  ;;  %v1905_v31 = vld [vmem:[%s2672_s12 + $0x10] sm:$0xe]  ;;  %v1960_v46 = vcombine.low %v1904_v30, %v2732_v12  ;;  %v239_v49 = vld [vmem:[%s2672_s12 + $0x2c] sm:$0x1]  ;;  %v430_v12 = vrot.slane %v1948_v3, 1 }
  0x2d   : > { %2256 = vmatprep.subr.bf16.mxu1 %v2416_v50  ;;  %v1961_v47 = vcombine.low %v1905_v31, %v1897_v22  ;;  %v2777_v50 = vld [vmem:[%s2672_s12 + $0x28] sm:$0xf]  ;;  %v1949_v4 = vcombine.low %v247_v60, %v239_v49  ;;  %v491_v22 = vshll.u32 %v2806_v9, 16  ;;  %v233_v30 = vld [vmem:[%s2672_s12 + $0x38] sm:$0xf] }
  0x2e   : > { %1419 = vmatmul.mubr.bf16.vlgmr.msra.gmra.mxu0 %v1984_v57  ;;  %v2788_v57 = vld [vmem:[%s2672_s12 + $0x24] sm:$0x1]  ;;  %v240_v31 = vld [vmem:[%s2672_s12 + $0x34] sm:$0x1]  ;;  %v2876_v3 = vld [vmem:[%s2672_s12 + $0x3c] sm:$0x1] }
  0x2f   : > { %1484 = vmatmul.mubr.bf16.vlgmr.msra.gmra.mxu1 %v1986_v62  ;;  %2217 = vmatpush3.bf16.msra.mxu0 %v2417_v55  ;;  %v1941_v55 = vcombine.low %v231_v45, %v239_v49  ;;  %v377_v62 = vshll.u32 %v1940_v54, 16  ;;  %v2796_v2 = vrot.slane %v1961_v47, 1  ;;  %v431_v13 = vrot.slane %v1949_v4, 1  ;;  %v248_v45 = vld [vmem:[%s2672_s12 + $0x30] sm:$0xe] }
  0x30   : > { %2257 = vmatpush3.bf16.msra.mxu1 %v2418_v56  ;;  %2218 = vmatprep.subr.bf16.mxu0 %v2419_v61  ;;  %v2785_v56 = vld [vmem:[%s2672_s12 + $0x30] sm:$0xf]  ;;  %v375_v61 = vshrl.u32 %v1940_v54, 16  ;;  %v2816_v16 = vcombine.low %v2726_v8, %v2788_v57  ;;  %v1950_v54 = vcombine.low %v248_v45, %v240_v31  ;;  %v1907_v45 = vld [vmem:[%s2672_s12 + $0x20] sm:$0xe] }
  0x31   : > { %2258 = vmatprep.subr.bf16.mxu1 %v2420_v63  ;;  %1491 = vmatprep.mubr.bf16.mxu1 %v1996_v10  ;;  %v2005_v58 = vcombine.low %v2777_v50, %v2785_v56  ;;  %v382_v63 = vshrl.u32 %v1941_v55, 16  ;;  %v379_v10 = vrot.slane %v377_v62, 1  ;;  %v2464_v62 = vld [vmem:[%s3137_s1 + $0x1c8] sm:$0xff]  }
  0x32   : > { %1426 = vmatprep.mubr.bf16.mxu0 %v1994_v40  ;;  %v498_v27 = vshll.u32 %v2816_v16, 16  ;;  %v1895_v40 = vld [vmem:[%s2672_s12 + $0x40] sm:$0xf]  ;;  %v496_v59 = vshrl.u32 %v2816_v16, 16  ;;  %v432_v4 = vrot.slane %v1950_v54, 1  ;;  %v2983_v16 = vld [vmem:[%s3137_s1 + $0x228] sm:$0xff]  }
  0x33   : > { %2219 = vmatpush3.bf16.msra.mxu0 %v2421_v0  ;;  %v384_v0 = vshll.u32 %v1941_v55, 16  ;;  %v380_v7 = vor.u32 %v379_v10, %v375_v61  ;;  %v2951_v54 = vld [vmem:[%s2672_s12 + $0x28] sm:$0xf] }
  0x34   : > { %2259 = vmatpush3.bf16.msra.mxu1 %v2422_v1  ;;  %2220 = vmatprep.subr.bf16.mxu0 %v2431_v20  ;;  %v2794_v1 = vrot.slane %v1960_v46, 1  ;;  %v2004_v20 = vcombine.low %v430_v12, %v431_v13  ;;  %v249_v46 = vld [vmem:[%s2672_s12 + $0x38] sm:$0xe]  ;;  %v2011_v12 = vcombine.low %v2840_v29, %v233_v30 }
  0x35   : > { %2260 = vmatprep.subr.bf16.mxu1 %v2432_v21  ;;  %v386_v11 = vrot.slane %v384_v0, 1  ;;  %v2451_v21 = vld [vmem:[%s3137_s1 + $0x150] sm:$0xff]   ;;  %v1951_v55 = vcombine.low %v249_v46, %v241_v33 }
  0x36   : > { %1427 = vmatmul.mubr.bf16.gmra.mxu0 %v1993_v35  ;;  %v1943_v35 = vcombine.low %v233_v30, %v241_v33 }
  0x37   : > { %2221 = vmatpush3.bf16.msra.mxu0 %v2433_v24  ;;  %1492 = vmatmul.mubr.bf16.gmra.mxu1 %v1995_v34  ;;  %v387_v17 = vor.u32 %v386_v11, %v382_v63  ;;  %v2452_v24 = vld [vmem:[%s3137_s1 + $0x1d0] sm:$0xff]   ;;  %v1942_v34 = vcombine.low %v2840_v29, %v240_v31  ;;  %v2465_v63 = vld [vmem:[%s3137_s1 + $0x108] sm:$0xff]   ;;  %v2882_v11 = vld [vmem:[%s2672_s12 + $0x44] sm:$0x1] }
  0x38   : > { %2261 = vmatpush3.bf16.msra.mxu1 %v2434_v28  ;;  %2222 = vmatprep.subr.bf16.mxu0 %v2435_v36  ;;  %v2454_v28 = vld [vmem:[%s3137_s1 + $0x190] sm:$0xff]   ;;  %v1894_v36 = vld [vmem:[%s2672_s12 + $0x38] sm:$0xf]  ;;  %v396_v49 = vshrl.u32 %v1943_v35, 16  ;;  %v398_v52 = vshll.u32 %v1943_v35, 16  ;;  %v2922_v30 = vcombine.low %v1895_v40, %v2882_v11 }
  0x39   : > { %2262 = vmatprep.subr.bf16.mxu1 %v2436_v37  ;;  %1499 = vmatprep.mubr.bf16.mxu1 %v2005_v58  ;;  %v2003_v8 = vcombine.low %v380_v7, %v387_v17  ;;  %v489_v37 = vshrl.u32 %v2806_v9, 16  ;;  %v2014_v44 = vcombine.low %v1894_v36, %v1895_v40  ;;  %v389_v47 = vshrl.u32 %v1942_v34, 16  ;;  %v2463_v58 = vld [vmem:[%s3137_s1 + $0x148] sm:$0xff]   ;;  %v2919_v29 = vld [vmem:[%s2672_s12 + $0x14] sm:$0x1] }
  0x3a   : > { %v391_v48 = vshll.u32 %v1942_v34, 16  ;;  %v400_v61 = vrot.slane %v398_v52, 1  ;;  %v1906_v34 = vld [vmem:[%s2672_s12 + $0x18] sm:$0xe]  ;;  %v1963_v52 = vcombine.low %v1907_v45, %v2788_v57  ;;  %v1911_v45 = vld [vmem:[%s2672_s12 + $0x40] sm:$0xe] }
  0x3b   : > { %2223 = vmatpush3.bf16.msra.mxu0 %v2437_v42  ;;  %1434 = vmatprep.mubr.bf16.mxu0 %v2003_v8  ;;  %v2849_v42 = vrot.slane %v491_v22, 1  ;;  %v2899_v8 = vcombine.low %v1894_v36, %v2876_v3  ;;  %v1962_v46 = vcombine.low %v1906_v34, %v2782_v53  ;;  %v2962_v53 = vld [vmem:[%s3137_s1 + $0x230] sm:$0xff]  }
  0x3c   : > { %2263 = vmatpush3.bf16.msra.mxu1 %v2438_v43  ;;  %2224 = vmatprep.subr.bf16.mxu0 %v2447_v5  ;;  %v2856_v43 = vcombine.low %v2777_v50, %v2825_v23  ;;  %v2866_v50 = vcombine.low %v2785_v56, %v2852_v38  ;;  %v393_v60 = vrot.slane %v391_v48, 1  ;;  %v433_v5 = vrot.slane %v1951_v55, 1  ;;  %v2466_v56 = vld [vmem:[%s3137_s1 + $0x188] sm:$0xff]   ;;  %v2954_v55 = vld [vmem:[%s2672_s12 + $0x24] sm:$0x1] }
  0x3d   : > { %2264 = vmatprep.subr.bf16.mxu1 %v2448_v6  ;;  %v401_v10 = vor.u32 %v400_v61, %v396_v49  ;;  %v526_v48 = vshll.u32 %v2922_v30, 16  ;;  %v556_v61 = vrot.slane %v1962_v46, 1 }
  0x3e   : > { %1435 = vmatmul.mubr.bf16.gmra.mxu0 %v2002_v19  ;;  %v505_v0 = vshll.u32 %v2856_v43, 16  ;;  %v394_v6 = vor.u32 %v393_v60, %v389_v47  ;;  %v2013_v13 = vcombine.low %v432_v4, %v433_v5  ;;  %v512_v7 = vshll.u32 %v2866_v50, 16  ;;  %v2468_v19 = vld [vmem:[%s3137_s1 + $0x1c0] sm:$0xff]  }
  0x3f   : > { %2225 = vmatpush3.bf16.msra.mxu0 %v2449_v14  ;;  %1500 = vmatmul.mubr.bf16.gmra.mxu1 %v2004_v20  ;;  %v2467_v14 = vld [vmem:[%s3137_s1 + $0x140] sm:$0xff]   ;;  %v503_v22 = vshrl.u32 %v2856_v43, 16  ;;  %v557_v4 = vrot.slane %v1963_v52, 1 }
  0x40   : > { %2265 = vmatpush3.bf16.msra.mxu1 %v2450_v15  ;;  %2226 = vmatprep.subr.bf16.mxu0 %v2451_v21  ;;  %v500_v15 = vrot.slane %v498_v27, 1  ;;  %v2012_v17 = vcombine.low %v394_v6, %v401_v10  ;;  %v2469_v20 = vld [vmem:[%s3137_s1 + $0x100] sm:$0xff]   ;;  %v1989_v21 = vcombine.low %v2794_v1, %v2796_v2  ;;  %v480_v27 = vor.u32 %v2818_v18, %v475_v41  ;;  %v2913_v2 = vld [vmem:[%s2672_s12 + $0x10] sm:$0xf] }
  0x41   : > { %2266 = vmatprep.subr.bf16.mxu1 %v2452_v24  ;;  %1507 = vmatprep.mubr.bf16.mxu1 %v2014_v44  ;;  %v2470_v24 = vld [vmem:[%s3137_s1 + $0x180] sm:$0xff]   ;;  %v487_v1 = vor.u32 %v2830_v25, %v482_v51  ;;  %v1968_v39 = vcombine.low %v2913_v2, %v2919_v29  ;;  %v2934_v51 = vld [vmem:[%s3137_s1 + $0x238] sm:$0xff]   ;;  %v510_v18 = vshrl.u32 %v2866_v50, 16  ;;  %v519_v25 = vshll.u32 %v2899_v8, 16 }
  0x42   : > { %1442 = vmatprep.mubr.bf16.mxu0 %v2012_v17  ;;  %v2939_v35 = vrot.slane %v512_v7, 1  ;;  %v2946_v47 = vld [vmem:[%s2672_s12 + $0x20] sm:$0xf]  ;;  %v501_v6 = vor.u32 %v500_v15, %v496_v59  ;;  %v1908_v59 = vld [vmem:[%s2672_s12 + $0x28] sm:$0xe] }
  0x43   : > { %2227 = vmatpush3.bf16.msra.mxu0 %v2453_v26  ;;  %v2904_v26 = vrot.slane %v505_v0, 1  ;;  %v603_v31 = vshrl.u32 %v1968_v39, 16  ;;  %v605_v33 = vshll.u32 %v1968_v39, 16  ;;  %v1988_v36 = vcombine.low %v480_v27, %v487_v1  ;;  %v1909_v15 = vld [vmem:[%s2672_s12 + $0x30] sm:$0xe]  ;;  %v2999_v39 = vld [vmem:[%s3137_s1 + $0x220] sm:$0xff]  }
  0x44   : > { %2267 = vmatpush3.bf16.msra.mxu1 %v2454_v28  ;;  %2228 = vmatprep.subr.bf16.mxu0 %v2463_v58  ;;  %v2916_v28 = vld [vmem:[%s2672_s12 + $0x18] sm:$0xf]  ;;  %v494_v58 = vor.u32 %v2849_v42, %v489_v37  ;;  %v1970_v57 = vcombine.low %v2946_v47, %v2954_v55  ;;  %v2972_v37 = vrot.slane %v519_v25, 1  ;;  %v524_v1 = vshrl.u32 %v2922_v30, 16 }
  0x45   : > { %2268 = vmatprep.subr.bf16.mxu1 %v2464_v62  ;;  %v1969_v41 = vcombine.low %v2916_v28, %v2925_v32  ;;  %v607_v49 = vrot.slane %v605_v33, 1  ;;  %v2965_v62 = vld [vmem:[%s2672_s12 + $0x2c] sm:$0x1]  ;;  %v1990_v10 = vcombine.low %v2913_v2, %v2916_v28  ;;  %v2993_v27 = vld [vmem:[%s2672_s12 + $0x38] sm:$0xf] }
  0x46   : > { %1443 = vmatmul.mubr.bf16.gmra.mxu0 %v2011_v12  ;;  %v1971_v9 = vcombine.low %v2951_v54, %v2965_v62  ;;  %v617_v5 = vshrl.u32 %v1970_v57, 16  ;;  %v1998_v12 = vcombine.low %v556_v61, %v557_v4  ;;  %v1997_v28 = vcombine.low %v494_v58, %v501_v6  ;;  %v3024_v58 = vld [vmem:[%s2672_s12 + $0x40] sm:$0xf] }
  0x47   : > { %2229 = vmatpush3.bf16.msra.mxu0 %v2465_v63  ;;  %1508 = vmatmul.mubr.bf16.gmra.mxu1 %v2013_v13  ;;  %v610_v40 = vshrl.u32 %v1969_v41, 16  ;;  %v612_v44 = vshll.u32 %v1969_v41, 16  ;;  %v517_v63 = vshrl.u32 %v2899_v8, 16  ;;  %v608_v0 = vor.u32 %v607_v49, %v603_v31  ;;  %v3002_v41 = vld [vmem:[%s2672_s12 + $0x34] sm:$0x1] }
  0x48   : > { %2269 = vmatpush3.bf16.msra.mxu1 %v2466_v56  ;;  %2230 = vmatprep.subr.bf16.mxu0 %v2467_v14  ;;  %v619_v56 = vshll.u32 %v1970_v57, 16  ;;  %v624_v13 = vshrl.u32 %v1971_v9, 16  ;;  %v626_v14 = vshll.u32 %v1971_v9, 16  ;;  %v1999_v61 = vcombine.low %v2946_v47, %v2951_v54 }
  0x49   : > { %2270 = vmatprep.subr.bf16.mxu1 %v2468_v19  ;;  %1548 = vmatprep.mubr.bf16.mxu0 %v1989_v21  ;;  %v614_v60 = vrot.slane %v612_v44, 1  ;;  %v1965_v21 = vcombine.low %v1909_v15, %v2852_v38  ;;  %v1910_v44 = vld [vmem:[%s2672_s12 + $0x38] sm:$0xe] }
  0x4a   : > { %v621_v17 = vrot.slane %v619_v56, 1  ;;  %v628_v19 = vrot.slane %v626_v14, 1  ;;  %v1966_v50 = vcombine.low %v1910_v44, %v2876_v3 }
  0x4b   : > { %2231 = vmatpush3.bf16.msra.mxu0 %v2469_v20  ;;  %v615_v42 = vor.u32 %v614_v60, %v610_v40  ;;  %v1964_v20 = vcombine.low %v1908_v59, %v2825_v23  ;;  %v3005_v23 = vld [vmem:[%s2672_s12 + $0x3c] sm:$0x1]  ;;  %v559_v31 = vrot.slane %v1965_v21, 1  ;;  %v515_v40 = vor.u32 %v2939_v35, %v510_v18  ;;  %v3027_v60 = vld [vmem:[%s2672_s12 + $0x48] sm:$0xf] }
  0x4c   : > { %2271 = vmatpush3.bf16.msra.mxu1 %v2470_v24  ;;  %2308 = vmatprep.subr.bf16.mxu0 %v2934_v51  ;;  %v2990_v24 = vld [vmem:[%s2672_s12 + $0x30] sm:$0xf]  ;;  %v622_v2 = vor.u32 %v621_v17, %v617_v5  ;;  %v629_v38 = vor.u32 %v628_v19, %v624_v13  ;;  %v1973_v34 = vcombine.low %v2993_v27, %v3005_v23  ;;  %v3032_v18 = vld [vmem:[%s2672_s12 + $0x44] sm:$0x1]  ;;  %v3035_v35 = vld [vmem:[%s2672_s12 + $0x4c] sm:$0x1] }
  0x4d   : > { %2332 = vmatprep.subr.bf16.mxu1 %v2934_v51  ;;  %v1991_v7 = vcombine.low %v608_v0, %v615_v42  ;;  %v558_v25 = vrot.slane %v1964_v20, 1  ;;  %v1972_v33 = vcombine.low %v2990_v24, %v3002_v41  ;;  %v1974_v0 = vcombine.low %v3024_v58, %v3032_v18  ;;  %v1929_v17 = vld [vmem:[%s2672_s12 + $0x18] sm:$0xe] }
  0x4e   : > { %1549 = vmatmul.mubr.bf16.vlgmr.msra.gmra.mxu0 %v1988_v36  ;;  %v508_v36 = vor.u32 %v2904_v26, %v503_v22  ;;  %v638_v43 = vshrl.u32 %v1973_v34, 16  ;;  %v640_v22 = vshll.u32 %v1973_v34, 16  ;;  %v1967_v26 = vcombine.low %v1911_v45, %v2882_v11  ;;  %v2490_v11 = vld [vmem:[%s3137_s1 + $0x218] sm:$0xff]  }
  0x4f   : > { %2309 = vmatpush3.bf16.msra.mxu0 %v2934_v51  ;;  %1556 = vmatprep.mubr.bf16.mxu0 %v1998_v12  ;;  %v2007_v46 = vcombine.low %v558_v25, %v559_v31  ;;  %v631_v49 = vshrl.u32 %v1972_v33, 16  ;;  %v633_v52 = vshll.u32 %v1972_v33, 16  ;;  %v1975_v4 = vcombine.low %v3027_v60, %v3035_v35  ;;  %v1930_v31 = vld [vmem:[%s2672_s12 + $0x20] sm:$0xe]  ;;  %v1931_v33 = vld [vmem:[%s2672_s12 + $0x28] sm:$0xe] }
  0x50   : > { %2310 = vmatprep.subr.bf16.mxu0 %v2962_v53  ;;  %1613 = vmatprep.mubr.bf16.mxu1 %v1991_v7  ;;  %v642_v3 = vrot.slane %v640_v22, 1  ;;  %v560_v9 = vrot.slane %v1966_v50, 1  ;;  %v561_v47 = vrot.slane %v1967_v26, 1  ;;  %v645_v42 = vshrl.u32 %v1974_v0, 16  ;;  %v1928_v7 = vld [vmem:[%s2672_s12 + $0x10] sm:$0xe] }
  0x51   : > { %1614 = vmatmul.mubr.bf16.vlgmr.msra.gmra.mxu1 %v1990_v10  ;;  %v635_v57 = vrot.slane %v633_v52, 1  ;;  %v647_v5 = vshll.u32 %v1974_v0, 16  ;;  %v2006_v6 = vcombine.low %v508_v36, %v515_v40  ;;  %v652_v10 = vshrl.u32 %v1975_v4, 16  ;;  %v1934_v36 = vld [vmem:[%s2672_s12 + $0x40] sm:$0xe] }
  0x52   : > { %2340 = vmatpush3.bf16.msra.mxu1 %v2934_v51  ;;  %v2000_v51 = vcombine.low %v622_v2, %v629_v38  ;;  %v643_v56 = vor.u32 %v642_v3, %v638_v43  ;;  %v654_v12 = vshll.u32 %v1975_v4, 16  ;;  %v2016_v13 = vcombine.low %v560_v9, %v561_v47  ;;  %v1932_v2 = vld [vmem:[%s2672_s12 + $0x30] sm:$0xe]  ;;  %v1935_v40 = vld [vmem:[%s2672_s12 + $0x48] sm:$0xe] }
  0x53   : > { %2311 = vmatpush3.bf16.msra.mxu0 %v2962_v53  ;;  %2333 = vmatprep.subr.bf16.mxu1 %v2962_v53  ;;  %v636_v54 = vor.u32 %v635_v57, %v631_v49  ;;  %v649_v14 = vrot.slane %v647_v5, 1  ;;  %v1976_v19 = vcombine.low %v1928_v7, %v2919_v29  ;;  %v1977_v21 = vcombine.low %v1929_v17, %v2925_v32 }
  0x54   : > { %2312 = vmatprep.subr.bf16.mxu0 %v2983_v16  ;;  %1621 = vmatprep.mubr.bf16.mxu1 %v2000_v51  ;;  %v656_v15 = vrot.slane %v654_v12, 1  ;;  %v522_v38 = vor.u32 %v2972_v37, %v517_v63  ;;  %v2008_v29 = vcombine.low %v2990_v24, %v2993_v27  ;;  %v1980_v63 = vcombine.low %v1932_v2, %v3002_v41  ;;  %v2499_v37 = vld [vmem:[%s3137_s1 + $0x208] sm:$0xff]   ;;  %v2500_v41 = vld [vmem:[%s3137_s1 + $0x200] sm:$0xff]  }
  0x55   : > { %v2009_v59 = vcombine.low %v636_v54, %v643_v56  ;;  %v650_v20 = vor.u32 %v649_v14, %v645_v42  ;;  %v682_v32 = vrot.slane %v1976_v19, 1  ;;  %v683_v34 = vrot.slane %v1977_v21, 1 }
  0x56   : > { %1557 = vmatmul.mubr.bf16.gmra.mxu0 %v1997_v28  ;;  %2341 = vmatpush3.bf16.msra.mxu1 %v2962_v53  ;;  %v528_v53 = vrot.slane %v526_v48, 1  ;;  %v2491_v48 = vld [vmem:[%s3137_s1 + $0x210] sm:$0xff]   ;;  %v1933_v28 = vld [vmem:[%s2672_s12 + $0x38] sm:$0xe]  ;;  %v1978_v24 = vcombine.low %v1930_v31, %v2954_v55  ;;  %v1979_v27 = vcombine.low %v1931_v33, %v2965_v62  ;;  %v1982_v62 = vcombine.low %v1934_v36, %v3032_v18 }
  0x57   : > { %2313 = vmatpush3.bf16.msra.mxu0 %v2983_v16  ;;  %2334 = vmatprep.subr.bf16.mxu1 %v2983_v16  ;;  %v1981_v30 = vcombine.low %v1933_v28, %v3005_v23  ;;  %v686_v23 = vrot.slane %v1980_v63, 1  ;;  %v1983_v51 = vcombine.low %v1935_v40, %v3035_v35 }
  0x58   : > { %2314 = vmatprep.subr.bf16.mxu0 %v2999_v39  ;;  %1564 = vmatprep.mubr.bf16.mxu0 %v2007_v46  ;;  %v529_v25 = vor.u32 %v528_v53, %v524_v1  ;;  %v684_v45 = vrot.slane %v1978_v24, 1  ;;  %v685_v55 = vrot.slane %v1979_v27, 1  ;;  %v2017_v46 = vcombine.low %v3024_v58, %v3027_v60 }
  0x59   : > { %1622 = vmatmul.mubr.bf16.gmra.mxu1 %v1999_v61  ;;  %v687_v44 = vrot.slane %v1981_v30, 1  ;;  %v688_v43 = vrot.slane %v1982_v62, 1  ;;  %v689_v22 = vrot.slane %v1983_v51, 1 }
  0x5a   : > { %2342 = vmatpush3.bf16.msra.mxu1 %v2983_v16  ;;  %1629 = vmatprep.mubr.bf16.mxu1 %v2009_v59  ;;  %v657_v16 = vor.u32 %v656_v15, %v652_v10  ;;  %v2015_v1 = vcombine.low %v522_v38, %v529_v25  ;;  %v2001_v52 = vcombine.low %v684_v45, %v685_v55 }
  0x5b   : > { %2315 = vmatpush3.bf16.msra.mxu0 %v2999_v39  ;;  %2335 = vmatprep.subr.bf16.mxu1 %v2999_v39  ;;  %v2010_v49 = vcombine.low %v686_v23, %v687_v44  ;;  %v2019_v50 = vcombine.low %v688_v43, %v689_v22 }
  0x5c   : > { %2316 = vmatprep.subr.bf16.mxu0 %v2490_v11  ;;  %v2018_v8 = vcombine.low %v650_v20, %v657_v16 }
  0x5e   : > { %1565 = vmatmul.mubr.bf16.gmra.mxu0 %v2006_v6  ;;  %2343 = vmatpush3.bf16.msra.mxu1 %v2999_v39  ;;  %v1992_v39 = vcombine.low %v682_v32, %v683_v34 }
  0x5f   : > { %2317 = vmatpush3.bf16.msra.mxu0 %v2490_v11  ;;  %1572 = vmatprep.mubr.bf16.mxu0 %v2016_v13 }
  0x60   : > { %2318 = vmatprep.subr.bf16.mxu0 %v2491_v48  ;;  %2336 = vmatprep.subr.bf16.mxu1 %v2490_v11 }
  0x61   : > { %1630 = vmatmul.mubr.bf16.gmra.mxu1 %v2008_v29 }
  0x62   : > { %2344 = vmatpush3.bf16.msra.mxu1 %v2490_v11  ;;  %1637 = vmatprep.mubr.bf16.mxu1 %v2018_v8 }
  0x63   : > { %2319 = vmatpush3.bf16.msra.mxu0 %v2491_v48  ;;  %2337 = vmatprep.subr.bf16.mxu1 %v2491_v48 }
  0x64   : > { %2320 = vmatprep.subr.bf16.mxu0 %v2499_v37 }
  0x66   : > { %1573 = vmatmul.mubr.bf16.gmra.mxu0 %v2015_v1  ;;  %2345 = vmatpush3.bf16.msra.mxu1 %v2491_v48 }
  0x67   : > { %2321 = vmatpush3.bf16.msra.mxu0 %v2499_v37  ;;  %2324 = vmatprep.mubr.bf16.mxu0 %v1992_v39 }
  0x68   : > { %2322 = vmatprep.subr.bf16.mxu0 %v2500_v41  ;;  %2338 = vmatprep.subr.bf16.mxu1 %v2499_v37 }
  0x69   : > { %1638 = vmatmul.mubr.bf16.gmra.mxu1 %v2017_v46 }
  0x6a   : > { %2346 = vmatpush3.bf16.msra.mxu1 %v2499_v37  ;;  %2328 = vmatprep.mubr.bf16.mxu1 %v2010_v49 }
  0x6b   : > { %2323 = vmatpush3.bf16.msra.mxu0 %v2500_v41  ;;  %2339 = vmatprep.subr.bf16.mxu1 %v2500_v41 }
  0x6e   : > { %2325 = vmatmul.mubr.bf16.vlgmr.msra.gmra.mxu0 %v2001_v52  ;;  %2347 = vmatpush3.bf16.msra.mxu1 %v2500_v41 }
  0x71   : > { %2329 = vmatmul.mubr.bf16.vlgmr.msra.gmra.mxu1 %v2019_v50 }
  0xee   : > { %v2152_v26 = vpop.f32.mrf.mxu0 }
  0xef   : > { %v2192_v58 = vpop.f32.mrf.mxu1 }
  0xf0   : > { %v2153_v60 = vpop.f32.mrf.mxu0 }
  0xf1   : > { %v2193_v18 = vpop.f32.mrf.mxu1  ;;  %v2154_v55 = vadd.f32 %v2153_v60, %v2152_v26 }
  0xf2   : > { %v2155_v61 = vpop.f32.mrf.mxu0  ;;  %v2194_v62 = vadd.f32 %v2193_v18, %v2192_v58 }
  0xf3   : > { %v3090_v35 = vpop.f32.mrf.mxu1 }
  0xf4   : > { %v2156_v0 = vpop.f32.mrf.mxu0 }
  0xf5   : > { %v2196_v57 = vpop.f32.mrf.mxu1 }
  0xf6   : > { %v2158_v11 = vpop.f32.mrf.mxu0 }
  0xf7   : > { %v2198_v4 = vpop.f32.mrf.mxu1 }
  0xf8   : > { %v2159_v9 = vpop.f32.mrf.mxu0 }
  0xf9   : > { %v2199_v3 = vpop.f32.mrf.mxu1  ;;  %v2160_v41 = vadd.f32 %v2159_v9, %v2158_v11  ;;  %v2197_v11 = vadd.f32 %v2196_v57, %v3090_v35 }
  0xfa   : > { %v2161_v54 = vpop.f32.mrf.mxu0  ;;  %v2200_v23 = vadd.f32 %v2199_v3, %v2198_v4 }
  0xfb   : > { %v2201_v47 = vpop.f32.mrf.mxu1 }
  0xfc   : > { %v2162_v5 = vpop.f32.mrf.mxu0  ;;  %v1494_v22 = vadd.f32 %v2200_v23, %v2160_v41 }
  0xfd   : > { %v2202_v42 = vpop.f32.mrf.mxu1  ;;  %v2163_v50 = vadd.f32 %v2162_v5, %v2161_v54 }
  0xfe   : > { %v2164_v56 = vpop.f32.mrf.mxu0 }
  0xff   : > { %v2204_v53 = vpop.f32.mrf.mxu1 }
 0x100   : > { %v2165_v10 = vpop.f32.mrf.mxu0 }
 0x101   : > { %v2205_v6 = vpop.f32.mrf.mxu1  ;;  %v2166_v4 = vadd.f32 %v2165_v10, %v2164_v56 }
 0x102   : > { %v3094_v13 = vpop.f32.mrf.mxu0  ;;  %v2206_v3 = vadd.f32 %v2205_v6, %v2204_v53 }
 0x103   : > { %v3092_v12 = vpop.f32.mrf.mxu1 }
 0x104   : > { %3141 = vst [vmem:[#allocation2_spill] sm:$0xff] %v3092_v12  ;;  %v3098_v7 = vpop.f32.mrf.mxu0  ;;  %v2157_v12 = vadd.f32 %v2156_v0, %v2155_v61  ;;  %v1502_v0 = vadd.f32 %v2206_v3, %v2166_v4 }
 0x105   : > { %v3096_v14 = vpop.f32.mrf.mxu1 }
 0x106   : > { %3142 = vst [vmem:[#allocation3_spill] sm:$0xff] %v3096_v14  ;;  %v2170_v59 = vpop.f32.mrf.mxu0  ;;  %v1489_v61 = vadd.f32 %v2197_v11, %v2157_v12  ;;  %v2092_v12 = vld [vmem:[%s3138_s2] ss:$0 sm:$0xff] }
 0x107   : > { %v2210_v17 = vpop.f32.mrf.mxu1 }
 0x108   : > { %v2171_v15 = vpop.f32.mrf.mxu0 }
 0x109   : > { %v2211_v48 = vpop.f32.mrf.mxu1  ;;  %v2172_v49 = vadd.f32 %v2171_v15, %v2170_v59 }
 0x10a   : > { %v2173_v19 = vpop.f32.mrf.mxu0  ;;  %v2212_v52 = vadd.f32 %v2211_v48, %v2210_v17 }
 0x10b   : > { %v2213_v20 = vpop.f32.mrf.mxu1 }
 0x10c   : > { %v2174_v21 = vpop.f32.mrf.mxu0  ;;  %v1510_v59 = vadd.f32 %v2212_v52, %v2172_v49 }
 0x10d   : > { %v2214_v28 = vpop.f32.mrf.mxu1  ;;  %v2175_v17 = vadd.f32 %v2174_v21, %v2173_v19  ;;  %v2169_v19 = vadd.f32 %v3098_v7, %v3094_v13  ;;  %v3147_v21 = vld [vmem:[#allocation3_spill] sm:$0xff] }
 0x10e   : > { %v2232_v2 = vpop.f32.mrf.mxu0  ;;  %v2215_v48 = vadd.f32 %v2214_v28, %v2213_v20  ;;  %v3146_v20 = vld [vmem:[#allocation2_spill] sm:$0xff] }
 0x10f   : > { %v2209_v28 = vadd.f32 %v3147_v21, %v3146_v20 }
 0x110   : > { %v2233_v16 = vpop.f32.mrf.mxu0 }
 0x111   : > { %v2272_v25 = vpop.f32.mrf.mxu1 }
 0x112   : > { %v2235_v38 = vpop.f32.mrf.mxu0 }
 0x113   : > { %v2273_v33 = vpop.f32.mrf.mxu1 }
 0x114   : > { %v2236_v31 = vpop.f32.mrf.mxu0  ;;  %v2274_v56 = vadd.f32 %v2273_v33, %v2272_v25 }
 0x115   : > { %v3100_v32 = vpop.f32.mrf.mxu1 }
 0x116   : > { %v2238_v29 = vpop.f32.mrf.mxu0  ;;  %3143 = vst [vmem:[#allocation4_spill] sm:$0xff] %v3100_v32  ;;  %v2234_v32 = vadd.f32 %v2233_v16, %v2232_v2 }
 0x117   : > { %v3102_v8 = vpop.f32.mrf.mxu1 }
 0x118   : > { %v2239_v34 = vpop.f32.mrf.mxu0  ;;  %3144 = vst [vmem:[#allocation5_spill] sm:$0xff] %v3102_v8  ;;  %v2203_v8 = vadd.f32 %v2202_v42, %v2201_v47  ;;  %v2237_v42 = vadd.f32 %v2236_v31, %v2235_v38 }
 0x119   : > { %v2278_v30 = vpop.f32.mrf.mxu1  ;;  %v2240_v51 = vadd.f32 %v2239_v34, %v2238_v29 }
 0x11a   : > { %v2241_v63 = vpop.f32.mrf.mxu0  ;;  %v1497_v54 = vadd.f32 %v2203_v8, %v2163_v50  ;;  %v1554_v34 = vadd.f32 %v2237_v42, %v1489_v61 }
 0x11b   : > { %v2279_v24 = vpop.f32.mrf.mxu1  ;;  %v1559_v26 = vadd.f32 %v2240_v51, %v1494_v22  ;;  %v1505_v51 = vadd.f32 %v2209_v28, %v2169_v19 }
 0x11c   : > { %v2242_v37 = vpop.f32.mrf.mxu0  ;;  %v2280_v5 = vadd.f32 %v2279_v24, %v2278_v30 }
 0x11d   : > { %v2281_v1 = vpop.f32.mrf.mxu1  ;;  %v2243_v58 = vadd.f32 %v2242_v37, %v2241_v63  ;;  %v3148_v7 = vld [vmem:[#allocation4_spill] sm:$0xff] }
 0x11e   : > { %v2244_v27 = vpop.f32.mrf.mxu0  ;;  %v1624_v29 = vadd.f32 %v2280_v5, %v1559_v26 }
 0x11f   : > { %v2282_v39 = vpop.f32.mrf.mxu1  ;;  %v1562_v6 = vadd.f32 %v2243_v58, %v1497_v54 }
 0x120   : > { %v2245_v36 = vpop.f32.mrf.mxu0  ;;  %v2283_v8 = vadd.f32 %v2282_v39, %v2281_v1  ;;  %v2093_v1 = vld [vmem:[%s3139_s3] ss:$0 sm:$0xff] }
 0x121   : > { %v3104_v44 = vpop.f32.mrf.mxu1  ;;  %v2246_v35 = vadd.f32 %v2245_v36, %v2244_v27  ;;  %v3149_v36 = vld [vmem:[#allocation5_spill] sm:$0xff] }
 0x122   : > { %v2247_v40 = vpop.f32.mrf.mxu0  ;;  %3145 = vst [vmem:[#allocation6_spill] sm:$0xff] %v3104_v44  ;;  %v1486_v44 = vadd.f32 %v2194_v62, %v2154_v55  ;;  %v2277_v41 = vadd.f32 %v3149_v36, %v3148_v7  ;;  %v1627_v62 = vadd.f32 %v2283_v8, %v1562_v6 }
 0x123   : > { %v2285_v46 = vpop.f32.mrf.mxu1  ;;  %v1567_v30 = vadd.f32 %v2246_v35, %v1502_v0 }
 0x124   : > { %v2248_v45 = vpop.f32.mrf.mxu0  ;;  %v1551_v47 = vadd.f32 %v2234_v32, %v1486_v44  ;;  %v1513_v32 = vadd.f32 %v2215_v48, %v2175_v17  ;;  %v1619_v50 = vadd.f32 %v2277_v41, %v1554_v34 }
 0x125   : > { %v3106_v14 = vpop.f32.mrf.mxu1  ;;  %v2249_v37 = vadd.f32 %v2248_v45, %v2247_v40 }
 0x126   : > { %v2250_v43 = vpop.f32.mrf.mxu0  ;;  %v1616_v63 = vadd.f32 %v2274_v56, %v1551_v47 }
 0x127   : > { %v2288_v60 = vpop.f32.mrf.mxu1  ;;  %v1570_v11 = vadd.f32 %v2249_v37, %v1505_v51 }
 0x128   : > { %v2251_v9 = vpop.f32.mrf.mxu0  ;;  %v2289_v17 = vadd.f32 %v2288_v60, %v3106_v14 }
 0x129   : > { %v2252_v18 = vadd.f32 %v2251_v9, %v2250_v43  ;;  %v2290_v2 = vpop.f32.mrf.mxu1  ;;  %v3150_v49 = vld [vmem:[#allocation6_spill] sm:$0xff] }
 0x12a   : > { %v2253_v15 = vpop.f32.mrf.mxu0  ;;  %v2286_v52 = vadd.f32 %v2285_v46, %v3150_v49  ;;  %v1635_v0 = vadd.f32 %v2289_v17, %v1570_v11 }
 0x12b   : > { %v1575_v57 = vadd.f32 %v2252_v18, %v1510_v59  ;;  %v2291_v10 = vpop.f32.mrf.mxu1 }
 0x12c   : > { %v2254_v53 = vpop.f32.mrf.mxu0  ;;  %v2292_v38 = vadd.f32 %v2291_v10, %v2290_v2  ;;  %v1632_v3 = vadd.f32 %v2286_v52, %v1567_v30 }
 0x12d   : > { %v2255_v16 = vadd.f32 %v2254_v53, %v2253_v15  ;;  %v2293_v25 = vpop.f32.mrf.mxu1 }
 0x12e   : > { %v2326_v31 = vpop.f32.mrf.mxu0  ;;  %v1640_v27 = vadd.f32 %v2292_v38, %v1575_v57 }
 0x12f   : > { %v1689_v33 = vadd.f32 %v2326_v31, %v1624_v29  ;;  %v1578_v24 = vadd.f32 %v2255_v16, %v1513_v32  ;;  %v2294_v23 = vpop.f32.mrf.mxu1 }
 0x130   : > { %v1680_v13 = vpop.f32.mrf.mxu0  ;;  %v2295_v43 = vadd.f32 %v2294_v23, %v2293_v25 }
 0x131   : > { %v1720_v44 = vmul.f32 %v2092_v12, %v1689_v33  ;;  %v1681_v55 = vadd.f32 %v1680_v13, %v1616_v63  ;;  %v2330_v40 = vpop.f32.mrf.mxu1 }
 0x132   : > { %v2327_v39 = vpop.f32.mrf.mxu0  ;;  %v1705_v4 = vadd.f32 %v2330_v40, %v1640_v27  ;;  %v1643_v9 = vadd.f32 %v2295_v43, %v1578_v24 }
 0x133   : > { %v1718_v45 = vmul.f32 %v2092_v12, %v1681_v55  ;;  %v1692_v22 = vadd.f32 %v2327_v39, %v1627_v62  ;;  %v1735_v58 = vadd.f32 %v2093_v1, %v1720_v44  ;;  %v1696_v18 = vpop.f32.mrf.mxu1 }
 0x134   : > { %v1683_v26 = vpop.f32.mrf.mxu0  ;;  %v1724_v48 = vmul.f32 %v2092_v12, %v1705_v4  ;;  %v1697_v15 = vadd.f32 %v1696_v18, %v1632_v3 }
 0x135   : > { %v1721_v59 = vmul.f32 %v2092_v12, %v1692_v22  ;;  %v1684_v46 = vadd.f32 %v1683_v26, %v1619_v50  ;;  %v1733_v54 = vadd.f32 %v2093_v1, %v1718_v45  ;;  %v2331_v42 = vpop.f32.mrf.mxu1  ;;  %v1743_v35 = vmax.f32 %v1735_v58, 0.0 }
 0x136   : > { %v1722_v2 = vmul.f32 %v2092_v12, %v1697_v15  ;;  %v1708_v61 = vadd.f32 %v2331_v42, %v1643_v9  ;;  %v1739_v6 = vadd.f32 %v2093_v1, %v1724_v48 }
 0x137   : > { %v1736_v47 = vadd.f32 %v2093_v1, %v1721_v59  ;;  %v1719_v5 = vmul.f32 %v2092_v12, %v1684_v46  ;;  %v1699_v56 = vpop.f32.mrf.mxu1  ;;  %v1741_v10 = vmax.f32 %v1733_v54, 0.0 }
 0x138   : > { %v1725_v14 = vmul.f32 %v2092_v12, %v1708_v61  ;;  %v1700_v60 = vadd.f32 %v1699_v56, %v1635_v0  ;;  %v1737_v19 = vadd.f32 %v2093_v1, %v1722_v2  ;;  %v1747_v32 = vmax.f32 %v1739_v6, 0.0 }
 0x139   : > { %v1744_v57 = vmax.f32 %v1736_v47, 0.0  ;;  %v1734_v53 = vadd.f32 %v2093_v1, %v1719_v5 }
 0x13a   : > { %v1740_v20 = vadd.f32 %v2093_v1, %v1725_v14  ;;  %v1723_v21 = vmul.f32 %v2092_v12, %v1700_v60  ;;  %v1745_v34 = vmax.f32 %v1737_v19, 0.0 }
 0x13b   : > { %v2121_v16 = vpack.c.bf16 %v1744_v57, %v1743_v35  ;;  %v1742_v29 = vmax.f32 %v1734_v53, 0.0 }
 0x13c   : > { %v1748_v38 = vmax.f32 %v1740_v20, 0.0  ;;  %v1738_v31 = vadd.f32 %v2093_v1, %v1723_v21 }
 0x13d   : > { %2133 = vst [vmem:[%s219_s23 + $0x8] sm:$0xff] %v2121_v16   ;;  %v2116_v28 = vpack.c.bf16 %v1742_v29, %v1741_v10 }
 0x13e   : > { %v2131_v8 = vpack.c.bf16 %v1748_v38, %v1747_v32  ;;  %v1746_v25 = vmax.f32 %v1738_v31, 0.0 }
 0x13f   : > { %2117 = vst [vmem:[%s219_s23] sm:$0xff] %v2116_v28  }
 0x140   : > { %2135 = vst [vmem:[%s219_s23 + $0x18] sm:$0xff] %v2131_v8   ;;  %v2126_v33 = vpack.c.bf16 %v1746_v25, %v1745_v34 }
 0x142   : > { %2134 = vst [vmem:[%s219_s23 + $0x10] sm:$0xff] %v2126_v33  }
 0x143 PF: > { %s14_s17 = sadd.s32 1, %s2527_s17   ;;  %s3151_s15 = smov %s2523_s16 }
 0x144   : > { %p11_p5 = scmp.ge.s32.totalorder %s14_s17, 4   ;;  %s3152_s16 = smov %s3154_s18 }
 0x146   :  { %13 = sbr.rel (!%p11_p5) target bundleno = 2 (0x2), region = 69 }

</bundles_post_ra>
